<compile_context>
chip_gen: v5e
topology: v5e:2x2
jax: 0.10.0
libtpu: 0.0.40
codegen_flags: <defaults>
</compile_context>

<pallas_src>
import jax
import jax.numpy as jnp
from jax.experimental import pallas as pl
from jax.experimental.pallas import tpu as pltpu


# ---------------------------------------------------------------------------
# Kernel
# ---------------------------------------------------------------------------
def _fused_kernel(xp_ref, w1_ref, b1_ref, w2_ref, b2_ref, w3_ref, b3_ref,
                  wfc_ref, bfc_ref, out_ref):
    M = xp_ref.shape[0]          # bt * 64 rows, row r = b*64 + y*8 + x
    bt = M // 64

    # ---- conv1: one lane-dense MXU matmul (input pre-im2col'd in wrapper) --
    a1 = jnp.dot(xp_ref[...], w1_ref[...], preferred_element_type=jnp.float32)
    a1 = jnp.maximum(a1 + b1_ref[...], 0.0)                    # (M, 64) f32

    # ---- boundary masks for the 3x3 taps ----------------------------------
    row = jax.lax.broadcasted_iota(jnp.int32, (M, 1), 0)
    x_pos = row & 7
    y_pos = (row >> 3) & 7
    x_valid = {-1: x_pos >= 1, 0: None, 1: x_pos <= 6}
    y_valid = {-1: y_pos >= 1, 0: None, 1: y_pos <= 6}

    def shift_rows(a, s):
        # t[r, :] = a[(r + s) % M, :] for static int s; wrapped rows are
        # always zeroed by the boundary masks, so wraparound is harmless.
        if s == 0:
            return a
        return jnp.concatenate([a[s:], a[:s]], axis=0)

    def conv3x3(a_f32, w_taps_ref, b_ref):
        """3x3 'same' conv + bias + ReLU via 9 per-tap MXU accumulations."""
        cout = w_taps_ref.shape[-1]
        # 3 x-shifted, x-masked variants (dx = -1, 0, +1).  Only these two
        # +-1-row shifts are sublane-misaligned; the y-shifts below move by
        # +-8 rows (whole f32 vregs).  x-masks commute with y-shifts because
        # x = r & 7 is invariant under shifts by multiples of 8.
        ax = {}
        for dx in (-1, 0, 1):
            t = shift_rows(a_f32, dx)
            if x_valid[dx] is not None:
                t = jnp.where(x_valid[dx], t, 0.0)
            ax[dx] = t
        acc = jnp.zeros((M, cout), jnp.float32)
        for ky in range(3):
            for kx in range(3):
                dy, dx = ky - 1, kx - 1
                t = shift_rows(ax[dx], 8 * dy)
                if y_valid[dy] is not None:
                    t = jnp.where(y_valid[dy], t, 0.0)
                acc = acc + jnp.dot(t.astype(jnp.bfloat16),
                                    w_taps_ref[ky * 3 + kx],
                                    preferred_element_type=jnp.float32)
        return jnp.maximum(acc + b_ref[...], 0.0)

    a2 = conv3x3(a1, w2_ref, b2_ref)                            # (M, 128) f32
    a3 = conv3x3(a2, w3_ref, b3_ref)                            # (M, 128) f32

    # ---- fc (N=4): single pass, single store -------------------------------
    # out[b, n] = sum_{hw, c} a3[b, hw, c] * wfc[n, hw, c] + bfc[n]
    prod = a3.reshape(bt, 1, 64, 128) * wfc_ref[...][None]      # (bt, 4, 64, 128)
    s = jnp.sum(prod, axis=2)                                   # (bt, 4, 128)
    out_ref[...] = jnp.sum(s, axis=2) + bfc_ref[...]            # (bt, 4)


# ---------------------------------------------------------------------------
# Wrapper
# ---------------------------------------------------------------------------
def chess_tactic_cnn_fwd(x_nchw, params):
    """Forward pass. x_nchw: (B, 14, 8, 8) float32, like the PyTorch module."""
    w1m, b1, w2t, b2, w3t, b3, wfc, bfc = params
    B = x_nchw.shape[0]

    # Batch tiling: one grid step for up to 32 boards; 32-board tiles above.
    bt = B if B <= 32 else 32
    pad_b = (-B) % bt
    Bp = B + pad_b
    nb = Bp // bt

    # One-time glue in XLA: NCHW -> NHWC, batch pad, 1-px halo, Cin 14 -> 16,
    # then im2col so conv1 is a plain lane-dense matmul inside the kernel.
    x = jnp.transpose(x_nchw, (0, 2, 3, 1))                     # (B, 8, 8, 14)
    if pad_b:
        x = jnp.pad(x, ((0, pad_b), (0, 0), (0, 0), (0, 0)))
    xpad = jnp.pad(x, ((0, 0), (1, 1), (1, 1), (0, 2)))         # (Bp, 10, 10, 16)
    taps = [xpad[:, ky:ky + 8, kx:kx + 8, :]
            for ky in range(3) for kx in range(3)]
    patches = jnp.concatenate(taps, axis=-1)                    # (Bp, 8, 8, 144)
    patches = patches.reshape(Bp * 64, 144).astype(jnp.bfloat16)

    out = pl.pallas_call(
        _fused_kernel,
        out_shape=jax.ShapeDtypeStruct((Bp, 4), jnp.float32),
        grid_spec=pltpu.PrefetchScalarGridSpec(
            num_scalar_prefetch=0,
            grid=(nb,),
            in_specs=[
                pl.BlockSpec((bt * 64, 144), lambda i: (i, 0)),
                # Weights / biases: constant index_map -> VMEM-resident.
                pl.BlockSpec((144, 64), lambda i: (0, 0)),
                pl.BlockSpec((1, 64), lambda i: (0, 0)),
                pl.BlockSpec((9, 64, 128), lambda i: (0, 0, 0)),
                pl.BlockSpec((1, 128), lambda i: (0, 0)),
                pl.BlockSpec((9, 128, 128), lambda i: (0, 0, 0)),
                pl.BlockSpec((1, 128), lambda i: (0, 0)),
                pl.BlockSpec((4, 64, 128), lambda i: (0, 0, 0)),
                pl.BlockSpec((1, 4), lambda i: (0, 0)),
            ],
            out_specs=pl.BlockSpec((bt, 4), lambda i: (i, 0)),
        ),
        compiler_params=pltpu.CompilerParams(
            dimension_semantics=("parallel",),
            vmem_limit_bytes=32 * 1024 * 1024),
    )(patches, w1m, b1, w2t, b2, w3t, b3, wfc, bfc)
    return out[:B]


# ---------------------------------------------------------------------------
# Parameters (PyTorch layout -> kernel layout)
# ---------------------------------------------------------------------------
def init_pt_params(key):
    """Deterministic synthetic params in the PyTorch module's native layouts."""
    ks = jax.random.split(key, 8)
    w1 = 0.05 * jax.random.normal(ks[0], (64, 14, 3, 3), jnp.float32)     # OIHW
    b1 = 0.05 * jax.random.normal(ks[1], (64,), jnp.float32)
    w2 = 0.05 * jax.random.normal(ks[2], (128, 64, 3, 3), jnp.float32)
    b2 = 0.05 * jax.random.normal(ks[3], (128,), jnp.float32)
    w3 = 0.05 * jax.random.normal(ks[4], (128, 128, 3, 3), jnp.float32)
    b3 = 0.05 * jax.random.normal(ks[5], (128,), jnp.float32)
    wfc = 0.02 * jax.random.normal(ks[6], (4, 128 * 8 * 8), jnp.float32)  # (out, C*H*W)
    bfc = 0.02 * jax.random.normal(ks[7], (4,), jnp.float32)
    return (w1, b1, w2, b2, w3, b3, wfc, bfc)


def prepare_params(pt_params):
    """Convert PyTorch-layout params to the fused kernel's layouts."""
    w1, b1, w2, b2, w3, b3, wfc, bfc = pt_params

    def conv1_mat(w_oihw, pad_cin_to):
        w = jnp.transpose(w_oihw, (2, 3, 1, 0))                      # HWIO
        w = jnp.pad(w, ((0, 0), (0, 0), (0, pad_cin_to - w.shape[2]), (0, 0)))
        kh, kw, cin, cout = w.shape
        return w.reshape(kh * kw * cin, cout).astype(jnp.bfloat16)   # (144, 64)

    def conv_taps(w_oihw):
        w = jnp.transpose(w_oihw, (2, 3, 1, 0))                      # (3,3,Cin,Cout)
        kh, kw, cin, cout = w.shape
        return w.reshape(kh * kw, cin, cout).astype(jnp.bfloat16)    # (9, Cin, Cout)

    w1m = conv1_mat(w1, pad_cin_to=16)      # Cin padded 14 -> 16 (matches wrapper)
    w2t = conv_taps(w2)                     # (9, 64, 128)
    w3t = conv_taps(w3)                     # (9, 128, 128)
    # fc weight: (4, C*H*W) with PyTorch (C, H, W) flatten -> (4, HW, C).
    wfc_k = jnp.transpose(wfc.reshape(4, 128, 8, 8), (0, 2, 3, 1)).reshape(4, 64, 128)
    return (w1m, b1.reshape(1, 64).astype(jnp.float32),
            w2t, b2.reshape(1, 128).astype(jnp.float32),
            w3t, b3.reshape(1, 128).astype(jnp.float32),
            wfc_k.astype(jnp.float32), bfc.reshape(1, 4).astype(jnp.float32))


# ---------------------------------------------------------------------------
# Pure-JAX reference (mirrors the PyTorch module exactly, f32 HIGHEST)
# ---------------------------------------------------------------------------
def _reference(x_nchw, pt_params):
    w1, b1, w2, b2, w3, b3, wfc, bfc = pt_params

    def conv(x, w, b):
        y = jax.lax.conv_general_dilated(
            x, w, (1, 1), "SAME",
            dimension_numbers=("NCHW", "OIHW", "NCHW"),
            precision=jax.lax.Precision.HIGHEST)
        return jax.nn.relu(y + b[None, :, None, None])

    x = conv(x_nchw, w1, b1)
    x = conv(x, w2, b2)
    x = conv(x, w3, b3)
    feat = x.reshape(x.shape[0], -1)                  # PyTorch (C, H, W) flatten
    return jnp.dot(feat, wfc.T, precision=jax.lax.Precision.HIGHEST) + bfc


if __name__ == "__main__":
    key = jax.random.PRNGKey(0)
    k_x, k_p = jax.random.split(key)
    # Chess boards: batch=2, 14 piece/feature planes, 8x8 squares.
    x = jax.random.normal(k_x, (2, 14, 8, 8), jnp.float32)
    pt_params = init_pt_params(k_p)
    k_params = prepare_params(pt_params)

    fwd = jax.jit(chess_tactic_cnn_fwd)
    out = jax.block_until_ready(fwd(x, k_params))

    assert out.shape == (2, 4)
    ref = _reference(x, pt_params)
    # bf16 MXU operands vs an f32 HIGHEST-precision reference => ~1e-2-scale error.
    assert jnp.allclose(out, ref, rtol=3e-2, atol=3e-2), (out, ref)
    print("KERNEL_OK")
</pallas_src>

<mosaic_0001>
module attributes {stable_mosaic.version = 11 : i64} {
  func.func @_fused_kernel(%arg0: i32, %arg1: memref<128x144xbf16, #tpu.memory_space<vmem>>, %arg2: memref<144x64xbf16, #tpu.memory_space<vmem>>, %arg3: memref<1x64xf32, #tpu.memory_space<vmem>>, %arg4: memref<9x64x128xbf16, #tpu.memory_space<vmem>>, %arg5: memref<1x128xf32, #tpu.memory_space<vmem>>, %arg6: memref<9x128x128xbf16, #tpu.memory_space<vmem>>, %arg7: memref<1x128xf32, #tpu.memory_space<vmem>>, %arg8: memref<4x64x128xf32, #tpu.memory_space<vmem>>, %arg9: memref<1x4xf32, #tpu.memory_space<vmem>>, %arg10: memref<2x4xf32, #tpu.memory_space<vmem>>) attributes {dimension_semantics = [#tpu.dimension_semantics<parallel>], iteration_bounds = array<i64: 1>, scalar_prefetch = 0 : i64, scratch_operands = 0 : i64, tpu.core_type = #tpu.core_type<tc>, window_params = [{transform_indices = @transform_0, window_bounds = array<i64: 128, 144>}, {pipeline_mode = #tpu.pipeline_mode<synchronous>, transform_indices = @transform_1, window_bounds = array<i64: 144, 64>}, {pipeline_mode = #tpu.pipeline_mode<synchronous>, transform_indices = @transform_2, window_bounds = array<i64: 1, 64>}, {pipeline_mode = #tpu.pipeline_mode<synchronous>, transform_indices = @transform_3, window_bounds = array<i64: 9, 64, 128>}, {pipeline_mode = #tpu.pipeline_mode<synchronous>, transform_indices = @transform_4, window_bounds = array<i64: 1, 128>}, {pipeline_mode = #tpu.pipeline_mode<synchronous>, transform_indices = @transform_5, window_bounds = array<i64: 9, 128, 128>}, {pipeline_mode = #tpu.pipeline_mode<synchronous>, transform_indices = @transform_6, window_bounds = array<i64: 1, 128>}, {pipeline_mode = #tpu.pipeline_mode<synchronous>, transform_indices = @transform_7, window_bounds = array<i64: 4, 64, 128>}, {pipeline_mode = #tpu.pipeline_mode<synchronous>, transform_indices = @transform_8, window_bounds = array<i64: 1, 4>}, {transform_indices = @transform_9, window_bounds = array<i64: 2, 4>}]} {
    %c0 = arith.constant 0 : index
    %c0_0 = arith.constant 0 : index
    %0 = vector.load %arg1[%c0, %c0_0] : memref<128x144xbf16, #tpu.memory_space<vmem>>, vector<128x144xbf16>
    %c0_1 = arith.constant 0 : index
    %c0_2 = arith.constant 0 : index
    %1 = vector.load %arg2[%c0_1, %c0_2] : memref<144x64xbf16, #tpu.memory_space<vmem>>, vector<144x64xbf16>
    %cst = arith.constant dense<0.000000e+00> : vector<128x64xf32>
    %2 = tpu.matmul %0, %1, %cst {dimension_numbers = #tpu.dot_dimension_numbers<[1], [0], [0], [1], [0, 0, 1, 1], [], []>} : vector<128x144xbf16>, vector<144x64xbf16>, vector<128x64xf32> -> vector<128x64xf32>
    %c0_3 = arith.constant 0 : index
    %c0_4 = arith.constant 0 : index
    %3 = vector.load %arg3[%c0_3, %c0_4] : memref<1x64xf32, #tpu.memory_space<vmem>>, vector<1x64xf32>
    %4 = vector.broadcast %3 : vector<1x64xf32> to vector<128x64xf32>
    %5 = arith.addf %2, %4 : vector<128x64xf32>
    %cst_5 = arith.constant 0.000000e+00 : f32
    %6 = vector.broadcast %cst_5 : f32 to vector<128x64xf32>
    %7 = arith.maximumf %5, %6 : vector<128x64xf32>
    %8 = tpu.iota {dimensions = array<i32: 0>} : vector<128x1xi32>
    %c7_i32 = arith.constant 7 : i32
    %9 = vector.broadcast %c7_i32 : i32 to vector<128x1xi32>
    %10 = arith.andi %8, %9 : vector<128x1xi32>
    %c3_i32 = arith.constant 3 : i32
    %11 = vector.broadcast %c3_i32 : i32 to vector<128x1xi32>
    %12 = arith.shrsi %8, %11 : vector<128x1xi32>
    %c7_i32_6 = arith.constant 7 : i32
    %13 = vector.broadcast %c7_i32_6 : i32 to vector<128x1xi32>
    %14 = arith.andi %12, %13 : vector<128x1xi32>
    %c1_i32 = arith.constant 1 : i32
    %15 = vector.broadcast %c1_i32 : i32 to vector<128x1xi32>
    %16 = arith.cmpi sge, %10, %15 : vector<128x1xi32>
    %c6_i32 = arith.constant 6 : i32
    %17 = vector.broadcast %c6_i32 : i32 to vector<128x1xi32>
    %18 = arith.cmpi sle, %10, %17 : vector<128x1xi32>
    %c1_i32_7 = arith.constant 1 : i32
    %19 = vector.broadcast %c1_i32_7 : i32 to vector<128x1xi32>
    %20 = arith.cmpi sge, %14, %19 : vector<128x1xi32>
    %c6_i32_8 = arith.constant 6 : i32
    %21 = vector.broadcast %c6_i32_8 : i32 to vector<128x1xi32>
    %22 = arith.cmpi sle, %14, %21 : vector<128x1xi32>
    %23 = vector.extract_strided_slice %7 {offsets = [127, 0], sizes = [1, 64], strides = [1, 1]} : vector<128x64xf32> to vector<1x64xf32>
    %24 = vector.extract_strided_slice %7 {offsets = [0, 0], sizes = [127, 64], strides = [1, 1]} : vector<128x64xf32> to vector<127x64xf32>
    %25 = tpu.concatenate %23, %24 in 0 : vector<1x64xf32>, vector<127x64xf32> -> vector<128x64xf32>
    %cst_9 = arith.constant 0.000000e+00 : f32
    %26 = vector.shape_cast %16 : vector<128x1xi1> to vector<128x1xi1>
    %27 = vector.broadcast %26 : vector<128x1xi1> to vector<128x64xi1>
    %28 = vector.broadcast %cst_9 : f32 to vector<128x64xf32>
    %29 = arith.select %27, %25, %28 : vector<128x64xi1>, vector<128x64xf32>
    %30 = vector.extract_strided_slice %7 {offsets = [1, 0], sizes = [127, 64], strides = [1, 1]} : vector<128x64xf32> to vector<127x64xf32>
    %31 = vector.extract_strided_slice %7 {offsets = [0, 0], sizes = [1, 64], strides = [1, 1]} : vector<128x64xf32> to vector<1x64xf32>
    %32 = tpu.concatenate %30, %31 in 0 : vector<127x64xf32>, vector<1x64xf32> -> vector<128x64xf32>
    %cst_10 = arith.constant 0.000000e+00 : f32
    %33 = vector.shape_cast %18 : vector<128x1xi1> to vector<128x1xi1>
    %34 = vector.broadcast %33 : vector<128x1xi1> to vector<128x64xi1>
    %35 = vector.broadcast %cst_10 : f32 to vector<128x64xf32>
    %36 = arith.select %34, %32, %35 : vector<128x64xi1>, vector<128x64xf32>
    %cst_11 = arith.constant 0.000000e+00 : f32
    %37 = vector.broadcast %cst_11 : f32 to vector<128x128xf32>
    %38 = vector.extract_strided_slice %29 {offsets = [120, 0], sizes = [8, 64], strides = [1, 1]} : vector<128x64xf32> to vector<8x64xf32>
    %39 = vector.extract_strided_slice %29 {offsets = [0, 0], sizes = [120, 64], strides = [1, 1]} : vector<128x64xf32> to vector<120x64xf32>
    %40 = tpu.concatenate %38, %39 in 0 : vector<8x64xf32>, vector<120x64xf32> -> vector<128x64xf32>
    %cst_12 = arith.constant 0.000000e+00 : f32
    %41 = vector.shape_cast %20 : vector<128x1xi1> to vector<128x1xi1>
    %42 = vector.broadcast %41 : vector<128x1xi1> to vector<128x64xi1>
    %43 = vector.broadcast %cst_12 : f32 to vector<128x64xf32>
    %44 = arith.select %42, %40, %43 : vector<128x64xi1>, vector<128x64xf32>
    %45 = arith.truncf %44 : vector<128x64xf32> to vector<128x64xbf16>
    %c0_13 = arith.constant 0 : index
    %c0_14 = arith.constant 0 : index
    %c0_15 = arith.constant 0 : index
    %46 = vector.load %arg4[%c0_13, %c0_14, %c0_15] : memref<9x64x128xbf16, #tpu.memory_space<vmem>>, vector<1x64x128xbf16>
    %47 = vector.shape_cast %46 : vector<1x64x128xbf16> to vector<64x128xbf16>
    %cst_16 = arith.constant dense<0.000000e+00> : vector<128x128xf32>
    %48 = tpu.matmul %45, %47, %cst_16 {dimension_numbers = #tpu.dot_dimension_numbers<[1], [0], [0], [1], [0, 0, 1, 1], [], []>} : vector<128x64xbf16>, vector<64x128xbf16>, vector<128x128xf32> -> vector<128x128xf32>
    %49 = arith.addf %37, %48 : vector<128x128xf32>
    %50 = vector.extract_strided_slice %7 {offsets = [120, 0], sizes = [8, 64], strides = [1, 1]} : vector<128x64xf32> to vector<8x64xf32>
    %51 = vector.extract_strided_slice %7 {offsets = [0, 0], sizes = [120, 64], strides = [1, 1]} : vector<128x64xf32> to vector<120x64xf32>
    %52 = tpu.concatenate %50, %51 in 0 : vector<8x64xf32>, vector<120x64xf32> -> vector<128x64xf32>
    %cst_17 = arith.constant 0.000000e+00 : f32
    %53 = vector.shape_cast %20 : vector<128x1xi1> to vector<128x1xi1>
    %54 = vector.broadcast %53 : vector<128x1xi1> to vector<128x64xi1>
    %55 = vector.broadcast %cst_17 : f32 to vector<128x64xf32>
    %56 = arith.select %54, %52, %55 : vector<128x64xi1>, vector<128x64xf32>
    %57 = arith.truncf %56 : vector<128x64xf32> to vector<128x64xbf16>
    %c1 = arith.constant 1 : index
    %c0_18 = arith.constant 0 : index
    %c0_19 = arith.constant 0 : index
    %58 = vector.load %arg4[%c1, %c0_18, %c0_19] : memref<9x64x128xbf16, #tpu.memory_space<vmem>>, vector<1x64x128xbf16>
    %59 = vector.shape_cast %58 : vector<1x64x128xbf16> to vector<64x128xbf16>
    %cst_20 = arith.constant dense<0.000000e+00> : vector<128x128xf32>
    %60 = tpu.matmul %57, %59, %cst_20 {dimension_numbers = #tpu.dot_dimension_numbers<[1], [0], [0], [1], [0, 0, 1, 1], [], []>} : vector<128x64xbf16>, vector<64x128xbf16>, vector<128x128xf32> -> vector<128x128xf32>
    %61 = arith.addf %49, %60 : vector<128x128xf32>
    %62 = vector.extract_strided_slice %36 {offsets = [120, 0], sizes = [8, 64], strides = [1, 1]} : vector<128x64xf32> to vector<8x64xf32>
    %63 = vector.extract_strided_slice %36 {offsets = [0, 0], sizes = [120, 64], strides = [1, 1]} : vector<128x64xf32> to vector<120x64xf32>
    %64 = tpu.concatenate %62, %63 in 0 : vector<8x64xf32>, vector<120x64xf32> -> vector<128x64xf32>
    %cst_21 = arith.constant 0.000000e+00 : f32
    %65 = vector.shape_cast %20 : vector<128x1xi1> to vector<128x1xi1>
    %66 = vector.broadcast %65 : vector<128x1xi1> to vector<128x64xi1>
    %67 = vector.broadcast %cst_21 : f32 to vector<128x64xf32>
    %68 = arith.select %66, %64, %67 : vector<128x64xi1>, vector<128x64xf32>
    %69 = arith.truncf %68 : vector<128x64xf32> to vector<128x64xbf16>
    %c2 = arith.constant 2 : index
    %c0_22 = arith.constant 0 : index
    %c0_23 = arith.constant 0 : index
    %70 = vector.load %arg4[%c2, %c0_22, %c0_23] : memref<9x64x128xbf16, #tpu.memory_space<vmem>>, vector<1x64x128xbf16>
    %71 = vector.shape_cast %70 : vector<1x64x128xbf16> to vector<64x128xbf16>
    %cst_24 = arith.constant dense<0.000000e+00> : vector<128x128xf32>
    %72 = tpu.matmul %69, %71, %cst_24 {dimension_numbers = #tpu.dot_dimension_numbers<[1], [0], [0], [1], [0, 0, 1, 1], [], []>} : vector<128x64xbf16>, vector<64x128xbf16>, vector<128x128xf32> -> vector<128x128xf32>
    %73 = arith.addf %61, %72 : vector<128x128xf32>
    %74 = arith.truncf %29 : vector<128x64xf32> to vector<128x64xbf16>
    %c3 = arith.constant 3 : index
    %c0_25 = arith.constant 0 : index
    %c0_26 = arith.constant 0 : index
    %75 = vector.load %arg4[%c3, %c0_25, %c0_26] : memref<9x64x128xbf16, #tpu.memory_space<vmem>>, vector<1x64x128xbf16>
    %76 = vector.shape_cast %75 : vector<1x64x128xbf16> to vector<64x128xbf16>
    %cst_27 = arith.constant dense<0.000000e+00> : vector<128x128xf32>
    %77 = tpu.matmul %74, %76, %cst_27 {dimension_numbers = #tpu.dot_dimension_numbers<[1], [0], [0], [1], [0, 0, 1, 1], [], []>} : vector<128x64xbf16>, vector<64x128xbf16>, vector<128x128xf32> -> vector<128x128xf32>
    %78 = arith.addf %73, %77 : vector<128x128xf32>
    %79 = arith.truncf %7 : vector<128x64xf32> to vector<128x64xbf16>
    %c4 = arith.constant 4 : index
    %c0_28 = arith.constant 0 : index
    %c0_29 = arith.constant 0 : index
    %80 = vector.load %arg4[%c4, %c0_28, %c0_29] : memref<9x64x128xbf16, #tpu.memory_space<vmem>>, vector<1x64x128xbf16>
    %81 = vector.shape_cast %80 : vector<1x64x128xbf16> to vector<64x128xbf16>
    %cst_30 = arith.constant dense<0.000000e+00> : vector<128x128xf32>
    %82 = tpu.matmul %79, %81, %cst_30 {dimension_numbers = #tpu.dot_dimension_numbers<[1], [0], [0], [1], [0, 0, 1, 1], [], []>} : vector<128x64xbf16>, vector<64x128xbf16>, vector<128x128xf32> -> vector<128x128xf32>
    %83 = arith.addf %78, %82 : vector<128x128xf32>
    %84 = arith.truncf %36 : vector<128x64xf32> to vector<128x64xbf16>
    %c5 = arith.constant 5 : index
    %c0_31 = arith.constant 0 : index
    %c0_32 = arith.constant 0 : index
    %85 = vector.load %arg4[%c5, %c0_31, %c0_32] : memref<9x64x128xbf16, #tpu.memory_space<vmem>>, vector<1x64x128xbf16>
    %86 = vector.shape_cast %85 : vector<1x64x128xbf16> to vector<64x128xbf16>
    %cst_33 = arith.constant dense<0.000000e+00> : vector<128x128xf32>
    %87 = tpu.matmul %84, %86, %cst_33 {dimension_numbers = #tpu.dot_dimension_numbers<[1], [0], [0], [1], [0, 0, 1, 1], [], []>} : vector<128x64xbf16>, vector<64x128xbf16>, vector<128x128xf32> -> vector<128x128xf32>
    %88 = arith.addf %83, %87 : vector<128x128xf32>
    %89 = vector.extract_strided_slice %29 {offsets = [8, 0], sizes = [120, 64], strides = [1, 1]} : vector<128x64xf32> to vector<120x64xf32>
    %90 = vector.extract_strided_slice %29 {offsets = [0, 0], sizes = [8, 64], strides = [1, 1]} : vector<128x64xf32> to vector<8x64xf32>
    %91 = tpu.concatenate %89, %90 in 0 : vector<120x64xf32>, vector<8x64xf32> -> vector<128x64xf32>
    %cst_34 = arith.constant 0.000000e+00 : f32
    %92 = vector.shape_cast %22 : vector<128x1xi1> to vector<128x1xi1>
    %93 = vector.broadcast %92 : vector<128x1xi1> to vector<128x64xi1>
    %94 = vector.broadcast %cst_34 : f32 to vector<128x64xf32>
    %95 = arith.select %93, %91, %94 : vector<128x64xi1>, vector<128x64xf32>
    %96 = arith.truncf %95 : vector<128x64xf32> to vector<128x64xbf16>
    %c6 = arith.constant 6 : index
    %c0_35 = arith.constant 0 : index
    %c0_36 = arith.constant 0 : index
    %97 = vector.load %arg4[%c6, %c0_35, %c0_36] : memref<9x64x128xbf16, #tpu.memory_space<vmem>>, vector<1x64x128xbf16>
    %98 = vector.shape_cast %97 : vector<1x64x128xbf16> to vector<64x128xbf16>
    %cst_37 = arith.constant dense<0.000000e+00> : vector<128x128xf32>
    %99 = tpu.matmul %96, %98, %cst_37 {dimension_numbers = #tpu.dot_dimension_numbers<[1], [0], [0], [1], [0, 0, 1, 1], [], []>} : vector<128x64xbf16>, vector<64x128xbf16>, vector<128x128xf32> -> vector<128x128xf32>
    %100 = arith.addf %88, %99 : vector<128x128xf32>
    %101 = vector.extract_strided_slice %7 {offsets = [8, 0], sizes = [120, 64], strides = [1, 1]} : vector<128x64xf32> to vector<120x64xf32>
    %102 = vector.extract_strided_slice %7 {offsets = [0, 0], sizes = [8, 64], strides = [1, 1]} : vector<128x64xf32> to vector<8x64xf32>
    %103 = tpu.concatenate %101, %102 in 0 : vector<120x64xf32>, vector<8x64xf32> -> vector<128x64xf32>
    %cst_38 = arith.constant 0.000000e+00 : f32
    %104 = vector.shape_cast %22 : vector<128x1xi1> to vector<128x1xi1>
    %105 = vector.broadcast %104 : vector<128x1xi1> to vector<128x64xi1>
    %106 = vector.broadcast %cst_38 : f32 to vector<128x64xf32>
    %107 = arith.select %105, %103, %106 : vector<128x64xi1>, vector<128x64xf32>
    %108 = arith.truncf %107 : vector<128x64xf32> to vector<128x64xbf16>
    %c7 = arith.constant 7 : index
    %c0_39 = arith.constant 0 : index
    %c0_40 = arith.constant 0 : index
    %109 = vector.load %arg4[%c7, %c0_39, %c0_40] : memref<9x64x128xbf16, #tpu.memory_space<vmem>>, vector<1x64x128xbf16>
    %110 = vector.shape_cast %109 : vector<1x64x128xbf16> to vector<64x128xbf16>
    %cst_41 = arith.constant dense<0.000000e+00> : vector<128x128xf32>
    %111 = tpu.matmul %108, %110, %cst_41 {dimension_numbers = #tpu.dot_dimension_numbers<[1], [0], [0], [1], [0, 0, 1, 1], [], []>} : vector<128x64xbf16>, vector<64x128xbf16>, vector<128x128xf32> -> vector<128x128xf32>
    %112 = arith.addf %100, %111 : vector<128x128xf32>
    %113 = vector.extract_strided_slice %36 {offsets = [8, 0], sizes = [120, 64], strides = [1, 1]} : vector<128x64xf32> to vector<120x64xf32>
    %114 = vector.extract_strided_slice %36 {offsets = [0, 0], sizes = [8, 64], strides = [1, 1]} : vector<128x64xf32> to vector<8x64xf32>
    %115 = tpu.concatenate %113, %114 in 0 : vector<120x64xf32>, vector<8x64xf32> -> vector<128x64xf32>
    %cst_42 = arith.constant 0.000000e+00 : f32
    %116 = vector.shape_cast %22 : vector<128x1xi1> to vector<128x1xi1>
    %117 = vector.broadcast %116 : vector<128x1xi1> to vector<128x64xi1>
    %118 = vector.broadcast %cst_42 : f32 to vector<128x64xf32>
    %119 = arith.select %117, %115, %118 : vector<128x64xi1>, vector<128x64xf32>
    %120 = arith.truncf %119 : vector<128x64xf32> to vector<128x64xbf16>
    %c8 = arith.constant 8 : index
    %c0_43 = arith.constant 0 : index
    %c0_44 = arith.constant 0 : index
    %121 = vector.load %arg4[%c8, %c0_43, %c0_44] : memref<9x64x128xbf16, #tpu.memory_space<vmem>>, vector<1x64x128xbf16>
    %122 = vector.shape_cast %121 : vector<1x64x128xbf16> to vector<64x128xbf16>
    %cst_45 = arith.constant dense<0.000000e+00> : vector<128x128xf32>
    %123 = tpu.matmul %120, %122, %cst_45 {dimension_numbers = #tpu.dot_dimension_numbers<[1], [0], [0], [1], [0, 0, 1, 1], [], []>} : vector<128x64xbf16>, vector<64x128xbf16>, vector<128x128xf32> -> vector<128x128xf32>
    %124 = arith.addf %112, %123 : vector<128x128xf32>
    %c0_46 = arith.constant 0 : index
    %c0_47 = arith.constant 0 : index
    %125 = vector.load %arg5[%c0_46, %c0_47] : memref<1x128xf32, #tpu.memory_space<vmem>>, vector<1x128xf32>
    %126 = vector.broadcast %125 : vector<1x128xf32> to vector<128x128xf32>
    %127 = arith.addf %124, %126 : vector<128x128xf32>
    %cst_48 = arith.constant 0.000000e+00 : f32
    %128 = vector.broadcast %cst_48 : f32 to vector<128x128xf32>
    %129 = arith.maximumf %127, %128 : vector<128x128xf32>
    %130 = vector.extract_strided_slice %129 {offsets = [127, 0], sizes = [1, 128], strides = [1, 1]} : vector<128x128xf32> to vector<1x128xf32>
    %131 = vector.extract_strided_slice %129 {offsets = [0, 0], sizes = [127, 128], strides = [1, 1]} : vector<128x128xf32> to vector<127x128xf32>
    %132 = tpu.concatenate %130, %131 in 0 : vector<1x128xf32>, vector<127x128xf32> -> vector<128x128xf32>
    %cst_49 = arith.constant 0.000000e+00 : f32
    %133 = vector.shape_cast %16 : vector<128x1xi1> to vector<128x1xi1>
    %134 = vector.broadcast %133 : vector<128x1xi1> to vector<128x128xi1>
    %135 = vector.broadcast %cst_49 : f32 to vector<128x128xf32>
    %136 = arith.select %134, %132, %135 : vector<128x128xi1>, vector<128x128xf32>
    %137 = vector.extract_strided_slice %129 {offsets = [1, 0], sizes = [127, 128], strides = [1, 1]} : vector<128x128xf32> to vector<127x128xf32>
    %138 = vector.extract_strided_slice %129 {offsets = [0, 0], sizes = [1, 128], strides = [1, 1]} : vector<128x128xf32> to vector<1x128xf32>
    %139 = tpu.concatenate %137, %138 in 0 : vector<127x128xf32>, vector<1x128xf32> -> vector<128x128xf32>
    %cst_50 = arith.constant 0.000000e+00 : f32
    %140 = vector.shape_cast %18 : vector<128x1xi1> to vector<128x1xi1>
    %141 = vector.broadcast %140 : vector<128x1xi1> to vector<128x128xi1>
    %142 = vector.broadcast %cst_50 : f32 to vector<128x128xf32>
    %143 = arith.select %141, %139, %142 : vector<128x128xi1>, vector<128x128xf32>
    %cst_51 = arith.constant 0.000000e+00 : f32
    %144 = vector.broadcast %cst_51 : f32 to vector<128x128xf32>
    %145 = vector.extract_strided_slice %136 {offsets = [120, 0], sizes = [8, 128], strides = [1, 1]} : vector<128x128xf32> to vector<8x128xf32>
    %146 = vector.extract_strided_slice %136 {offsets = [0, 0], sizes = [120, 128], strides = [1, 1]} : vector<128x128xf32> to vector<120x128xf32>
    %147 = tpu.concatenate %145, %146 in 0 : vector<8x128xf32>, vector<120x128xf32> -> vector<128x128xf32>
    %cst_52 = arith.constant 0.000000e+00 : f32
    %148 = vector.shape_cast %20 : vector<128x1xi1> to vector<128x1xi1>
    %149 = vector.broadcast %148 : vector<128x1xi1> to vector<128x128xi1>
    %150 = vector.broadcast %cst_52 : f32 to vector<128x128xf32>
    %151 = arith.select %149, %147, %150 : vector<128x128xi1>, vector<128x128xf32>
    %152 = arith.truncf %151 : vector<128x128xf32> to vector<128x128xbf16>
    %c0_53 = arith.constant 0 : index
    %c0_54 = arith.constant 0 : index
    %c0_55 = arith.constant 0 : index
    %153 = vector.load %arg6[%c0_53, %c0_54, %c0_55] : memref<9x128x128xbf16, #tpu.memory_space<vmem>>, vector<1x128x128xbf16>
    %154 = vector.shape_cast %153 : vector<1x128x128xbf16> to vector<128x128xbf16>
    %cst_56 = arith.constant dense<0.000000e+00> : vector<128x128xf32>
    %155 = tpu.matmul %152, %154, %cst_56 {dimension_numbers = #tpu.dot_dimension_numbers<[1], [0], [0], [1], [0, 0, 1, 1], [], []>} : vector<128x128xbf16>, vector<128x128xbf16>, vector<128x128xf32> -> vector<128x128xf32>
    %156 = arith.addf %144, %155 : vector<128x128xf32>
    %157 = vector.extract_strided_slice %129 {offsets = [120, 0], sizes = [8, 128], strides = [1, 1]} : vector<128x128xf32> to vector<8x128xf32>
    %158 = vector.extract_strided_slice %129 {offsets = [0, 0], sizes = [120, 128], strides = [1, 1]} : vector<128x128xf32> to vector<120x128xf32>
    %159 = tpu.concatenate %157, %158 in 0 : vector<8x128xf32>, vector<120x128xf32> -> vector<128x128xf32>
    %cst_57 = arith.constant 0.000000e+00 : f32
    %160 = vector.shape_cast %20 : vector<128x1xi1> to vector<128x1xi1>
    %161 = vector.broadcast %160 : vector<128x1xi1> to vector<128x128xi1>
    %162 = vector.broadcast %cst_57 : f32 to vector<128x128xf32>
    %163 = arith.select %161, %159, %162 : vector<128x128xi1>, vector<128x128xf32>
    %164 = arith.truncf %163 : vector<128x128xf32> to vector<128x128xbf16>
    %c1_58 = arith.constant 1 : index
    %c0_59 = arith.constant 0 : index
    %c0_60 = arith.constant 0 : index
    %165 = vector.load %arg6[%c1_58, %c0_59, %c0_60] : memref<9x128x128xbf16, #tpu.memory_space<vmem>>, vector<1x128x128xbf16>
    %166 = vector.shape_cast %165 : vector<1x128x128xbf16> to vector<128x128xbf16>
    %cst_61 = arith.constant dense<0.000000e+00> : vector<128x128xf32>
    %167 = tpu.matmul %164, %166, %cst_61 {dimension_numbers = #tpu.dot_dimension_numbers<[1], [0], [0], [1], [0, 0, 1, 1], [], []>} : vector<128x128xbf16>, vector<128x128xbf16>, vector<128x128xf32> -> vector<128x128xf32>
    %168 = arith.addf %156, %167 : vector<128x128xf32>
    %169 = vector.extract_strided_slice %143 {offsets = [120, 0], sizes = [8, 128], strides = [1, 1]} : vector<128x128xf32> to vector<8x128xf32>
    %170 = vector.extract_strided_slice %143 {offsets = [0, 0], sizes = [120, 128], strides = [1, 1]} : vector<128x128xf32> to vector<120x128xf32>
    %171 = tpu.concatenate %169, %170 in 0 : vector<8x128xf32>, vector<120x128xf32> -> vector<128x128xf32>
    %cst_62 = arith.constant 0.000000e+00 : f32
    %172 = vector.shape_cast %20 : vector<128x1xi1> to vector<128x1xi1>
    %173 = vector.broadcast %172 : vector<128x1xi1> to vector<128x128xi1>
    %174 = vector.broadcast %cst_62 : f32 to vector<128x128xf32>
    %175 = arith.select %173, %171, %174 : vector<128x128xi1>, vector<128x128xf32>
    %176 = arith.truncf %175 : vector<128x128xf32> to vector<128x128xbf16>
    %c2_63 = arith.constant 2 : index
    %c0_64 = arith.constant 0 : index
    %c0_65 = arith.constant 0 : index
    %177 = vector.load %arg6[%c2_63, %c0_64, %c0_65] : memref<9x128x128xbf16, #tpu.memory_space<vmem>>, vector<1x128x128xbf16>
    %178 = vector.shape_cast %177 : vector<1x128x128xbf16> to vector<128x128xbf16>
    %cst_66 = arith.constant dense<0.000000e+00> : vector<128x128xf32>
    %179 = tpu.matmul %176, %178, %cst_66 {dimension_numbers = #tpu.dot_dimension_numbers<[1], [0], [0], [1], [0, 0, 1, 1], [], []>} : vector<128x128xbf16>, vector<128x128xbf16>, vector<128x128xf32> -> vector<128x128xf32>
    %180 = arith.addf %168, %179 : vector<128x128xf32>
    %181 = arith.truncf %136 : vector<128x128xf32> to vector<128x128xbf16>
    %c3_67 = arith.constant 3 : index
    %c0_68 = arith.constant 0 : index
    %c0_69 = arith.constant 0 : index
    %182 = vector.load %arg6[%c3_67, %c0_68, %c0_69] : memref<9x128x128xbf16, #tpu.memory_space<vmem>>, vector<1x128x128xbf16>
    %183 = vector.shape_cast %182 : vector<1x128x128xbf16> to vector<128x128xbf16>
    %cst_70 = arith.constant dense<0.000000e+00> : vector<128x128xf32>
    %184 = tpu.matmul %181, %183, %cst_70 {dimension_numbers = #tpu.dot_dimension_numbers<[1], [0], [0], [1], [0, 0, 1, 1], [], []>} : vector<128x128xbf16>, vector<128x128xbf16>, vector<128x128xf32> -> vector<128x128xf32>
    %185 = arith.addf %180, %184 : vector<128x128xf32>
    %186 = arith.truncf %129 : vector<128x128xf32> to vector<128x128xbf16>
    %c4_71 = arith.constant 4 : index
    %c0_72 = arith.constant 0 : index
    %c0_73 = arith.constant 0 : index
    %187 = vector.load %arg6[%c4_71, %c0_72, %c0_73] : memref<9x128x128xbf16, #tpu.memory_space<vmem>>, vector<1x128x128xbf16>
    %188 = vector.shape_cast %187 : vector<1x128x128xbf16> to vector<128x128xbf16>
    %cst_74 = arith.constant dense<0.000000e+00> : vector<128x128xf32>
    %189 = tpu.matmul %186, %188, %cst_74 {dimension_numbers = #tpu.dot_dimension_numbers<[1], [0], [0], [1], [0, 0, 1, 1], [], []>} : vector<128x128xbf16>, vector<128x128xbf16>, vector<128x128xf32> -> vector<128x128xf32>
    %190 = arith.addf %185, %189 : vector<128x128xf32>
    %191 = arith.truncf %143 : vector<128x128xf32> to vector<128x128xbf16>
    %c5_75 = arith.constant 5 : index
    %c0_76 = arith.constant 0 : index
    %c0_77 = arith.constant 0 : index
    %192 = vector.load %arg6[%c5_75, %c0_76, %c0_77] : memref<9x128x128xbf16, #tpu.memory_space<vmem>>, vector<1x128x128xbf16>
    %193 = vector.shape_cast %192 : vector<1x128x128xbf16> to vector<128x128xbf16>
    %cst_78 = arith.constant dense<0.000000e+00> : vector<128x128xf32>
    %194 = tpu.matmul %191, %193, %cst_78 {dimension_numbers = #tpu.dot_dimension_numbers<[1], [0], [0], [1], [0, 0, 1, 1], [], []>} : vector<128x128xbf16>, vector<128x128xbf16>, vector<128x128xf32> -> vector<128x128xf32>
    %195 = arith.addf %190, %194 : vector<128x128xf32>
    %196 = vector.extract_strided_slice %136 {offsets = [8, 0], sizes = [120, 128], strides = [1, 1]} : vector<128x128xf32> to vector<120x128xf32>
    %197 = vector.extract_strided_slice %136 {offsets = [0, 0], sizes = [8, 128], strides = [1, 1]} : vector<128x128xf32> to vector<8x128xf32>
    %198 = tpu.concatenate %196, %197 in 0 : vector<120x128xf32>, vector<8x128xf32> -> vector<128x128xf32>
    %cst_79 = arith.constant 0.000000e+00 : f32
    %199 = vector.shape_cast %22 : vector<128x1xi1> to vector<128x1xi1>
    %200 = vector.broadcast %199 : vector<128x1xi1> to vector<128x128xi1>
    %201 = vector.broadcast %cst_79 : f32 to vector<128x128xf32>
    %202 = arith.select %200, %198, %201 : vector<128x128xi1>, vector<128x128xf32>
    %203 = arith.truncf %202 : vector<128x128xf32> to vector<128x128xbf16>
    %c6_80 = arith.constant 6 : index
    %c0_81 = arith.constant 0 : index
    %c0_82 = arith.constant 0 : index
    %204 = vector.load %arg6[%c6_80, %c0_81, %c0_82] : memref<9x128x128xbf16, #tpu.memory_space<vmem>>, vector<1x128x128xbf16>
    %205 = vector.shape_cast %204 : vector<1x128x128xbf16> to vector<128x128xbf16>
    %cst_83 = arith.constant dense<0.000000e+00> : vector<128x128xf32>
    %206 = tpu.matmul %203, %205, %cst_83 {dimension_numbers = #tpu.dot_dimension_numbers<[1], [0], [0], [1], [0, 0, 1, 1], [], []>} : vector<128x128xbf16>, vector<128x128xbf16>, vector<128x128xf32> -> vector<128x128xf32>
    %207 = arith.addf %195, %206 : vector<128x128xf32>
    %208 = vector.extract_strided_slice %129 {offsets = [8, 0], sizes = [120, 128], strides = [1, 1]} : vector<128x128xf32> to vector<120x128xf32>
    %209 = vector.extract_strided_slice %129 {offsets = [0, 0], sizes = [8, 128], strides = [1, 1]} : vector<128x128xf32> to vector<8x128xf32>
    %210 = tpu.concatenate %208, %209 in 0 : vector<120x128xf32>, vector<8x128xf32> -> vector<128x128xf32>
    %cst_84 = arith.constant 0.000000e+00 : f32
    %211 = vector.shape_cast %22 : vector<128x1xi1> to vector<128x1xi1>
    %212 = vector.broadcast %211 : vector<128x1xi1> to vector<128x128xi1>
    %213 = vector.broadcast %cst_84 : f32 to vector<128x128xf32>
    %214 = arith.select %212, %210, %213 : vector<128x128xi1>, vector<128x128xf32>
    %215 = arith.truncf %214 : vector<128x128xf32> to vector<128x128xbf16>
    %c7_85 = arith.constant 7 : index
    %c0_86 = arith.constant 0 : index
    %c0_87 = arith.constant 0 : index
    %216 = vector.load %arg6[%c7_85, %c0_86, %c0_87] : memref<9x128x128xbf16, #tpu.memory_space<vmem>>, vector<1x128x128xbf16>
    %217 = vector.shape_cast %216 : vector<1x128x128xbf16> to vector<128x128xbf16>
    %cst_88 = arith.constant dense<0.000000e+00> : vector<128x128xf32>
    %218 = tpu.matmul %215, %217, %cst_88 {dimension_numbers = #tpu.dot_dimension_numbers<[1], [0], [0], [1], [0, 0, 1, 1], [], []>} : vector<128x128xbf16>, vector<128x128xbf16>, vector<128x128xf32> -> vector<128x128xf32>
    %219 = arith.addf %207, %218 : vector<128x128xf32>
    %220 = vector.extract_strided_slice %143 {offsets = [8, 0], sizes = [120, 128], strides = [1, 1]} : vector<128x128xf32> to vector<120x128xf32>
    %221 = vector.extract_strided_slice %143 {offsets = [0, 0], sizes = [8, 128], strides = [1, 1]} : vector<128x128xf32> to vector<8x128xf32>
    %222 = tpu.concatenate %220, %221 in 0 : vector<120x128xf32>, vector<8x128xf32> -> vector<128x128xf32>
    %cst_89 = arith.constant 0.000000e+00 : f32
    %223 = vector.shape_cast %22 : vector<128x1xi1> to vector<128x1xi1>
    %224 = vector.broadcast %223 : vector<128x1xi1> to vector<128x128xi1>
    %225 = vector.broadcast %cst_89 : f32 to vector<128x128xf32>
    %226 = arith.select %224, %222, %225 : vector<128x128xi1>, vector<128x128xf32>
    %227 = arith.truncf %226 : vector<128x128xf32> to vector<128x128xbf16>
    %c8_90 = arith.constant 8 : index
    %c0_91 = arith.constant 0 : index
    %c0_92 = arith.constant 0 : index
    %228 = vector.load %arg6[%c8_90, %c0_91, %c0_92] : memref<9x128x128xbf16, #tpu.memory_space<vmem>>, vector<1x128x128xbf16>
    %229 = vector.shape_cast %228 : vector<1x128x128xbf16> to vector<128x128xbf16>
    %cst_93 = arith.constant dense<0.000000e+00> : vector<128x128xf32>
    %230 = tpu.matmul %227, %229, %cst_93 {dimension_numbers = #tpu.dot_dimension_numbers<[1], [0], [0], [1], [0, 0, 1, 1], [], []>} : vector<128x128xbf16>, vector<128x128xbf16>, vector<128x128xf32> -> vector<128x128xf32>
    %231 = arith.addf %219, %230 : vector<128x128xf32>
    %c0_94 = arith.constant 0 : index
    %c0_95 = arith.constant 0 : index
    %232 = vector.load %arg7[%c0_94, %c0_95] : memref<1x128xf32, #tpu.memory_space<vmem>>, vector<1x128xf32>
    %233 = vector.broadcast %232 : vector<1x128xf32> to vector<128x128xf32>
    %234 = arith.addf %231, %233 : vector<128x128xf32>
    %cst_96 = arith.constant 0.000000e+00 : f32
    %235 = vector.broadcast %cst_96 : f32 to vector<128x128xf32>
    %236 = arith.maximumf %234, %235 : vector<128x128xf32>
    %237 = vector.shape_cast %236 : vector<128x128xf32> to vector<2x1x64x128xf32>
    %c0_97 = arith.constant 0 : index
    %c0_98 = arith.constant 0 : index
    %c0_99 = arith.constant 0 : index
    %238 = vector.load %arg8[%c0_97, %c0_98, %c0_99] : memref<4x64x128xf32, #tpu.memory_space<vmem>>, vector<4x64x128xf32>
    %239 = vector.shape_cast %238 : vector<4x64x128xf32> to vector<1x4x64x128xf32>
    %240 = vector.broadcast %237 : vector<2x1x64x128xf32> to vector<2x4x64x128xf32>
    %241 = vector.broadcast %239 : vector<1x4x64x128xf32> to vector<2x4x64x128xf32>
    %242 = arith.mulf %240, %241 : vector<2x4x64x128xf32>
    %cst_100 = arith.constant dense<0.000000e+00> : vector<2x4x128xf32>
    %243 = vector.multi_reduction <add>, %242, %cst_100 [2] : vector<2x4x64x128xf32> to vector<2x4x128xf32>
    %cst_101 = arith.constant dense<0.000000e+00> : vector<2x4xf32>
    %244 = vector.multi_reduction <add>, %243, %cst_101 [2] : vector<2x4x128xf32> to vector<2x4xf32>
    %c0_102 = arith.constant 0 : index
    %c0_103 = arith.constant 0 : index
    %245 = vector.load %arg9[%c0_102, %c0_103] : memref<1x4xf32, #tpu.memory_space<vmem>>, vector<1x4xf32>
    %246 = vector.broadcast %245 : vector<1x4xf32> to vector<2x4xf32>
    %247 = arith.addf %244, %246 : vector<2x4xf32>
    %c0_104 = arith.constant 0 : index
    %c0_105 = arith.constant 0 : index
    %248 = vector.load %arg10[%c0_104, %c0_105] : memref<2x4xf32, #tpu.memory_space<vmem>>, vector<2x4xf32>
    tpu.vector_store %arg10[%c0_104, %c0_105], %247 {strides = array<i32>} : memref<2x4xf32, #tpu.memory_space<vmem>>, vector<2x4xf32>,
    return
  }
  func.func @transform_0(%arg0: i32) -> (i32, i32) {
    %c0_i32 = arith.constant 0 : i32
    %c0_i32_0 = arith.constant 0 : i32
    return %arg0, %c0_i32 : i32, i32
  }
  func.func @transform_1(%arg0: i32) -> (i32, i32) {
    %c0_i32 = arith.constant 0 : i32
    %c0_i32_0 = arith.constant 0 : i32
    %c0_i32_1 = arith.constant 0 : i32
    return %c0_i32, %c0_i32_0 : i32, i32
  }
  func.func @transform_2(%arg0: i32) -> (i32, i32) {
    %c0_i32 = arith.constant 0 : i32
    %c0_i32_0 = arith.constant 0 : i32
    %c0_i32_1 = arith.constant 0 : i32
    return %c0_i32, %c0_i32_0 : i32, i32
  }
  func.func @transform_3(%arg0: i32) -> (i32, i32, i32) {
    %c0_i32 = arith.constant 0 : i32
    %c0_i32_0 = arith.constant 0 : i32
    %c0_i32_1 = arith.constant 0 : i32
    %c0_i32_2 = arith.constant 0 : i32
    return %c0_i32, %c0_i32_0, %c0_i32_1 : i32, i32, i32
  }
  func.func @transform_4(%arg0: i32) -> (i32, i32) {
    %c0_i32 = arith.constant 0 : i32
    %c0_i32_0 = arith.constant 0 : i32
    %c0_i32_1 = arith.constant 0 : i32
    return %c0_i32, %c0_i32_0 : i32, i32
  }
  func.func @transform_5(%arg0: i32) -> (i32, i32, i32) {
    %c0_i32 = arith.constant 0 : i32
    %c0_i32_0 = arith.constant 0 : i32
    %c0_i32_1 = arith.constant 0 : i32
    %c0_i32_2 = arith.constant 0 : i32
    return %c0_i32, %c0_i32_0, %c0_i32_1 : i32, i32, i32
  }
  func.func @transform_6(%arg0: i32) -> (i32, i32) {
    %c0_i32 = arith.constant 0 : i32
    %c0_i32_0 = arith.constant 0 : i32
    %c0_i32_1 = arith.constant 0 : i32
    return %c0_i32, %c0_i32_0 : i32, i32
  }
  func.func @transform_7(%arg0: i32) -> (i32, i32, i32) {
    %c0_i32 = arith.constant 0 : i32
    %c0_i32_0 = arith.constant 0 : i32
    %c0_i32_1 = arith.constant 0 : i32
    %c0_i32_2 = arith.constant 0 : i32
    return %c0_i32, %c0_i32_0, %c0_i32_1 : i32, i32, i32
  }
  func.func @transform_8(%arg0: i32) -> (i32, i32) {
    %c0_i32 = arith.constant 0 : i32
    %c0_i32_0 = arith.constant 0 : i32
    %c0_i32_1 = arith.constant 0 : i32
    return %c0_i32, %c0_i32_0 : i32, i32
  }
  func.func @transform_9(%arg0: i32) -> (i32, i32) {
    %c0_i32 = arith.constant 0 : i32
    %c0_i32_0 = arith.constant 0 : i32
    return %arg0, %c0_i32 : i32, i32
  }
}

</mosaic_0001>

<bundles_post_ra>
// kernel: chess_tactic_cnn_fwd.1
= control target key start
LH: loop header
LB: loop body
LE: loop exit
PB: predicated region body
PF: predicated region fallthrough
CT: control target
= control target key end

     0   :  { %vm198_vm0 = vcmask 130048   ;;  %s7986_s0 = inlined_call_operand.vmem [shape: bf16[128,144], index: 0, kind: input, shape index: {}]   ;;  %s7987_s1 = inlined_call_operand.vmem [shape: bf16[144,64], index: 1, kind: input, shape index: {}]   ;;  %s7988_s2 = inlined_call_operand.vmem [shape: f32[1,64], index: 2, kind: input, shape index: {}]   ;;  %s7989_s3 = inlined_call_operand.vmem [shape: bf16[9,64,128], index: 3, kind: input, shape index: {}]   ;;  %s7990_s4 = inlined_call_operand.vmem [shape: f32[1,128], index: 4, kind: input, shape index: {}]   ;;  %s7991_s5 = inlined_call_operand.vmem [shape: bf16[9,128,128], index: 5, kind: input, shape index: {}]   ;;  %s7992_s6 = inlined_call_operand.vmem [shape: f32[1,128], index: 6, kind: input, shape index: {}]   ;;  %s7993_s7 = inlined_call_operand.vmem [shape: f32[4,64,128], index: 7, kind: input, shape index: {}]   ;;  %s7994_s8 = inlined_call_operand.vmem [shape: f32[1,4], index: 8, kind: input, shape index: {}]   ;;  %s7995_s9 = inlined_call_operand.hbm [shape: f32[2,4], index: 9, kind: output, shape index: {}]  }
   0x1   :  { %v4788_v0 = vld [vmem:[%s7987_s1 + $0x38] sm:$0xff]  ;;  %v4787_v1 = vld [vmem:[%s7987_s1 + $0x30] sm:$0xff]  ;;  %v4789_v2 = vld [vmem:[%s7987_s1 + $0x40] sm:$0xff] }
   0x2   :  { %223 = vmatpush.bf16.msra.mxu0 %v4788_v0  ;;  %v4765_v3 = vld [vmem:[%s7986_s0 + $0x4] sm:$0xf]  ;;  %v3773_v4 = vld [vmem:[%s7986_s0 + $0x8] sm:$0xf0]  ;;  %279 = vmatpush.bf16.msra.mxu1 %v4789_v2 }
   0x3   :  { %v3776_v5 = vor.u32 %v4765_v3, %v3773_v4  ;;  %v4786_v6 = vld [vmem:[%s7987_s1 + $0x28] sm:$0xff] }
   0x5   :  { %3869 = vmatmul.msk.bf16.vlgmr.msra.gmra.mxu1 %vm198_vm0, %v3776_v5 }
   0x6   :  { %224 = vmatpush.bf16.msra.mxu0 %v4787_v1 }
   0x7   :  { %14 = vsyncpa [#allocation3], 0  ;;  %v4785_v7 = vld [vmem:[%s7987_s1 + $0x20] sm:$0xff]  ;;  %v4784_v8 = vld [vmem:[%s7987_s1 + $0x18] sm:$0xff]  ;;  %v7998_v53 = vlaneseq  ;;  %vm8010_vm1 = vcmask 1040384   ;;  %vm8052_vm3 = vcmask 1046528  }
   0x8   :  { %v4767_v9 = vld [vmem:[%s7986_s0 + $0x14] sm:$0xf]  ;;  %v3781_v10 = vld [vmem:[%s7986_s0 + $0x18] sm:$0xf0]  ;;  %v4782_v13 = vld [vmem:[%s7987_s1 + $0x8] sm:$0xff]  ;;  %vm8004_vm9 = vcmask 523264  }
   0x9   :  { %v4783_v11 = vld [vmem:[%s7987_s1 + $0x10] sm:$0xff]  ;;  %v3784_v12 = vor.u32 %v4767_v9, %v3781_v10  ;;  %v4781_v14 = vld [vmem:[%s7987_s1] sm:$0xff]  ;;  %v4766_v16 = vld [vmem:[%s7986_s0 + $0x4] sm:$0xf0]  ;;  %v5112_v54 = vshrl.u32 %v7998_v53, 7  ;;  %s3760_s28 = sshll.u32 %s7995_s9, 4  ;;  %s3761_s28 = int_to_ptr.hbm [resolvable:$true] %s3760_s28 }
   0xa   :  { %225 = vmatpush.bf16.msra.mxu0 %v4786_v6  ;;  %v3771_v15 = vld [vmem:[%s7986_s0] sm:$0xf]  ;;  %v4769_v18 = vld [vmem:[%s7986_s0 + $0x24] sm:$0xf]  ;;  %v3789_v19 = vld [vmem:[%s7986_s0 + $0x28] sm:$0xf0] }
   0xb   :  { %v3772_v17 = vor.u32 %v4766_v16, %v3771_v15  ;;  %v3792_v20 = vor.u32 %v4769_v18, %v3789_v19  ;;  %v3779_v21 = vld [vmem:[%s7986_s0 + $0x10] sm:$0xf]  ;;  %v4768_v22 = vld [vmem:[%s7986_s0 + $0x14] sm:$0xf0]  ;;  %v4771_v24 = vld [vmem:[%s7986_s0 + $0x34] sm:$0xf]  ;;  %4900 = vset.pattern.permute.xlu1 %v5112_v54 }
   0xc   :  { %v3780_v23 = vor.u32 %v4768_v22, %v3779_v21  ;;  %v3797_v25 = vld [vmem:[%s7986_s0 + $0x38] sm:$0xf0]  ;;  %v3787_v27 = vld [vmem:[%s7986_s0 + $0x20] sm:$0xf]  ;;  %v4770_v28 = vld [vmem:[%s7986_s0 + $0x24] sm:$0xf0] }
   0xd   :  { %v3800_v26 = vor.u32 %v4771_v24, %v3797_v25  ;;  %v3788_v29 = vor.u32 %v4770_v28, %v3787_v27  ;;  %v4773_v30 = vld [vmem:[%s7986_s0 + $0x44] sm:$0xf]  ;;  %v3805_v31 = vld [vmem:[%s7986_s0 + $0x48] sm:$0xf0]  ;;  %v3795_v33 = vld [vmem:[%s7986_s0 + $0x30] sm:$0xf] }
   0xe   :  { %226 = vmatpush.bf16.msra.mxu0 %v4785_v7  ;;  %v3808_v32 = vor.u32 %v4773_v30, %v3805_v31  ;;  %v4772_v34 = vld [vmem:[%s7986_s0 + $0x34] sm:$0xf0]  ;;  %v4775_v36 = vld [vmem:[%s7986_s0 + $0x54] sm:$0xf]  ;;  %v3813_v37 = vld [vmem:[%s7986_s0 + $0x58] sm:$0xf0] }
   0xf   :  { %v3796_v35 = vor.u32 %v4772_v34, %v3795_v33  ;;  %v3816_v38 = vor.u32 %v4775_v36, %v3813_v37  ;;  %v3803_v39 = vld [vmem:[%s7986_s0 + $0x40] sm:$0xf]  ;;  %v4774_v40 = vld [vmem:[%s7986_s0 + $0x44] sm:$0xf0]  ;;  %v4777_v42 = vld [vmem:[%s7986_s0 + $0x64] sm:$0xf] }
  0x10   :  { %v3804_v41 = vor.u32 %v4774_v40, %v3803_v39  ;;  %v3821_v43 = vld [vmem:[%s7986_s0 + $0x68] sm:$0xf0]  ;;  %v3811_v45 = vld [vmem:[%s7986_s0 + $0x50] sm:$0xf]  ;;  %v4776_v46 = vld [vmem:[%s7986_s0 + $0x54] sm:$0xf0] }
  0x11   :  { %v3824_v44 = vor.u32 %v4777_v42, %v3821_v43  ;;  %v3812_v47 = vor.u32 %v4776_v46, %v3811_v45  ;;  %v4779_v48 = vld [vmem:[%s7986_s0 + $0x74] sm:$0xf]  ;;  %v3829_v49 = vld [vmem:[%s7986_s0 + $0x78] sm:$0xf0]  ;;  %v3819_v51 = vld [vmem:[%s7986_s0 + $0x60] sm:$0xf] }
  0x12   :  { %227 = vmatpush.bf16.msra.mxu0 %v4784_v8  ;;  %v3832_v50 = vor.u32 %v4779_v48, %v3829_v49  ;;  %v4778_v52 = vld [vmem:[%s7986_s0 + $0x64] sm:$0xf0]  ;;  %v3827_v57 = vld [vmem:[%s7986_s0 + $0x70] sm:$0xf]  ;;  %v4780_v58 = vld [vmem:[%s7986_s0 + $0x74] sm:$0xf0] }
  0x13   :  { %v3820_v55 = vor.u32 %v4778_v52, %v3819_v51  ;;  %v4813_v59 = vld [vmem:[%s7989_s3 + $0xb8] sm:$0xff]  ;;  %v3828_v61 = vor.u32 %v4780_v58, %v3827_v57  ;;  %v4812_v62 = vld [vmem:[%s7989_s3 + $0xb0] sm:$0xff]  ;;  %v4811_v63 = vld [vmem:[%s7989_s3 + $0xa8] sm:$0xff]  ;;  %v5140_v7 = vadd.s32 16, %v5112_v54  ;;  %v5143_v9 = vadd.s32 24, %v5112_v54 }
  0x14   :  { %v4810_v1 = vld [vmem:[%s7989_s3 + $0xa0] sm:$0xff]  ;;  %v370_v18 = vshra.s32 %v5112_v54, 3  ;;  %v5183_v34 = vadd.s32 32, %v5112_v54  ;;  %v8270_v37 = vmov 0  ;;  %v8307_v48 = vmov 0 }
  0x15   :  { %3870 = vmatmul.msk.bf16.gmra.mxu1 %vm198_vm0, %v3784_v12  ;;  %v5136_v2 = vld [vmem:[%s7988_s2] ss:$0 sm:$0xff]  ;;  %v373_v16 = vshra.s32 %v5143_v9, 3  ;;  %v356_v40 = vand.u32 7, %v5140_v7 }
  0x16   :  { %228 = vmatpush.bf16.msra.mxu0 %v4783_v11  ;;  %v5147_v11 = vadd.s32 8, %v5112_v54  ;;  %v5168_v27 = vand.u32 7, %v370_v18 }
  0x17   :  { %v5163_v24 = vand.u32 7, %v373_v16  ;;  %vm5255_vm10 = vcmp.ge.s32.totalorder %v356_v40, 1  ;;  %vm5259_vm11 = vcmp.le.s32.totalorder %v356_v40, 6 }
  0x18   :  { %v371_v19 = vshra.s32 %v5147_v11, 3  ;;  %8267 = vst [vmem:[#allocation6_spill] sm:$0xff] %v5168_v27  ;;  %vm7996_vm6 = vcmp.le.s32.totalorder %v5168_v27, 6 }
  0x19   :  { %vm8002_vm5 = vcmp.ge.s32.totalorder %v5163_v24, 1 }
  0x1a   :  { %229 = vmatpush.bf16.msra.mxu0 %v4782_v13  ;;  %v5176_v30 = vand.u32 7, %v371_v19  ;;  %v5280_v19 = vadd.s32 48, %v5112_v54 }
  0x1c   :  { %8268 = vst [vmem:[#allocation7_spill] sm:$0xff] %v5176_v30  ;;  %vm7997_vm4 = vcmp.le.s32.totalorder %v5176_v30, 6 }
  0x1e   :  { %230 = vmatpush.bf16.msra.mxu0 %v4781_v14  ;;  %v372_v14 = vshra.s32 %v5140_v7, 3 }
  0x20   :  { %v5160_v21 = vand.u32 7, %v372_v14 }
  0x21   :  { %231 = vmatmul.bf16.vlgmr.msra.gmra.mxu0 %v3772_v17 }
  0x22   :  { %1445 = vmatpush.bf16.msrb.mxu0 %v4813_v59  ;;  %vm7999_vm2 = vcmp.ge.s32.totalorder %v5160_v21, 1 }
  0x25   :  { %3871 = vmatmul.msk.bf16.gmra.mxu1 %vm198_vm0, %v3792_v20 }
  0x26   :  { %1446 = vmatpush.bf16.msrb.mxu0 %v4812_v62  ;;  %v357_v62 = vand.u32 7, %v5143_v9 }
  0x28   :  { %vm5264_vm12 = vcmp.ge.s32.totalorder %v357_v62, 1  ;;  %vm5322_vm15 = vcmp.le.s32.totalorder %v357_v62, 6 }
  0x2a   :  { %1447 = vmatpush.bf16.msrb.mxu0 %v4811_v63 }
  0x2e   :  { %1448 = vmatpush.bf16.msrb.mxu0 %v4810_v1 }
  0x31   :  { %236 = vmatmul.bf16.gmra.mxu0 %v3780_v23 }
  0x35   :  { %3872 = vmatmul.msk.bf16.gmra.mxu1 %vm198_vm0, %v3800_v26 }
  0x41   :  { %241 = vmatmul.bf16.gmra.mxu0 %v3788_v29  ;;  %v8005_v29 = vand.u32 7, %v5112_v54 }
  0x43   :  { %vm5192_vm7 = vcmp.le.s32.totalorder %v8005_v29, 6  ;;  %v360_v29 = vand.u32 7, %v5280_v19 }
  0x44   :  { %v8271_v37 = vsel %vm5192_vm7, 4294967295, %v8270_v37 }
  0x45   :  { %3873 = vmatmul.msk.bf16.gmra.mxu1 %vm198_vm0, %v3808_v32  ;;  %v8000_v32 = vand.u32 7, %v5147_v11  ;;  %8272 = vst [vmem:[#allocation9_spill] sm:$0xff] %v8271_v37  ;;  %v5424_v37 = vadd.s32 64, %v5112_v54 }
  0x47   :  { %vm5198_vm8 = vcmp.le.s32.totalorder %v8000_v32, 6 }
  0x51   :  { %246 = vmatmul.bf16.gmra.mxu0 %v3796_v35 }
  0x55   :  { %3874 = vmatmul.msk.bf16.gmra.mxu1 %vm198_vm0, %v3816_v38  ;;  %v8273_v38 = vmov 0 }
  0x56   :  { %v8274_v38 = vsel %vm5198_vm8, 4294967295, %v8273_v38 }
  0x57   :  { %8275 = vst [vmem:[#allocation10_spill] sm:$0xff] %v8274_v38  ;;  %v378_v38 = vshra.s32 %v5424_v37, 3 }
  0x61   :  { %251 = vmatmul.bf16.gmra.mxu0 %v3804_v41 }
  0x65   :  { %3875 = vmatmul.msk.bf16.gmra.mxu1 %vm198_vm0, %v3824_v44 }
  0x71   :  { %256 = vmatmul.bf16.gmra.mxu0 %v3812_v47  ;;  %v5225_v47 = vadd.s32 40, %v5112_v54 }
  0x73   :  { %v375_v63 = vshra.s32 %v5225_v47, 3 }
  0x75   :  { %3876 = vmatmul.msk.bf16.gmra.mxu1 %vm198_vm0, %v3832_v50  ;;  %v374_v50 = vshra.s32 %v5183_v34, 3 }
  0x81   :  { %261 = vmatmul.bf16.gmra.mxu0 %v3820_v55 }
  0x82   :  { %v281_v56 = vpop.f32.mrf.mxu1 }
  0x8a   :  { %v283_v60 = vpop.f32.mrf.mxu1 }
  0x91   :  { %266 = vmatmul.bf16.gmra.mxu0 %v3828_v61 }
  0x92   :  { %v286_v0 = vpop.f32.mrf.mxu1 }
  0x9a   :  { %v288_v4 = vpop.f32.mrf.mxu1 }
  0x9e   :  { %v232_v3 = vpop.f32.mrf.mxu0 }
  0x9f   :  { %v233_v5 = vadd.f32 %v5136_v2, %v232_v3  ;;  %v8280_v3 = vmov 0 }
  0xa0   :  { %v8281_v3 = vsel %vm5255_vm10, 4294967295, %v8280_v3 }
  0xa1   :  { %v282_v6 = vadd.f32 %v281_v56, %v233_v5  ;;  %8282 = vst [vmem:[#allocation15_spill] sm:$0xff] %v8281_v3  ;;  %v8283_v5 = vmov 0 }
  0xa2   :  { %v5152_v15 = vpop.f32.mrf.mxu1  ;;  %v8284_v5 = vsel %vm5259_vm11, 4294967295, %v8283_v5 }
  0xa3   :  { %v5149_v12 = vmax.f32 %v282_v6, 0.0  ;;  %8285 = vst [vmem:[#allocation16_spill] sm:$0xff] %v8284_v5  ;;  %v8286_v6 = vmov 0 }
  0xa4   :  { %v8287_v6 = vsel %vm5264_vm12, 4294967295, %v8286_v6 }
  0xa5   :  { %v8003_v20 = vrot.slane %v5149_v12, 7  ;;  %v8001_v36 = vrot.slane %v5149_v12, 1  ;;  %8288 = vst [vmem:[#allocation17_spill] sm:$0xff] %v8287_v6 }
  0xa6   :  { %v234_v8 = vpop.f32.mrf.mxu0 }
  0xa7   :  { %v235_v10 = vadd.f32 %v5136_v2, %v234_v8 }
  0xa9   :  { %v284_v13 = vadd.f32 %v283_v60, %v235_v10  ;;  %v358_v10 = vand.u32 7, %v5183_v34 }
  0xaa   :  { %v5202_v39 = vpop.f32.mrf.mxu1 }
  0xab   :  { %v5155_v17 = vmax.f32 %v284_v13, 0.0  ;;  %v5272_v13 = vand.u32 7, %v375_v63  ;;  %vm5326_vm0 = vcmp.ge.s32.totalorder %v358_v10, 1 }
  0xad   :  { %8266 = vst [vmem:[#allocation5_spill] sm:$0xff] %v5155_v17  ;;  %v486_v22 = vrot.slane %v5155_v17, 7  ;;  %v582_v33 = vrot.slane %v5155_v17, 1  ;;  %v5208_v41 = vsel %vm7999_vm2, %v5155_v17, 0.0  ;;  %v5236_v55 = vsel %vm7996_vm6, %v5155_v17, 0.0 }
  0xae   :  { %v237_v23 = vpop.f32.mrf.mxu0  ;;  %8277 = vst [vmem:[#allocation12_spill] sm:$0xff] %v5236_v55  ;;  %vm8015_vm14 = vcmp.ge.s32.totalorder %v5272_v13, 1  ;;  %v8334_v55 = vmov 0 }
  0xaf   :  { %v238_v26 = vadd.f32 %v5136_v2, %v237_v23  ;;  %v5173_v28 = vsel %vm8010_vm1, %v8003_v20, %v486_v22  ;;  %v583_v42 = vsel %vm8052_vm3, %v8001_v36, %v582_v33  ;;  %8289 = vst [vmem:[#allocation18_spill] sm:$0xff] %v5272_v13  ;;  %v8311_v20 = vmov 0 }
  0xb0   :  { %v5240_v56 = vsel %vm5192_vm7, %v583_v42, 0.0 }
  0xb1   :  { %v287_v31 = vadd.f32 %v286_v0, %v238_v26  ;;  %v5250_v0 = vand.u32 7, %v374_v50 }
  0xb2   :  { %v5269_v9 = vpop.f32.mrf.mxu1 }
  0xb3   :  { %v5186_v35 = vmax.f32 %v287_v31, 0.0  ;;  %8278 = vst [vmem:[#allocation13_spill] sm:$0xff] %v5250_v0  ;;  %vm8016_vm13 = vcmp.ge.s32.totalorder %v5250_v0, 1 }
  0xb5   :  { %8269 = vst [vmem:[#allocation8_spill] sm:$0xff] %v5186_v35  ;;  %v584_v43 = vrot.slane %v5186_v35, 1  ;;  %v5217_v44 = vsel %vm7997_vm4, %v5186_v35, 0.0  ;;  %v5222_v45 = vsel %vm8002_vm5, %v5186_v35, 0.0  ;;  %v488_v49 = vrot.slane %v5186_v35, 7 }
  0xb6   :  { %8276 = vst [vmem:[#allocation11_spill] sm:$0xff] %v5217_v44  ;;  %v239_v46 = vpop.f32.mrf.mxu0  ;;  %v8375_v35 = vmov 0 }
  0xb7   :  { %v240_v51 = vadd.f32 %v5136_v2, %v239_v46  ;;  %v585_v52 = vsel %vm8052_vm3, %v582_v33, %v584_v43  ;;  %v489_v58 = vsel %vm8010_vm1, %v486_v22, %v488_v49 }
  0xb8   :  { %v663_v57 = vsel %vm5198_vm8, %v585_v52, 0.0  ;;  %v5291_v31 = vsel %vm5255_vm10, %v489_v58, 0.0  ;;  %v8294_v52 = vmov 0 }
  0xb9   :  { %v289_v60 = vadd.f32 %v288_v4, %v240_v51  ;;  %v1376_v61 = vpack.c.bf16 %v663_v57, %v5240_v56  ;;  %v5287_v26 = vsel %vm7996_vm6, %v663_v57, 0.0  ;;  %v5304_v42 = vsel %vm7999_vm2, %v663_v57, 0.0 }
  0xba   :  { %8290 = vst [vmem:[#allocation19_spill] sm:$0xff] %v5287_v26  ;;  %v5320_v51 = vadd.s32 56, %v5112_v54  ;;  %v8295_v52 = vsel %vm5322_vm15, 4294967295, %v8294_v52  ;;  %v8297_v57 = vmov 0  ;;  %vm8017_vm6 = vcmp.le.s32.totalorder %v5160_v21, 6  ;;  %v5354_v14 = vpop.f32.mrf.mxu1 }
  0xbb   :  { %v5252_v1 = vmax.f32 %v289_v60, 0.0  ;;  %4053 = vmatmul.msk.bf16.vlgmr.msrb.gmra.mxu0 %vm8004_vm9, %v1376_v61  ;;  %8296 = vst [vmem:[#allocation23_spill] sm:$0xff] %v8295_v52  ;;  %v8298_v57 = vsel %vm5326_vm0, 4294967295, %v8297_v57  ;;  %vm5402_vm2 = vcmp.le.s32.totalorder %v358_v10, 6 }
  0xbc   :  { %8299 = vst [vmem:[#allocation24_spill] sm:$0xff] %v8298_v57  ;;  %v377_v46 = vshra.s32 %v5320_v51, 3  ;;  %v8308_v48 = vsel %vm5402_vm2, 4294967295, %v8307_v48  ;;  %v361_v6 = vand.u32 7, %v5320_v51 }
  0xbd   :  { %8279 = vst [vmem:[#allocation14_spill] sm:$0xff] %v5252_v1  ;;  %v586_v4 = vrot.slane %v5252_v1, 1  ;;  %v490_v7 = vrot.slane %v5252_v1, 7  ;;  %v5336_v60 = vsel %vm8016_vm13, %v5252_v1, 0.0 }
  0xbe   :  { %v242_v8 = vpop.f32.mrf.mxu0  ;;  %8309 = vst [vmem:[#allocation32_spill] sm:$0xff] %v8308_v48  ;;  %v5407_v36 = vand.u32 7, %v377_v46 }
  0xbf   :  { %v243_v16 = vadd.f32 %v5136_v2, %v242_v8  ;;  %v587_v18 = vsel %vm8052_vm3, %v584_v43, %v586_v4  ;;  %v491_v22 = vsel %vm8010_vm1, %v488_v49, %v490_v7  ;;  %v359_v8 = vand.u32 7, %v5225_v47 }
  0xc0   :  { %v664_v23 = vsel %vm5259_vm11, %v587_v18, 0.0  ;;  %v5295_v33 = vsel %vm5264_vm12, %v491_v22, 0.0  ;;  %v376_v18 = vshra.s32 %v5280_v19, 3  ;;  %8310 = vst [vmem:[#allocation33_spill] sm:$0xff] %v5407_v36 }
  0xc1   :  { %8291 = vst [vmem:[#allocation20_spill] sm:$0xff] %v5295_v33  ;;  %v292_v34 = vadd.f32 %v5152_v15, %v243_v16  ;;  %v5300_v40 = vsel %vm7997_vm4, %v664_v23, 0.0  ;;  %v5308_v43 = vsel %vm8002_vm5, %v664_v23, 0.0  ;;  %vm8018_vm4 = vcmp.le.s32.totalorder %v5163_v24, 6 }
  0xc2   :  { %8292 = vst [vmem:[#allocation21_spill] sm:$0xff] %v5300_v40  ;;  %v5363_v15 = vsel %vm8017_vm6, %v5252_v1, 0.0  ;;  %v5386_v16 = vsel %vm8017_vm6, %v5295_v33, 0.0  ;;  %v5398_v49 = vand.u32 7, %v376_v18  ;;  %vm5409_vm5 = vcmp.ge.s32.totalorder %v359_v8, 1  ;;  %v301_v19 = vpop.f32.mrf.mxu1 }
  0xc3   :  { %v5317_v50 = vmax.f32 %v292_v34, 0.0  ;;  %8301 = vst [vmem:[#allocation26_spill] sm:$0xff] %v5363_v15  ;;  %v8312_v20 = vsel %vm5409_vm5, 4294967295, %v8311_v20 }
  0xc4   :  { %8303 = vst [vmem:[#allocation28_spill] sm:$0xff] %v5386_v16  ;;  %vm8343_vm7 = vcmp.ge.s32.totalorder %v5398_v49, 1 }
  0xc5   :  { %8293 = vst [vmem:[#allocation22_spill] sm:$0xff] %v5317_v50  ;;  %v588_v58 = vrot.slane %v5317_v50, 1  ;;  %v5341_v61 = vsel %vm8015_vm14, %v5317_v50, 0.0  ;;  %v492_v62 = vrot.slane %v5317_v50, 7 }
  0xc6   :  { %v244_v63 = vpop.f32.mrf.mxu0  ;;  %8306 = vst [vmem:[#allocation31_spill] sm:$0xff] %v5398_v49 }
  0xc7   :  { %v245_v22 = vadd.f32 %v5136_v2, %v244_v63  ;;  %v589_v34 = vsel %vm8052_vm3, %v586_v4, %v588_v58  ;;  %v493_v53 = vsel %vm8010_vm1, %v490_v7, %v492_v62  ;;  %v5368_v4 = vsel %vm8018_vm4, %v5317_v50, 0.0  ;;  %8313 = vst [vmem:[#allocation34_spill] sm:$0xff] %v8312_v20 }
  0xc8   :  { %v665_v59 = vsel %vm5322_vm15, %v589_v34, 0.0  ;;  %v5358_v47 = vsel %vm5326_vm0, %v493_v53, 0.0  ;;  %8302 = vst [vmem:[#allocation27_spill] sm:$0xff] %v5368_v4  ;;  %v5374_v34 = vsel %vm8016_vm13, %v5295_v33, 0.0  ;;  %v5455_v20 = vadd.s32 72, %v5112_v54  ;;  %v4795_v33 = vld [vmem:[%s7989_s3 + $0x28] sm:$0xff] }
  0xc9   :  { %8300 = vst [vmem:[#allocation25_spill] sm:$0xff] %v5358_v47  ;;  %v294_v7 = vadd.f32 %v5202_v39, %v245_v22  ;;  %v1377_v63 = vpack.c.bf16 %v665_v59, %v664_v23  ;;  %v5379_v53 = vsel %vm8015_vm14, %v5358_v47, 0.0  ;;  %v5391_v39 = vsel %vm8018_vm4, %v5358_v47, 0.0 }
  0xca   :  { %8304 = vst [vmem:[#allocation29_spill] sm:$0xff] %v5391_v39  ;;  %v379_v15 = vshra.s32 %v5455_v20, 3  ;;  %v303_v40 = vpop.f32.mrf.mxu1 }
  0xcb   :  { %v5395_v22 = vmax.f32 %v294_v7, 0.0  ;;  %4054 = vmatmul.msk.bf16.gmra.mxu0 %vm8004_vm9, %v1377_v63  ;;  %vm8030_vm9 = vcmp.ge.s32.totalorder %v5398_v49, 1 }
  0xcc   :  { %v5542_v50 = vand.u32 7, %v379_v15 }
  0xcd   :  { %8305 = vst [vmem:[#allocation30_spill] sm:$0xff] %v5395_v22  ;;  %v590_v32 = vrot.slane %v5395_v22, 1  ;;  %v494_v7 = vrot.slane %v5395_v22, 7 }
  0xce   :  { %v247_v63 = vpop.f32.mrf.mxu0  ;;  %8337 = vst [vmem:[#allocation49_spill] sm:$0xff] %v5542_v50 }
  0xcf   :  { %v248_v23 = vadd.f32 %v5136_v2, %v247_v63  ;;  %v591_v10 = vsel %vm8052_vm3, %v588_v58, %v590_v32  ;;  %v495_v25 = vsel %vm8010_vm1, %v492_v62, %v494_v7  ;;  %v5433_v58 = vsel %vm8016_vm13, %v665_v59, 0.0 }
  0xd0   :  { %v666_v46 = vsel %vm5402_vm2, %v591_v10, 0.0  ;;  %v5428_v52 = vsel %vm5409_vm5, %v495_v25, 0.0  ;;  %vm8045_vm1 = vcmp.ge.s32.totalorder %v5407_v36, 1  ;;  %v8318_v10 = vmov 0 }
  0xd1   :  { %8314 = vst [vmem:[#allocation35_spill] sm:$0xff] %v5428_v52  ;;  %v297_v63 = vadd.f32 %v5269_v9, %v248_v23  ;;  %v5437_v62 = vsel %vm8015_vm14, %v666_v46, 0.0  ;;  %v5446_v9 = vsel %vm8017_vm6, %v665_v59, 0.0  ;;  %v5450_v23 = vsel %vm8018_vm4, %v666_v46, 0.0 }
  0xd2   :  { %8315 = vst [vmem:[#allocation36_spill] sm:$0xff] %v5446_v9  ;;  %vm5459_vm14 = vcmp.le.s32.totalorder %v359_v8, 6  ;;  %vm5463_vm13 = vcmp.ge.s32.totalorder %v360_v29, 1  ;;  %v8321_v25 = vmov 0  ;;  %vm8040_vm6 = vcmp.le.s32.totalorder %v5250_v0, 6 }
  0xd3   :  { %8316 = vst [vmem:[#allocation37_spill] sm:$0xff] %v5450_v23  ;;  %v5452_v18 = vmax.f32 %v297_v63, 0.0  ;;  %v8319_v10 = vsel %vm5459_vm14, 4294967295, %v8318_v10  ;;  %v8322_v25 = vsel %vm5463_vm13, 4294967295, %v8321_v25  ;;  %vm8044_vm4 = vcmp.le.s32.totalorder %v5272_v13, 6 }
  0xd4   :  { %8320 = vst [vmem:[#allocation39_spill] sm:$0xff] %v8319_v10  ;;  %v5473_v63 = vsel %vm8030_vm9, %v5395_v22, 0.0  ;;  %vm8324_vm9 = vcmask 1040384   ;;  %v5498_v51 = vsel %vm8040_vm6, %v5395_v22, 0.0  ;;  %v5521_v10 = vsel %vm8040_vm6, %v5428_v52, 0.0 }
  0xd5   :  { %8317 = vst [vmem:[#allocation38_spill] sm:$0xff] %v5452_v18  ;;  %v592_v59 = vrot.slane %v5452_v18, 1  ;;  %v5478_v8 = vsel %vm8045_vm1, %v5452_v18, 0.0  ;;  %v496_v48 = vrot.slane %v5452_v18, 7  ;;  %vm5537_vm6 = vcmp.le.s32.totalorder %v360_v29, 6 }
  0xd6   :  { %8323 = vst [vmem:[#allocation40_spill] sm:$0xff] %v8322_v25  ;;  %v249_v57 = vpop.f32.mrf.mxu0  ;;  %v5533_v25 = vand.u32 7, %v378_v38  ;;  %v8335_v55 = vsel %vm5537_vm6, 4294967295, %v8334_v55  ;;  %vm8520_vm2 = vcmask 1046528  }
  0xd7   :  { %v250_v3 = vadd.f32 %v5136_v2, %v249_v57  ;;  %v593_v9 = vsel %vm8052_vm3, %v590_v32, %v592_v59  ;;  %v497_v23 = vsel %vm8324_vm9, %v494_v7, %v496_v48  ;;  %8326 = vst [vmem:[#allocation42_spill] sm:$0xff] %v5498_v51  ;;  %v5503_v32 = vsel %vm8044_vm4, %v5452_v18, 0.0  ;;  %vm8521_vm15 = vmmov %vm8520_vm2 }
  0xd8   :  { %v667_v4 = vsel %vm5459_vm14, %v593_v9, 0.0  ;;  %v5493_v26 = vsel %vm5463_vm13, %v497_v23, 0.0  ;;  %8327 = vst [vmem:[#allocation43_spill] sm:$0xff] %v5503_v32  ;;  %vm8328_vm9 = vcmp.ge.s32.totalorder %v5398_v49, 1  ;;  %v362_v32 = vand.u32 7, %v5424_v37 }
  0xd9   :  { %8325 = vst [vmem:[#allocation41_spill] sm:$0xff] %v5493_v26  ;;  %v299_v57 = vadd.f32 %v5354_v14, %v250_v3  ;;  %v1378_v7 = vpack.c.bf16 %v667_v4, %v666_v46  ;;  %v5509_v9 = vsel %vm8328_vm9, %v5428_v52, 0.0  ;;  %v5514_v23 = vsel %vm8045_vm1, %v5493_v26, 0.0 }
  0xda   :  { %8329 = vst [vmem:[#allocation44_spill] sm:$0xff] %v5521_v10  ;;  %v5526_v3 = vsel %vm8044_vm4, %v5493_v26, 0.0  ;;  %vm8332_vm9 = vcmask 523264   ;;  %vm5544_vm4 = vcmp.ge.s32.totalorder %v361_v6, 1  ;;  %v8338_v14 = vmov 0 }
  0xdb   :  { %8330 = vst [vmem:[#allocation45_spill] sm:$0xff] %v5526_v3  ;;  %v5530_v46 = vmax.f32 %v299_v57, 0.0  ;;  %4055 = vmatmul.msk.bf16.gmra.mxu0 %vm8332_vm9, %v1378_v7  ;;  %v8339_v14 = vsel %vm5544_vm4, 4294967295, %v8338_v14  ;;  %vm8341_vm1 = vcmask 1040384   ;;  %v5559_v10 = vadd.s32 80, %v5112_v54 }
  0xdc   :  { %8333 = vst [vmem:[#allocation47_spill] sm:$0xff] %v5533_v25  ;;  %vm8345_vm9 = vcmp.le.s32.totalorder %v5250_v0, 6  ;;  %v8350_v37 = vmov 0  ;;  %v306_v0 = vpop.f32.mrf.mxu1 }
  0xdd   :  { %8331 = vst [vmem:[#allocation46_spill] sm:$0xff] %v5530_v46  ;;  %v594_v44 = vrot.slane %v5530_v46, 1  ;;  %v498_v57 = vrot.slane %v5530_v46, 7 }
  0xde   :  { %8336 = vst [vmem:[#allocation48_spill] sm:$0xff] %v8335_v55  ;;  %v252_v38 = vpop.f32.mrf.mxu0  ;;  %v363_v55 = vand.u32 7, %v5455_v20 }
  0xdf   :  { %8340 = vst [vmem:[#allocation50_spill] sm:$0xff] %v8339_v14  ;;  %v253_v5 = vadd.f32 %v5136_v2, %v252_v38  ;;  %v595_v29 = vsel %vm8052_vm3, %v592_v59, %v594_v44  ;;  %v499_v51 = vsel %vm8341_vm1, %v496_v48, %v498_v57  ;;  %v5567_v59 = vsel %vm8343_vm7, %v667_v4, 0.0 }
  0xe0   :  { %v668_v15 = vsel %vm5537_vm6, %v595_v29, 0.0  ;;  %v5563_v3 = vsel %vm5544_vm4, %v499_v51, 0.0  ;;  %vm8344_vm3 = vcmp.ge.s32.totalorder %v5407_v36, 1  ;;  %v5580_v51 = vsel %vm8345_vm9, %v667_v4, 0.0 }
  0xe1   :  { %8342 = vst [vmem:[#allocation51_spill] sm:$0xff] %v5563_v3  ;;  %v302_v7 = vadd.f32 %v301_v19, %v253_v5  ;;  %v5571_v48 = vsel %vm8344_vm3, %v668_v15, 0.0  ;;  %vm8347_vm4 = vcmp.le.s32.totalorder %v5272_v13, 6  ;;  %v5589_v29 = vadd.s32 88, %v5112_v54 }
  0xe2   :  { %8346 = vst [vmem:[#allocation52_spill] sm:$0xff] %v5580_v51  ;;  %v5584_v5 = vsel %vm8347_vm4, %v668_v15, 0.0  ;;  %vm5593_vm3 = vcmp.le.s32.totalorder %v361_v6, 6  ;;  %vm5597_vm7 = vcmp.ge.s32.totalorder %v362_v32, 1  ;;  %v8353_v38 = vmov 0  ;;  %v4797_v51 = vld [vmem:[%s7989_s3 + $0x38] sm:$0xff] }
  0xe3   :  { %8348 = vst [vmem:[#allocation53_spill] sm:$0xff] %v5584_v5  ;;  %v5586_v19 = vmax.f32 %v302_v7, 0.0  ;;  %v8351_v37 = vsel %vm5593_vm3, 4294967295, %v8350_v37  ;;  %v8354_v38 = vsel %vm5597_vm7, 4294967295, %v8353_v38  ;;  %vm8081_vm9 = vcmp.le.s32.totalorder %v5398_v49, 6  ;;  %828 = vmatpush.bf16.msra.mxu2 %v4797_v51 }
  0xe4   :  { %8352 = vst [vmem:[#allocation55_spill] sm:$0xff] %v8351_v37  ;;  %vm8356_vm1 = vcmp.ge.s32.totalorder %v5533_v25, 1  ;;  %vm8357_vm6 = vcmp.ge.s32.totalorder %v5542_v50, 1  ;;  %v380_v5 = vshra.s32 %v5559_v10, 3  ;;  %vm8359_vm4 = vcmask 1040384  }
  0xe5   :  { %8349 = vst [vmem:[#allocation54_spill] sm:$0xff] %v5586_v19  ;;  %v596_v4 = vrot.slane %v5586_v19, 1  ;;  %v5607_v7 = vsel %vm8356_vm1, %v5530_v46, 0.0  ;;  %v5612_v6 = vsel %vm8357_vm6, %v5586_v19, 0.0  ;;  %v500_v14 = vrot.slane %v5586_v19, 7 }
  0xe6   :  { %8355 = vst [vmem:[#allocation56_spill] sm:$0xff] %v8354_v38  ;;  %v254_v13 = vpop.f32.mrf.mxu0  ;;  %vm8358_vm1 = vcmask 1046528   ;;  %v381_v47 = vshra.s32 %v5589_v29, 3  ;;  %v5632_v20 = vsel %vm8081_vm9, %v5530_v46, 0.0  ;;  %vm8362_vm6 = vcmp.le.s32.totalorder %v5407_v36, 6 }
  0xe7   :  { %v255_v18 = vadd.f32 %v5136_v2, %v254_v13  ;;  %v597_v26 = vsel %vm8358_vm1, %v594_v44, %v596_v4  ;;  %v501_v22 = vsel %vm8359_vm4, %v498_v57, %v500_v14  ;;  %8361 = vst [vmem:[#allocation58_spill] sm:$0xff] %v5632_v20  ;;  %v5637_v44 = vsel %vm8362_vm6, %v5586_v19, 0.0 }
  0xe8   :  { %v669_v52 = vsel %vm5593_vm3, %v597_v26, 0.0  ;;  %v5627_v16 = vsel %vm5597_vm7, %v501_v22, 0.0  ;;  %8363 = vst [vmem:[#allocation59_spill] sm:$0xff] %v5637_v44  ;;  %vm8364_vm4 = vcmp.ge.s32.totalorder %v5533_v25, 1  ;;  %vm8365_vm1 = vcmp.ge.s32.totalorder %v5542_v50, 1  ;;  %v308_v44 = vpop.f32.mrf.mxu1 }
  0xe9   :  { %8360 = vst [vmem:[#allocation57_spill] sm:$0xff] %v5627_v16  ;;  %v304_v13 = vadd.f32 %v303_v40, %v255_v18  ;;  %v1379_v57 = vpack.c.bf16 %v669_v52, %v668_v15  ;;  %v5642_v26 = vsel %vm8364_vm4, %v5563_v3, 0.0  ;;  %v5647_v22 = vsel %vm8365_vm1, %v5627_v16, 0.0 }
  0xea   :  { %v5654_v37 = vsel %vm8081_vm9, %v5563_v3, 0.0  ;;  %v5659_v40 = vsel %vm8362_vm6, %v5627_v16, 0.0  ;;  %vm8369_vm4 = vcmask 523264   ;;  %v5666_v38 = vand.u32 7, %v380_v5 }
  0xeb   :  { %8366 = vst [vmem:[#allocation60_spill] sm:$0xff] %v5654_v37  ;;  %v5663_v15 = vmax.f32 %v304_v13, 0.0  ;;  %4056 = vmatmul.msk.bf16.gmra.mxu0 %vm8369_vm4, %v1379_v57  ;;  %v5670_v46 = vand.u32 7, %v381_v47  ;;  %vm5672_vm1 = vcmp.le.s32.totalorder %v362_v32, 6  ;;  %v8372_v3 = vmov 0 }
  0xec   :  { %8367 = vst [vmem:[#allocation61_spill] sm:$0xff] %v5659_v40  ;;  %v8373_v3 = vsel %vm5672_vm1, 4294967295, %v8372_v3  ;;  %vm5677_vm6 = vcmp.ge.s32.totalorder %v363_v55, 1  ;;  %v5683_v5 = vadd.s32 96, %v5112_v54  ;;  %vm8378_vm4 = vcmask 1046528  }
  0xed   :  { %8368 = vst [vmem:[#allocation62_spill] sm:$0xff] %v5663_v15  ;;  %v598_v39 = vrot.slane %v5663_v15, 1  ;;  %v8376_v35 = vsel %vm5677_vm6, 4294967295, %v8375_v35  ;;  %v502_v13 = vrot.slane %v5663_v15, 7  ;;  %vm8379_vm3 = vcmask 1040384  }
  0xee   :  { %8370 = vst [vmem:[#allocation63_spill] sm:$0xff] %v5666_v38  ;;  %v257_v57 = vpop.f32.mrf.mxu0  ;;  %v364_v40 = vand.u32 7, %v5559_v10  ;;  %vm8385_vm7 = vcmp.le.s32.totalorder %v5398_v49, 6  ;;  %vm8387_vm9 = vcmp.le.s32.totalorder %v5407_v36, 6  ;;  %v4801_v10 = vld [vmem:[%s7989_s3 + $0x58] sm:$0xff]  ;;  %v5742_v36 = vadd.s32 104, %v5112_v54 }
  0xef   :  { %8371 = vst [vmem:[#allocation64_spill] sm:$0xff] %v5670_v46  ;;  %v258_v32 = vadd.f32 %v5136_v2, %v257_v57  ;;  %v599_v18 = vsel %vm8378_vm4, %v596_v4, %v598_v39  ;;  %v503_v20 = vsel %vm8379_vm3, %v500_v14, %v502_v13  ;;  %vm8381_vm4 = vcmp.ge.s32.totalorder %v5533_v25, 1  ;;  %1055 = vmatpush.bf16.msrb.mxu1 %v4801_v10  ;;  %v4792_v10 = vld [vmem:[%s7989_s3 + $0x10] sm:$0xff] }
  0xf0   :  { %8374 = vst [vmem:[#allocation65_spill] sm:$0xff] %v8373_v3  ;;  %v670_v37 = vsel %vm5672_vm1, %v599_v18, 0.0  ;;  %v5700_v57 = vsel %vm5677_vm6, %v503_v20, 0.0  ;;  %v5704_v47 = vsel %vm8381_vm4, %v669_v52, 0.0  ;;  %vm8383_vm3 = vcmp.ge.s32.totalorder %v5542_v50, 1  ;;  %v4793_v18 = vld [vmem:[%s7989_s3 + $0x18] sm:$0xff] }
  0xf1   :  { %8377 = vst [vmem:[#allocation66_spill] sm:$0xff] %v8376_v35  ;;  %v307_v4 = vadd.f32 %v306_v0, %v258_v32  ;;  %v5708_v14 = vsel %vm8383_vm3, %v670_v37, 0.0  ;;  %v382_v35 = vshra.s32 %v5683_v5, 3  ;;  %v5717_v0 = vsel %vm8385_vm7, %v669_v52, 0.0  ;;  %v4796_v32 = vld [vmem:[%s7989_s3 + $0x30] sm:$0xff]  ;;  %925 = vmatpush.bf16.msra.mxu3 %v4793_v18 }
  0xf2   :  { %8380 = vst [vmem:[#allocation67_spill] sm:$0xff] %v5700_v57  ;;  %v5721_v51 = vsel %vm8387_vm9, %v670_v37, 0.0  ;;  %vm5737_vm9 = vcmp.le.s32.totalorder %v363_v55, 6  ;;  %vm5744_vm4 = vcmp.ge.s32.totalorder %v364_v40, 1  ;;  %v8393_v49 = vmov 0  ;;  %829 = vmatpush.bf16.msra.mxu2 %v4796_v32 }
  0xf3   :  { %8382 = vst [vmem:[#allocation68_spill] sm:$0xff] %v5704_v47  ;;  %v5723_v20 = vmax.f32 %v307_v4, 0.0  ;;  %v8390_v4 = vmov 0  ;;  %v8394_v49 = vsel %vm5744_vm4, 4294967295, %v8393_v49  ;;  %vm8396_vm7 = vcmp.ge.s32.totalorder %v5666_v38, 1 }
  0xf4   :  { %8384 = vst [vmem:[#allocation69_spill] sm:$0xff] %v5708_v14  ;;  %v8391_v4 = vsel %vm5737_vm9, 4294967295, %v8390_v4  ;;  %v5753_v55 = vsel %vm8396_vm7, %v5663_v15, 0.0  ;;  %vm8398_vm6 = vcmp.ge.s32.totalorder %v5670_v46, 1  ;;  %v5763_v16 = vand.u32 7, %v382_v35  ;;  %v4800_v35 = vld [vmem:[%s7989_s3 + $0x50] sm:$0xff] }
  0xf5   :  { %8386 = vst [vmem:[#allocation70_spill] sm:$0xff] %v5717_v0  ;;  %v600_v3 = vrot.slane %v5723_v20, 1  ;;  %v5758_v52 = vsel %vm8398_vm6, %v5723_v20, 0.0  ;;  %v504_v0 = vrot.slane %v5723_v20, 7  ;;  %vm8401_vm3 = vcmp.le.s32.totalorder %v5542_v50, 6  ;;  %926 = vmatpush.bf16.msra.mxu3 %v4792_v10  ;;  %1056 = vmatpush.bf16.msrb.mxu1 %v4800_v35  ;;  %v4791_v10 = vld [vmem:[%s7989_s3 + $0x8] sm:$0xff] }
  0xf6   :  { %8388 = vst [vmem:[#allocation71_spill] sm:$0xff] %v5721_v51  ;;  %v259_v51 = vpop.f32.mrf.mxu0  ;;  %v5768_v18 = vsel %vm8401_vm3, %v5723_v20, 0.0  ;;  %vm8403_vm7 = vcmask 1046528   ;;  %vm8404_vm6 = vcmask 1040384   ;;  %vm8405_vm3 = vcmp.le.s32.totalorder %v5533_v25, 6  ;;  %830 = vmatpush.bf16.msra.mxu2 %v4795_v33  ;;  %v4799_v35 = vld [vmem:[%s7989_s3 + $0x48] sm:$0xff] }
  0xf7   :  { %8389 = vst [vmem:[#allocation72_spill] sm:$0xff] %v5723_v20  ;;  %v260_v32 = vadd.f32 %v5136_v2, %v259_v51  ;;  %v601_v1 = vsel %vm8403_vm7, %v598_v39, %v600_v3  ;;  %v505_v19 = vsel %vm8404_vm6, %v502_v13, %v504_v0  ;;  %v5785_v51 = vsel %vm8405_vm3, %v5663_v15, 0.0 }
  0xf8   :  { %8392 = vst [vmem:[#allocation73_spill] sm:$0xff] %v8391_v4  ;;  %v671_v39 = vsel %vm5737_vm9, %v601_v1, 0.0  ;;  %v5791_v17 = vsel %vm5744_vm4, %v505_v19, 0.0  ;;  %vm8408_vm7 = vcmp.ge.s32.totalorder %v5666_v38, 1  ;;  %vm8410_vm6 = vcmp.ge.s32.totalorder %v5670_v46, 1  ;;  %v311_v19 = vpop.f32.mrf.mxu1 }
  0xf9   :  { %8395 = vst [vmem:[#allocation74_spill] sm:$0xff] %v8394_v49  ;;  %v309_v47 = vadd.f32 %v308_v44, %v260_v32  ;;  %v1380_v14 = vpack.c.bf16 %v671_v39, %v670_v37  ;;  %v5799_v13 = vsel %vm8408_vm7, %v5700_v57, 0.0  ;;  %v5804_v1 = vsel %vm8410_vm6, %v5791_v17, 0.0  ;;  %927 = vmatpush.bf16.msra.mxu3 %v4791_v10  ;;  %1057 = vmatpush.bf16.msrb.mxu1 %v4799_v35  ;;  %v4790_v35 = vld [vmem:[%s7989_s3] sm:$0xff] }
  0xfa   :  { %8397 = vst [vmem:[#allocation75_spill] sm:$0xff] %v5753_v55  ;;  %v383_v55 = vshra.s32 %v5742_v36, 3  ;;  %v365_v4 = vand.u32 7, %v5589_v29  ;;  %v5812_v33 = vsel %vm8405_vm3, %v5700_v57, 0.0  ;;  %vm8412_vm7 = vcmp.le.s32.totalorder %v5542_v50, 6  ;;  %v4794_v29 = vld [vmem:[%s7989_s3 + $0x20] sm:$0xff] }
  0xfb   :  { %8399 = vst [vmem:[#allocation76_spill] sm:$0xff] %v5758_v52  ;;  %v5817_v37 = vsel %vm8412_vm7, %v5791_v17, 0.0  ;;  %v5819_v32 = vmax.f32 %v309_v47, 0.0  ;;  %vm8415_vm6 = vcmask 523264   ;;  %vm5835_vm3 = vcmp.le.s32.totalorder %v364_v40, 6  ;;  %831 = vmatpush.bf16.msra.mxu2 %v4794_v29  ;;  %v4798_v52 = vld [vmem:[%s7989_s3 + $0x40] sm:$0xff] }
  0xfc   :  { %8400 = vst [vmem:[#allocation77_spill] sm:$0xff] %v5763_v16  ;;  %4057 = vmatmul.msk.bf16.gmra.mxu0 %vm8415_vm6, %v1380_v14  ;;  %v5833_v44 = vand.u32 7, %v383_v55  ;;  %v8417_v47 = vmov 0  ;;  %vm5842_vm6 = vcmp.ge.s32.totalorder %v365_v4, 1  ;;  %vm8423_vm4 = vcmask 1046528  }
  0xfd   :  { %8402 = vst [vmem:[#allocation78_spill] sm:$0xff] %v5768_v18  ;;  %v8418_v47 = vsel %vm5835_vm3, 4294967295, %v8417_v47  ;;  %v602_v14 = vrot.slane %v5819_v32, 1  ;;  %v506_v49 = vrot.slane %v5819_v32, 7  ;;  %v8420_v18 = vmov 0  ;;  %928 = vmatpush.bf16.msra.mxu3 %v4790_v35  ;;  %1058 = vmatpush.bf16.msrb.mxu1 %v4798_v52 }
  0xfe   :  { %8406 = vst [vmem:[#allocation79_spill] sm:$0xff] %v5785_v51  ;;  %v262_v51 = vpop.f32.mrf.mxu0  ;;  %v8421_v18 = vsel %vm5842_vm6, 4294967295, %v8420_v18  ;;  %v366_v10 = vand.u32 7, %v5683_v5  ;;  %vm8142_vm9 = vcmp.ge.s32.totalorder %v5833_v44, 1  ;;  %vm8426_vm7 = vcmask 1040384  }
  0xff   :  { %8407 = vst [vmem:[#allocation80_spill] sm:$0xff] %v5791_v17  ;;  %v263_v55 = vadd.f32 %v5136_v2, %v262_v51  ;;  %v603_v29 = vsel %vm8423_vm4, %v600_v3, %v602_v14  ;;  %v4805_v3 = vld [vmem:[%s7989_s3 + $0x78] sm:$0xff]  ;;  %vm8424_vm4 = vcmp.ge.s32.totalorder %v5666_v38, 1  ;;  %v507_v51 = vsel %vm8426_vm7, %v504_v0, %v506_v49 }
 0x100   :  { %8409 = vst [vmem:[#allocation81_spill] sm:$0xff] %v5799_v13  ;;  %v672_v40 = vsel %vm5835_vm3, %v603_v29, 0.0  ;;  %v5868_v5 = vsel %vm8424_vm4, %v671_v39, 0.0  ;;  %vm8427_vm1 = vcmp.ge.s32.totalorder %v5670_v46, 1  ;;  %v5878_v29 = vsel %vm5842_vm6, %v507_v51, 0.0  ;;  %1185 = vmatpush.bf16.msrb.mxu2 %v4805_v3  ;;  %v313_v3 = vpop.f32.mrf.mxu1  ;;  %v4809_v0 = vld [vmem:[%s7989_s3 + $0x98] sm:$0xff] }
 0x101   :  { %8411 = vst [vmem:[#allocation82_spill] sm:$0xff] %v5812_v33  ;;  %v5859_v33 = vadd.s32 112, %v5112_v54  ;;  %v312_v20 = vadd.f32 %v311_v19, %v263_v55  ;;  %vm8430_vm3 = vcmp.le.s32.totalorder %v5542_v50, 6  ;;  %v5896_v35 = vadd.s32 120, %v5112_v54  ;;  %1315 = vmatpush.bf16.msrb.mxu3 %v4809_v0 }
 0x102   :  { %8413 = vst [vmem:[#allocation83_spill] sm:$0xff] %v5817_v37  ;;  %v5874_v37 = vsel %vm8427_vm1, %v672_v40, 0.0  ;;  %vm8432_vm1 = vcmp.le.s32.totalorder %v5533_v25, 6  ;;  %v8435_v51 = vmov 0  ;;  %vm8438_vm4 = vcmp.ge.s32.totalorder %v5763_v16, 1 }
 0x103   :  { %8414 = vst [vmem:[#allocation84_spill] sm:$0xff] %v5819_v32  ;;  %v5891_v19 = vsel %vm8432_vm1, %v671_v39, 0.0  ;;  %v5893_v55 = vmax.f32 %v312_v20, 0.0  ;;  %v5910_v20 = vsel %vm8438_vm4, %v5819_v32, 0.0  ;;  %vm5912_vm1 = vcmp.ge.s32.totalorder %v366_v10, 1 }
 0x104   :  { %8416 = vst [vmem:[#allocation85_spill] sm:$0xff] %v5833_v44  ;;  %v8440_v39 = vmov 0  ;;  %vm8443_vm7 = vcmp.le.s32.totalorder %v5666_v38, 6  ;;  %vm8446_vm4 = vcmp.le.s32.totalorder %v5670_v46, 6  ;;  %v367_v13 = vand.u32 7, %v5742_v36 }
 0x105   :  { %8419 = vst [vmem:[#allocation86_spill] sm:$0xff] %v8418_v47  ;;  %v5882_v47 = vsel %vm8430_vm3, %v672_v40, 0.0  ;;  %vm5900_vm3 = vcmp.le.s32.totalorder %v365_v4, 6  ;;  %v8441_v39 = vsel %vm5912_vm1, 4294967295, %v8440_v39  ;;  %v5919_v4 = vsel %vm8443_vm7, %v5819_v32, 0.0 }
 0x106   :  { %8422 = vst [vmem:[#allocation87_spill] sm:$0xff] %v8421_v18  ;;  %v8436_v51 = vsel %vm5900_vm3, 4294967295, %v8435_v51  ;;  %v604_v52 = vrot.slane %v5893_v55, 1  ;;  %v5925_v15 = vsel %vm8142_vm9, %v5893_v55, 0.0  ;;  %v508_v50 = vrot.slane %v5893_v55, 7  ;;  %v264_v18 = vpop.f32.mrf.mxu0 }
 0x107   :  { %8425 = vst [vmem:[#allocation88_spill] sm:$0xff] %v5868_v5  ;;  %v5931_v25 = vsel %vm8446_vm4, %v5893_v55, 0.0  ;;  %v265_v17 = vadd.f32 %v5136_v2, %v264_v18  ;;  %vm8448_vm7 = vcmask 1046528   ;;  %vm8449_vm9 = vcmask 1040384  }
 0x108   :  { %8428 = vst [vmem:[#allocation89_spill] sm:$0xff] %v5874_v37  ;;  %v605_v57 = vsel %vm8448_vm7, %v602_v14, %v604_v52  ;;  %v509_v5 = vsel %vm8449_vm9, %v506_v49, %v508_v50  ;;  %vm8451_vm4 = vcmp.ge.s32.totalorder %v5763_v16, 1  ;;  %vm8452_vm9 = vcmp.ge.s32.totalorder %v5833_v44, 1 }
 0x109   :  { %8429 = vst [vmem:[#allocation90_spill] sm:$0xff] %v5878_v29  ;;  %v673_v37 = vsel %vm5900_vm3, %v605_v57, 0.0  ;;  %v5946_v0 = vsel %vm5912_vm1, %v509_v5, 0.0  ;;  %v5952_v18 = vsel %vm8451_vm4, %v5878_v29, 0.0  ;;  %vm8454_vm7 = vcmp.le.s32.totalorder %v5666_v38, 6 }
 0x10a   :  { %8431 = vst [vmem:[#allocation91_spill] sm:$0xff] %v5882_v47  ;;  %v384_v47 = vshra.s32 %v5859_v33, 3  ;;  %v5957_v49 = vsel %vm8452_vm9, %v5946_v0, 0.0  ;;  %vm8456_vm3 = vcmp.le.s32.totalorder %v5670_v46, 6  ;;  %vm8459_vm4 = vcmask 523264  }
 0x10b   :  { %8433 = vst [vmem:[#allocation92_spill] sm:$0xff] %v5891_v19  ;;  %v385_v19 = vshra.s32 %v5896_v35, 3  ;;  %v5971_v14 = vsel %vm8456_vm3, %v5946_v0, 0.0  ;;  %vm5978_vm9 = vcmp.le.s32.totalorder %v366_v10, 6  ;;  %v8463_v32 = vmov 0 }
 0x10c   :  { %8434 = vst [vmem:[#allocation93_spill] sm:$0xff] %v5893_v55  ;;  %v5961_v57 = vand.u32 7, %v384_v47  ;;  %v8460_v47 = vmov 0  ;;  %vm8468_vm1 = vcmask 1040384   ;;  %vm8470_vm3 = vcmp.ge.s32.totalorder %v5763_v16, 1 }
 0x10d   :  { %8437 = vst [vmem:[#allocation94_spill] sm:$0xff] %v8436_v51  ;;  %v8461_v47 = vsel %vm5978_vm9, 4294967295, %v8460_v47  ;;  %v316_v51 = vpop.f32.mrf.mxu1  ;;  %vm8472_vm14 = vcmp.le.s32.totalorder %v5666_v38, 6  ;;  %vm8474_vm6 = vcmp.le.s32.totalorder %v5670_v46, 6 }
 0x10e   :  { %8439 = vst [vmem:[#allocation95_spill] sm:$0xff] %v5910_v20  ;;  %v314_v20 = vadd.f32 %v313_v3, %v265_v17  ;;  %v5966_v17 = vsel %vm8454_vm7, %v5878_v29, 0.0  ;;  %vm5983_vm7 = vcmp.ge.s32.totalorder %v367_v13, 1 }
 0x10f   :  { %8442 = vst [vmem:[#allocation96_spill] sm:$0xff] %v8441_v39  ;;  %v8464_v32 = vsel %vm5983_vm7, 4294967295, %v8463_v32  ;;  %v5990_v39 = vand.u32 7, %v385_v19 }
 0x110   :  { %8444 = vst [vmem:[#allocation97_spill] sm:$0xff] %v5919_v4 }
 0x111   :  { %8445 = vst [vmem:[#allocation98_spill] sm:$0xff] %v5925_v15  ;;  %v1381_v15 = vpack.c.bf16 %v673_v37, %v672_v40  ;;  %v5973_v40 = vmax.f32 %v314_v20, 0.0  ;;  %vm8515_vm13 = vcmp.le.s32.totalorder %v5990_v39, 6 }
 0x112   :  { %8447 = vst [vmem:[#allocation99_spill] sm:$0xff] %v5931_v25 }
 0x113   :  { %8450 = vst [vmem:[#allocation100_spill] sm:$0xff] %v5946_v0  ;;  %4058 = vmatmul.msk.bf16.gmra.mxu0 %vm8459_vm4, %v1381_v15  ;;  %v606_v3 = vrot.slane %v5973_v40, 1  ;;  %v510_v36 = vrot.slane %v5973_v40, 7  ;;  %v267_v15 = vpop.f32.mrf.mxu0  ;;  %vm8467_vm4 = vcmask 1046528  }
 0x114   :  { %8453 = vst [vmem:[#allocation101_spill] sm:$0xff] %v5961_v57  ;;  %v268_v10 = vadd.f32 %v5136_v2, %v267_v15  ;;  %v6007_v15 = vsel %vm8470_vm3, %v673_v37, 0.0  ;;  %vm8486_vm3 = vcmp.ge.s32.totalorder %v5990_v39, 1 }
 0x115   :  { %8455 = vst [vmem:[#allocation102_spill] sm:$0xff] %v5966_v17  ;;  %v607_v5 = vsel %vm8467_vm4, %v604_v52, %v606_v3  ;;  %v511_v4 = vsel %vm8468_vm1, %v508_v50, %v510_v36  ;;  %v368_v17 = vand.u32 7, %v5859_v33  ;;  %vm8471_vm1 = vcmp.ge.s32.totalorder %v5833_v44, 1  ;;  %v318_v0 = vpop.f32.mrf.mxu1 }
 0x116   :  { %8457 = vst [vmem:[#allocation103_spill] sm:$0xff] %v5971_v14  ;;  %v674_v25 = vsel %vm5978_vm9, %v607_v5, 0.0  ;;  %v6003_v19 = vsel %vm5983_vm7, %v511_v4, 0.0  ;;  %v317_v20 = vadd.f32 %v316_v51, %v268_v10  ;;  %v6020_v4 = vsel %vm8472_vm14, %v673_v37, 0.0 }
 0x117   :  { %8458 = vst [vmem:[#allocation104_spill] sm:$0xff] %v5973_v40  ;;  %v6011_v50 = vsel %vm8471_vm1, %v674_v25, 0.0  ;;  %v6024_v51 = vsel %vm8474_vm6, %v674_v25, 0.0  ;;  %vm6031_vm1 = vcmp.le.s32.totalorder %v367_v13, 6  ;;  %v8477_v52 = vmov 0 }
 0x118   :  { %8462 = vst [vmem:[#allocation105_spill] sm:$0xff] %v8461_v47  ;;  %v6026_v5 = vmax.f32 %v317_v20, 0.0  ;;  %v8478_v52 = vsel %vm6031_vm1, 4294967295, %v8477_v52  ;;  %vm8480_vm4 = vcmp.ge.s32.totalorder %v5961_v57, 1  ;;  %vm6040_vm14 = vcmp.ge.s32.totalorder %v368_v17, 1 }
 0x119   :  { %8465 = vst [vmem:[#allocation106_spill] sm:$0xff] %v8464_v32  ;;  %v6038_v37 = vsel %vm8480_vm4, %v5973_v40, 0.0  ;;  %v8481_v33 = vmov 0  ;;  %vm8484_vm6 = vcmp.le.s32.totalorder %v5763_v16, 6  ;;  %vm8487_vm4 = vcmp.le.s32.totalorder %v5833_v44, 6 }
 0x11a   :  { %8466 = vst [vmem:[#allocation107_spill] sm:$0xff] %v5990_v39  ;;  %v8482_v33 = vsel %vm6040_vm14, 4294967295, %v8481_v33  ;;  %v6047_v20 = vsel %vm8484_vm6, %v5973_v40, 0.0  ;;  %v608_v10 = vrot.slane %v6026_v5, 1  ;;  %v512_v13 = vrot.slane %v6026_v5, 7 }
 0x11b   :  { %8469 = vst [vmem:[#allocation108_spill] sm:$0xff] %v6003_v19  ;;  %v6054_v46 = vsel %vm8486_vm3, %v6026_v5, 0.0  ;;  %v6059_v38 = vsel %vm8487_vm4, %v6026_v5, 0.0  ;;  %v269_v32 = vpop.f32.mrf.mxu0  ;;  %vm8489_vm6 = vcmask 1046528   ;;  %vm8490_vm7 = vcmask 1040384  }
 0x11c   :  { %8473 = vst [vmem:[#allocation109_spill] sm:$0xff] %v6020_v4  ;;  %v609_v55 = vsel %vm8489_vm6, %v606_v3, %v608_v10  ;;  %v513_v40 = vsel %vm8490_vm7, %v510_v36, %v512_v13  ;;  %vm8491_vm4 = vcmp.ge.s32.totalorder %v5176_v30, 1  ;;  %v369_v47 = vand.u32 7, %v5896_v35  ;;  %vm8494_vm6 = vmmov %vm8486_vm3 }
 0x11d   :  { %8475 = vst [vmem:[#allocation110_spill] sm:$0xff] %v6024_v51  ;;  %v270_v51 = vadd.f32 %v5136_v2, %v269_v32  ;;  %v675_v14 = vsel %vm6031_vm1, %v609_v55, 0.0  ;;  %v743_v29 = vsel %vm8491_vm4, %v5149_v12, 0.0  ;;  %v6077_v4 = vsel %vm6040_vm14, %v513_v40, 0.0 }
 0x11e   :  { %8476 = vst [vmem:[#allocation111_spill] sm:$0xff] %v6026_v5  ;;  %v1382_v32 = vpack.c.bf16 %v675_v14, %v674_v25  ;;  %vm8492_vm7 = vcmp.ge.s32.totalorder %v5961_v57, 1  ;;  %v6087_v55 = vsel %vm8494_vm6, %v6077_v4, 0.0  ;;  %vm8495_vm3 = vcmp.le.s32.totalorder %v5763_v16, 6  ;;  %vm8500_vm6 = vmmov %vm8491_vm4 }
 0x11f   :  { %8479 = vst [vmem:[#allocation112_spill] sm:$0xff] %v8478_v52  ;;  %v319_v2 = vadd.f32 %v318_v0, %v270_v51  ;;  %v6082_v36 = vsel %vm8492_vm7, %v6003_v19, 0.0  ;;  %v6095_v0 = vsel %vm8495_vm3, %v6003_v19, 0.0  ;;  %vm8497_vm1 = vcmp.le.s32.totalorder %v5833_v44, 6 }
 0x120   :  { %8483 = vst [vmem:[#allocation113_spill] sm:$0xff] %v8482_v33  ;;  %v6100_v25 = vsel %vm8497_vm1, %v6077_v4, 0.0  ;;  %vm8499_vm7 = vcmask 523264   ;;  %v971_v3 = vsel %vm8500_vm6, %v5240_v56, 0.0  ;;  %vm8501_vm3 = vcmp.le.s32.totalorder %v5990_v39, 6 }
 0x121   :  { %8485 = vst [vmem:[#allocation114_spill] sm:$0xff] %v6047_v20  ;;  %v6102_v40 = vmax.f32 %v319_v2, 0.0  ;;  %v6113_v35 = vsel %vm8501_vm3, %v5149_v12, 0.0  ;;  %v8502_v52 = vand.u32 7, %v5112_v54  ;;  %vm6121_vm4 = vcmp.ge.s32.totalorder %v369_v47, 1  ;;  %v8880_v2 = vld [vmem:[#allocation6_spill] sm:$0xff] }
 0x122   :  { %8488 = vst [vmem:[#allocation115_spill] sm:$0xff] %v6059_v38  ;;  %vm6129_vm6 = vcmp.le.s32.totalorder %v368_v17, 6  ;;  %v8510_v51 = vmov 0  ;;  %vm8513_vm3 = vcmp.ge.s32.totalorder %v5168_v27, 1  ;;  %vm8514_vm14 = vcmp.ge.s32.totalorder %v5961_v57, 1 }
 0x123   :  { %8493 = vst [vmem:[#allocation116_spill] sm:$0xff] %v6082_v36  ;;  %4059 = vmatmul.msk.bf16.gmra.mxu0 %vm8499_vm7, %v1382_v32  ;;  %vm6117_vm1 = vcmp.ge.s32.totalorder %v8502_v52, 1  ;;  %vm6125_vm7 = vcmp.le.s32.totalorder %v369_v47, 6  ;;  %v8507_v32 = vmov 0  ;;  %v8511_v51 = vsel %vm6129_vm6, 4294967295, %v8510_v51 }
 0x124   :  { %8496 = vst [vmem:[#allocation117_spill] sm:$0xff] %v6095_v0  ;;  %v8508_v32 = vsel %vm6125_vm7, 4294967295, %v8507_v32  ;;  %v742_v54 = vsel %vm8513_vm3, %v6102_v40, 0.0  ;;  %v467_v52 = vrot.slane %v6102_v40, 7  ;;  %v610_v20 = vrot.slane %v6102_v40, 1 }
 0x125   :  { %8498 = vst [vmem:[#allocation118_spill] sm:$0xff] %v6100_v25  ;;  %v758_v0 = vpack.c.bf16 %v743_v29, %v742_v54  ;;  %v6142_v47 = vsel %vm8514_vm14, %v675_v14, 0.0  ;;  %vm8209_vm9 = vcmp.le.s32.totalorder %v5961_v57, 6  ;;  %v6148_v17 = vsel %vm8515_vm13, %v5240_v56, 0.0 }
 0x126   :  { %8509 = vst [vmem:[#allocation119_spill] sm:$0xff] %v8508_v32  ;;  %vm8516_vm3 = vcmask 1040384   ;;  %v8517_v19 = vrot.slane %v5149_v12, 7  ;;  %v8519_v38 = vrot.slane %v5149_v12, 1  ;;  %v611_v54 = vsel %vm8521_vm15, %v608_v10, %v610_v20 }
 0x127   :  { %8512 = vst [vmem:[#allocation120_spill] sm:$0xff] %v8511_v51  ;;  %v514_v25 = vsel %vm8516_vm3, %v512_v13, %v467_v52  ;;  %vm8518_vm5 = vmmov %vm8516_vm3  ;;  %vm8522_vm14 = vcmask 523264   ;;  %vm8526_vm15 = vcmp.ge.s32.totalorder %v5990_v39, 1  ;;  %vm8527_vm3 = vcmp.le.s32.totalorder %v5763_v16, 6 }
 0x128   :  { %v531_v36 = vsel %vm8518_vm5, %v467_v52, %v8517_v19  ;;  %v629_v29 = vsel %vm8520_vm2, %v610_v20, %v8519_v38  ;;  %3901 = vmatmul.msk.bf16.vlgmr.msra.gmra.mxu2 %vm8522_vm14, %v758_v0  ;;  %v6165_v56 = vsel %vm6121_vm4, %v514_v25, 0.0  ;;  %v676_v19 = vsel %vm6129_vm6, %v611_v54, 0.0  ;;  %v4804_v38 = vld [vmem:[%s7989_s3 + $0x70] sm:$0xff] }
 0x129   :  { %v6161_v5 = vsel %vm6117_vm1, %v531_v36, 0.0  ;;  %v677_v13 = vsel %vm6125_vm7, %v629_v29, 0.0  ;;  %vm8523_vm2 = vcmp.ge.s32.totalorder %v5168_v27, 1  ;;  %vm8524_vm5 = vcmp.ge.s32.totalorder %v5176_v30, 1  ;;  %1186 = vmatpush.bf16.msrb.mxu2 %v4804_v38 }
 0x12a   :  { %v710_v10 = vsel %vm8523_vm2, %v6165_v56, 0.0  ;;  %v711_v20 = vsel %vm8524_vm5, %v6161_v5, 0.0  ;;  %vm8525_vm13 = vmmov %vm8523_vm2  ;;  %v6185_v0 = vsel %vm8209_vm9, %v6102_v40, 0.0  ;;  %v6189_v29 = vsel %vm8526_vm15, %v676_v19, 0.0 }
 0x12b   :  { %v970_v36 = vsel %vm8525_vm13, %v677_v13, 0.0  ;;  %v726_v25 = vpack.c.bf16 %v711_v20, %v710_v10  ;;  %v6193_v54 = vsel %vm8527_vm3, %v675_v14, 0.0  ;;  %v993_v51 = vpack.c.bf16 %v6189_v29, %v6142_v47  ;;  %v4808_v14 = vld [vmem:[%s7989_s3 + $0x90] sm:$0xff] }
 0x12c   :  { %v986_v52 = vpack.c.bf16 %v971_v3, %v970_v36  ;;  %v6202_v10 = vsel %vm8209_vm9, %v6165_v56, 0.0  ;;  %vm8528_vm14 = vcmp.le.s32.totalorder %v5990_v39, 6  ;;  %vm8529_vm2 = vcmask 523264   ;;  %1316 = vmatpush.bf16.msrb.mxu3 %v4808_v14 }
 0x12d   :  { %v6207_v3 = vsel %vm8528_vm14, %v6161_v5, 0.0  ;;  %3925 = vmatmul.msk.bf16.vlgmr.msra.gmra.mxu3 %vm8529_vm2, %v726_v25  ;;  %vm8530_vm5 = vmmov %vm8529_vm2  ;;  %vm8531_vm13 = vcmp.le.s32.totalorder %v5833_v44, 6  ;;  %v6224_v36 = vsel %vm8209_vm9, %v677_v13, 0.0  ;;  %v1383_v29 = vpack.c.bf16 %v677_v13, %v676_v19 }
 0x12e   :  { %3957 = vmatmul.msk.bf16.vlgmr.msrb.gmra.mxu1 %vm8530_vm5, %v986_v52  ;;  %v6218_v38 = vsel %vm8531_vm13, %v676_v19, 0.0  ;;  %vm8532_vm15 = vmmov %vm8529_vm2  ;;  %v8533_v47 = vand.u32 7, %v5147_v11  ;;  %vm8536_vm14 = vcmp.ge.s32.totalorder %v5163_v24, 1  ;;  %v8537_v14 = vpack.c.bf16 %v5222_v45, %v5208_v41  ;;  %v4803_v41 = vld [vmem:[%s7989_s3 + $0x68] sm:$0xff] }
 0x12f   :  { %v713_v25 = vsel %vm8536_vm14, %v5291_v31, 0.0  ;;  %vm8538_vm5 = vcmp.ge.s32.totalorder %v5160_v21, 1  ;;  %vm8539_vm13 = vmmov %vm8529_vm2  ;;  %v8540_v19 = vpack.c.bf16 %v5308_v43, %v5304_v42  ;;  %1187 = vmatpush.bf16.msrb.mxu2 %v4803_v41  ;;  %v8544_v45 = vpack.c.bf16 %v5379_v53, %v5374_v34  ;;  %v4807_v43 = vld [vmem:[%s7989_s3 + $0x88] sm:$0xff]  ;;  %v4821_v41 = vld [vmem:[%s7989_s3 + $0xf8] sm:$0xff] }
 0x130   :  { %vm6233_vm3 = vcmp.ge.s32.totalorder %v8533_v47, 1  ;;  %vm8543_vm14 = vmmov %vm8529_vm2  ;;  %v8545_v42 = vpack.c.bf16 %v5437_v62, %v5433_v58  ;;  %1317 = vmatpush.bf16.msrb.mxu3 %v4807_v43  ;;  %v8551_v34 = vpack.c.bf16 %v5571_v48, %v5567_v59  ;;  %v8553_v53 = vpack.c.bf16 %v5612_v6, %v5607_v7  ;;  %v4802_v58 = vld [vmem:[%s7989_s3 + $0x60] sm:$0xff]  ;;  %v8561_v48 = vld [vmem:[#allocation75_spill] sm:$0xff] }
 0x131   :  { %v565_v20 = vsel %vm6233_vm3, %v5173_v28, 0.0  ;;  %v8542_v28 = vpack.c.bf16 %v5341_v61, %v5336_v60  ;;  %v8547_v60 = vpack.c.bf16 %v5478_v8, %v5473_v63  ;;  %v8549_v61 = vpack.c.bf16 %v5514_v23, %v5509_v9  ;;  %v8556_v63 = vld [vmem:[#allocation69_spill] sm:$0xff]  ;;  %v8557_v8 = vld [vmem:[#allocation68_spill] sm:$0xff] }
 0x132   :  { %v712_v11 = vsel %vm8538_vm5, %v565_v20, 0.0  ;;  %vm8546_vm5 = vmmov %vm8529_vm2  ;;  %v8554_v62 = vpack.c.bf16 %v5647_v22, %v5642_v26  ;;  %v8558_v9 = vpack.c.bf16 %v8556_v63, %v8557_v8  ;;  %v4806_v23 = vld [vmem:[%s7989_s3 + $0x80] sm:$0xff]  ;;  %v4825_v43 = vld [vmem:[%s7989_s3 + $0x118] sm:$0xff]  ;;  %vm8585_vm9 = vcmp.le.s32.totalorder %v5168_v27, 6 }
 0x133   :  { %4060 = vmatmul.msk.bf16.gmra.mxu0 %vm8532_vm15, %v1383_v29  ;;  %v727_v13 = vpack.c.bf16 %v713_v25, %v712_v11  ;;  %vm8541_vm15 = vmmov %vm8529_vm2  ;;  %1188 = vmatpush.bf16.msrb.mxu2 %v4802_v58  ;;  %v8560_v59 = vld [vmem:[#allocation76_spill] sm:$0xff]  ;;  %v8564_v6 = vld [vmem:[#allocation81_spill] sm:$0xff] }
 0x134   :  { %1318 = vmatpush.bf16.msrb.mxu3 %v4806_v23  ;;  %v8562_v7 = vpack.c.bf16 %v8560_v59, %v8561_v48  ;;  %v8565_v26 = vpack.c.bf16 %v5804_v1, %v8564_v6  ;;  %v8567_v22 = vld [vmem:[#allocation89_spill] sm:$0xff]  ;;  %v8568_v47 = vld [vmem:[#allocation88_spill] sm:$0xff]  ;;  %v8570_v11 = vld [vmem:[#allocation98_spill] sm:$0xff] }
 0x135   :  { %v8569_v25 = vpack.c.bf16 %v8567_v22, %v8568_v47  ;;  %v4817_v29 = vld [vmem:[%s7989_s3 + $0xd8] sm:$0xff]  ;;  %v4815_v1 = vld [vmem:[%s7989_s3 + $0xc8] sm:$0xff] }
 0x136   :  { %1623 = vmatpush.bf16.msra.mxu1 %v4817_v29  ;;  %v8589_v59 = vld [vmem:[#allocation20_spill] sm:$0xff] }
 0x137   :  { %1769 = vmatpush.bf16.msra.mxu2 %v4821_v41  ;;  %v8593_v22 = vld [vmem:[#allocation8_spill] sm:$0xff] }
 0x138   :  { %3902 = vmatmul.msk.bf16.gmra.mxu2 %vm8529_vm2, %v8537_v14  ;;  %v4816_v14 = vld [vmem:[%s7989_s3 + $0xd0] sm:$0xff]  ;;  %1915 = vmatpush.bf16.msra.mxu3 %v4825_v43  ;;  %v8597_v29 = vld [vmem:[#allocation28_spill] sm:$0xff] }
 0x13a   :  { %1624 = vmatpush.bf16.msra.mxu1 %v4816_v14 }
 0x13d   :  { %3926 = vmatmul.msk.bf16.gmra.mxu3 %vm8539_vm13, %v727_v13  ;;  %vm8548_vm13 = vmmov %vm8529_vm2  ;;  %v8571_v13 = vld [vmem:[#allocation95_spill] sm:$0xff] }
 0x13e   :  { %3958 = vmatmul.msk.bf16.gmra.mxu1 %vm8541_vm15, %v8540_v19  ;;  %vm8550_vm15 = vmmov %vm8529_vm2  ;;  %v8572_v19 = vpack.c.bf16 %v8570_v11, %v8571_v13 }
 0x13f   :  { %1625 = vmatpush.bf16.msra.mxu1 %v4815_v1 }
 0x148   :  { %3903 = vmatmul.msk.bf16.gmra.mxu2 %vm8543_vm14, %v8542_v28  ;;  %vm8552_vm14 = vmmov %vm8529_vm2  ;;  %v4814_v28 = vld [vmem:[%s7989_s3 + $0xc0] sm:$0xff] }
 0x149   :  { %1626 = vmatpush.bf16.msra.mxu1 %v4814_v28 }
 0x14d   :  { %3927 = vmatmul.msk.bf16.gmra.mxu3 %vm8529_vm2, %v8544_v45  ;;  %v8574_v45 = vpack.c.bf16 %v5957_v49, %v5952_v18  ;;  %v1116_v49 = vpack.c.bf16 %v565_v20, %v6161_v5 }
 0x14e   :  { %3959 = vmatmul.msk.bf16.gmra.mxu1 %vm8546_vm5, %v8545_v42  ;;  %vm8555_vm5 = vmmov %vm8529_vm2  ;;  %v8576_v42 = vpack.c.bf16 %v6011_v50, %v6007_v15 }
 0x158   :  { %3904 = vmatmul.msk.bf16.gmra.mxu2 %vm8548_vm13, %v8547_v60  ;;  %vm8559_vm13 = vmmov %vm8529_vm2  ;;  %v8578_v60 = vpack.c.bf16 %v6054_v46, %v6038_v37  ;;  %v1538_v46 = vsel %vm8585_vm9, %v565_v20, 0.0  ;;  %v4820_v37 = vld [vmem:[%s7989_s3 + $0xf0] sm:$0xff] }
 0x159   :  { %1770 = vmatpush.bf16.msra.mxu2 %v4820_v37  ;;  %vm8591_vm9 = vmmov %vm8529_vm2  ;;  %v8608_v37 = vld [vmem:[#allocation45_spill] sm:$0xff] }
 0x15d   :  { %3928 = vmatmul.msk.bf16.gmra.mxu3 %vm8550_vm15, %v8549_v61  ;;  %vm8563_vm15 = vmmov %vm8529_vm2  ;;  %v8580_v61 = vld [vmem:[#allocation116_spill] sm:$0xff] }
 0x15e   :  { %3960 = vmatmul.msk.bf16.gmra.mxu1 %vm8552_vm14, %v8551_v34  ;;  %vm8566_vm14 = vmmov %vm8529_vm2  ;;  %v8581_v18 = vpack.c.bf16 %v6087_v55, %v8580_v61  ;;  %v4819_v61 = vld [vmem:[%s7989_s3 + $0xe8] sm:$0xff] }
 0x15f   :  { %1771 = vmatpush.bf16.msra.mxu2 %v4819_v61 }
 0x168   :  { %3905 = vmatmul.msk.bf16.gmra.mxu2 %vm8529_vm2, %v8553_v53  ;;  %v4824_v53 = vld [vmem:[%s7989_s3 + $0x110] sm:$0xff] }
 0x169   :  { %1916 = vmatpush.bf16.msra.mxu3 %v4824_v53 }
 0x16d   :  { %3929 = vmatmul.msk.bf16.gmra.mxu3 %vm8555_vm5, %v8554_v62  ;;  %vm8573_vm5 = vmmov %vm8529_vm2 }
 0x16e   :  { %3961 = vmatmul.msk.bf16.gmra.mxu1 %vm8559_vm13, %v8558_v9  ;;  %vm8575_vm13 = vmmov %vm8529_vm2 }
 0x178   :  { %3906 = vmatmul.msk.bf16.gmra.mxu2 %vm8563_vm15, %v8562_v7  ;;  %vm8577_vm15 = vmmov %vm8529_vm2 }
 0x17d   :  { %3930 = vmatmul.msk.bf16.gmra.mxu3 %vm8566_vm14, %v8565_v26  ;;  %vm8579_vm14 = vmmov %vm8529_vm2  ;;  %v8592_v26 = vld [vmem:[#allocation14_spill] sm:$0xff] }
 0x17e   :  { %3962 = vmatmul.msk.bf16.gmra.mxu1 %vm8529_vm2, %v8569_v25  ;;  %v8594_v47 = vpack.c.bf16 %v8592_v26, %v8593_v22  ;;  %v8596_v25 = vld [vmem:[#allocation29_spill] sm:$0xff]  ;;  %v8615_v22 = vld [vmem:[#allocation46_spill] sm:$0xff] }
 0x17f   :  { %v8598_v14 = vpack.c.bf16 %v8596_v25, %v8597_v29  ;;  %v8619_v29 = vld [vmem:[#allocation61_spill] sm:$0xff] }
 0x188   :  { %3907 = vmatmul.msk.bf16.gmra.mxu2 %vm8573_vm5, %v8572_v19  ;;  %vm8582_vm5 = vmmov %vm8529_vm2 }
 0x18d   :  { %3931 = vmatmul.msk.bf16.gmra.mxu3 %vm8575_vm13, %v8574_v45  ;;  %vm8583_vm13 = vcmp.le.s32.totalorder %v5176_v30, 6  ;;  %v8600_v45 = vld [vmem:[#allocation35_spill] sm:$0xff] }
 0x18e   :  { %3963 = vmatmul.msk.bf16.gmra.mxu1 %vm8577_vm15, %v8576_v42  ;;  %v1539_v15 = vsel %vm8583_vm13, %v5291_v31, 0.0  ;;  %vm8584_vm15 = vmmov %vm8529_vm2  ;;  %v8601_v42 = vld [vmem:[#allocation25_spill] sm:$0xff] }
 0x18f   :  { %v1554_v55 = vpack.c.bf16 %v1539_v15, %v1538_v46  ;;  %vm8599_vm13 = vmmov %vm8529_vm2  ;;  %v8602_v43 = vpack.c.bf16 %v8600_v45, %v8601_v42  ;;  %v8604_v15 = vld [vmem:[#allocation30_spill] sm:$0xff] }
 0x190   :  { %v8605_v46 = vld [vmem:[#allocation22_spill] sm:$0xff] }
 0x198   :  { %3908 = vmatmul.msk.bf16.gmra.mxu2 %vm8579_vm14, %v8578_v60  ;;  %vm8588_vm14 = vmmov %vm8529_vm2 }
 0x19d   :  { %3932 = vmatmul.msk.bf16.gmra.mxu3 %vm8529_vm2, %v8581_v18 }
 0x19e   :  { %3964 = vmatmul.msk.bf16.gmra.mxu1 %vm8582_vm5, %v993_v51  ;;  %v8586_v51 = vld [vmem:[#allocation5_spill] sm:$0xff]  ;;  %vm8595_vm5 = vmmov %vm8529_vm2 }
 0x19f   :  { %v8587_v5 = vpack.c.bf16 %v8586_v51, %v5149_v12  ;;  %v8590_v12 = vpack.c.bf16 %v8589_v59, %v5291_v31  ;;  %v4823_v51 = vld [vmem:[%s7989_s3 + $0x108] sm:$0xff] }
 0x1a0   :  { %1917 = vmatpush.bf16.msra.mxu3 %v4823_v51  ;;  %v8612_v59 = vld [vmem:[#allocation41_spill] sm:$0xff]  ;;  %v8631_v51 = vld [vmem:[#allocation83_spill] sm:$0xff] }
 0x1a8   :  { %3989 = vmatmul.msk.bf16.vlgmr.msrb.gmra.mxu2 %vm8584_vm15, %v1116_v49  ;;  %vm8603_vm15 = vmmov %vm8529_vm2 }
 0x1ab   :  { %v1060_v50 = vpop.f32.mrf.mxu1  ;;  %v833_v34 = vpop.f32.mrf.mxu2 }
 0x1ad   :  { %4021 = vmatmul.msk.bf16.vlgmr.msrb.gmra.mxu3 %vm8588_vm14, %v8587_v5  ;;  %vm8607_vm14 = vmmov %vm8529_vm2 }
 0x1ae   :  { %4085 = vmatmul.msk.bf16.vlgmr.msra.gmra.mxu1 %vm8529_vm2, %v1554_v55  ;;  %v8609_v55 = vld [vmem:[#allocation44_spill] sm:$0xff] }
 0x1b0   :  { %v930_v20 = vpop.f32.mrf.mxu3 }
 0x1b1   :  { %v931_v58 = vadd.f32 %v930_v20, %v833_v34  ;;  %v8610_v34 = vpack.c.bf16 %v8608_v37, %v8609_v55  ;;  %v8627_v37 = vld [vmem:[#allocation62_spill] sm:$0xff] }
 0x1b2   :  { %v8628_v55 = vld [vmem:[#allocation54_spill] sm:$0xff] }
 0x1b3   :  { %v1062_v62 = vpop.f32.mrf.mxu1  ;;  %v6371_v63 = vadd.f32 %v1060_v50, %v931_v58  ;;  %v835_v8 = vpop.f32.mrf.mxu2  ;;  %v8606_v50 = vpack.c.bf16 %v8604_v15, %v8605_v46  ;;  %v4818_v15 = vld [vmem:[%s7989_s3 + $0xe0] sm:$0xff] }
 0x1b4   :  { %1772 = vmatpush.bf16.msra.mxu2 %v4818_v15 }
 0x1b8   :  { %v932_v9 = vpop.f32.mrf.mxu3  ;;  %3990 = vmatmul.msk.bf16.gmra.mxu2 %vm8591_vm9, %v8590_v12  ;;  %vm8614_vm9 = vmmov %vm8529_vm2 }
 0x1b9   :  { %v933_v23 = vadd.f32 %v932_v9, %v835_v8 }
 0x1bb   :  { %v1065_v48 = vpop.f32.mrf.mxu1  ;;  %v6377_v7 = vadd.f32 %v1062_v62, %v933_v23  ;;  %v838_v6 = vpop.f32.mrf.mxu2  ;;  %v8611_v23 = vld [vmem:[#allocation51_spill] sm:$0xff] }
 0x1bc   :  { %v8613_v12 = vpack.c.bf16 %v8611_v23, %v8612_v59 }
 0x1bd   :  { %4022 = vmatmul.msk.bf16.gmra.mxu3 %vm8595_vm5, %v8594_v47  ;;  %v8616_v47 = vld [vmem:[#allocation38_spill] sm:$0xff]  ;;  %vm8618_vm5 = vmmov %vm8529_vm2 }
 0x1be   :  { %4086 = vmatmul.msk.bf16.gmra.mxu1 %vm8599_vm13, %v8598_v14  ;;  %v8617_v25 = vpack.c.bf16 %v8615_v22, %v8616_v47  ;;  %v8620_v14 = vld [vmem:[#allocation60_spill] sm:$0xff]  ;;  %vm8622_vm13 = vmmov %vm8529_vm2 }
 0x1bf   :  { %v8635_v22 = vld [vmem:[#allocation80_spill] sm:$0xff] }
 0x1c0   :  { %v935_v1 = vpop.f32.mrf.mxu3 }
 0x1c1   :  { %v936_v11 = vadd.f32 %v935_v1, %v838_v6  ;;  %v8621_v1 = vpack.c.bf16 %v8619_v29, %v8620_v14  ;;  %v8638_v14 = vld [vmem:[#allocation84_spill] sm:$0xff] }
 0x1c3   :  { %v1067_v13 = vpop.f32.mrf.mxu1  ;;  %v6387_v31 = vadd.f32 %v1065_v48, %v936_v11  ;;  %v840_v19 = vpop.f32.mrf.mxu2 }
 0x1c8   :  { %v937_v28 = vpop.f32.mrf.mxu3  ;;  %3991 = vmatmul.msk.bf16.gmra.mxu2 %vm8603_vm15, %v8602_v43  ;;  %v8623_v43 = vld [vmem:[#allocation67_spill] sm:$0xff]  ;;  %vm8626_vm15 = vmmov %vm8529_vm2 }
 0x1c9   :  { %v938_v41 = vadd.f32 %v937_v28, %v840_v19 }
 0x1cb   :  { %v1070_v60 = vpop.f32.mrf.mxu1  ;;  %v6396_v18 = vadd.f32 %v1067_v13, %v938_v41  ;;  %v843_v49 = vpop.f32.mrf.mxu2 }
 0x1cd   :  { %4023 = vmatmul.msk.bf16.gmra.mxu3 %vm8607_vm14, %v8606_v50  ;;  %vm8630_vm14 = vmmov %vm8529_vm2 }
 0x1ce   :  { %4087 = vmatmul.msk.bf16.gmra.mxu1 %vm8529_vm2, %v8610_v34  ;;  %v8629_v34 = vpack.c.bf16 %v8627_v37, %v8628_v55  ;;  %v8647_v37 = vld [vmem:[#allocation100_spill] sm:$0xff] }
 0x1d0   :  { %v940_v5 = vpop.f32.mrf.mxu3 }
 0x1d1   :  { %v941_v53 = vadd.f32 %v940_v5, %v843_v49  ;;  %v8632_v5 = vld [vmem:[#allocation82_spill] sm:$0xff] }
 0x1d3   :  { %v1072_v20 = vpop.f32.mrf.mxu1  ;;  %v6409_v58 = vadd.f32 %v1070_v60, %v941_v53  ;;  %v845_v62 = vpop.f32.mrf.mxu2  ;;  %v8624_v60 = vld [vmem:[#allocation57_spill] sm:$0xff]  ;;  %v8633_v53 = vpack.c.bf16 %v8631_v51, %v8632_v5  ;;  %v8650_v5 = vld [vmem:[#allocation104_spill] sm:$0xff] }
 0x1d4   :  { %v8625_v61 = vpack.c.bf16 %v8623_v43, %v8624_v60 }
 0x1d8   :  { %v942_v8 = vpop.f32.mrf.mxu3  ;;  %3992 = vmatmul.msk.bf16.gmra.mxu2 %vm8614_vm9, %v8613_v12  ;;  %vm8637_vm9 = vmmov %vm8529_vm2 }
 0x1d9   :  { %v943_v9 = vadd.f32 %v942_v8, %v845_v62 }
 0x1db   :  { %v1075_v48 = vpop.f32.mrf.mxu1  ;;  %v6415_v6 = vadd.f32 %v1072_v20, %v943_v9  ;;  %v848_v26 = vpop.f32.mrf.mxu2  ;;  %v4822_v20 = vld [vmem:[%s7989_s3 + $0x100] sm:$0xff] }
 0x1dc   :  { %1918 = vmatpush.bf16.msra.mxu3 %v4822_v20 }
 0x1dd   :  { %4024 = vmatmul.msk.bf16.gmra.mxu3 %vm8618_vm5, %v8617_v25  ;;  %vm8641_vm5 = vmmov %vm8529_vm2 }
 0x1de   :  { %4088 = vmatmul.msk.bf16.gmra.mxu1 %vm8622_vm13, %v8621_v1  ;;  %v8639_v1 = vld [vmem:[#allocation72_spill] sm:$0xff]  ;;  %vm8645_vm13 = vmmov %vm8529_vm2 }
 0x1e0   :  { %v945_v11 = vpop.f32.mrf.mxu3 }
 0x1e1   :  { %v946_v13 = vadd.f32 %v945_v11, %v848_v26  ;;  %v8634_v26 = vld [vmem:[#allocation90_spill] sm:$0xff]  ;;  %v8640_v11 = vpack.c.bf16 %v8638_v14, %v8639_v1  ;;  %v8657_v1 = vpack.c.bf16 %v6165_v56, %v6077_v4 }
 0x1e2   :  { %v8636_v47 = vpack.c.bf16 %v8634_v26, %v8635_v22 }
 0x1e3   :  { %v1077_v19 = vpop.f32.mrf.mxu1  ;;  %v6425_v28 = vadd.f32 %v1075_v48, %v946_v13  ;;  %v850_v41 = vpop.f32.mrf.mxu2  ;;  %v8642_v13 = vld [vmem:[#allocation103_spill] sm:$0xff] }
 0x1e8   :  { %v947_v45 = vpop.f32.mrf.mxu3  ;;  %3993 = vmatmul.msk.bf16.gmra.mxu2 %vm8626_vm15, %v8625_v61  ;;  %vm8649_vm15 = vmmov %vm8529_vm2 }
 0x1e9   :  { %v948_v42 = vadd.f32 %v947_v45, %v850_v41 }
 0x1eb   :  { %v1080_v49 = vpop.f32.mrf.mxu1  ;;  %v6434_v46 = vadd.f32 %v1077_v19, %v948_v42  ;;  %v853_v50 = vpop.f32.mrf.mxu2  ;;  %v8643_v19 = vld [vmem:[#allocation102_spill] sm:$0xff] }
 0x1ec   :  { %v8644_v41 = vpack.c.bf16 %v8642_v13, %v8643_v19 }
 0x1ed   :  { %4025 = vmatmul.msk.bf16.gmra.mxu3 %vm8630_vm14, %v8629_v34  ;;  %vm8653_vm14 = vmmov %vm8529_vm2 }
 0x1ee   :  { %4089 = vmatmul.msk.bf16.gmra.mxu1 %vm8529_vm2, %v8633_v53  ;;  %v8651_v53 = vld [vmem:[#allocation93_spill] sm:$0xff] }
 0x1ef   :  { %v8652_v20 = vpack.c.bf16 %v8650_v5, %v8651_v53 }
 0x1f0   :  { %v950_v62 = vpop.f32.mrf.mxu3 }
 0x1f1   :  { %v951_v8 = vadd.f32 %v950_v62, %v853_v50  ;;  %v8646_v50 = vld [vmem:[#allocation108_spill] sm:$0xff]  ;;  %v8654_v62 = vld [vmem:[#allocation118_spill] sm:$0xff] }
 0x1f2   :  { %v8648_v55 = vpack.c.bf16 %v8646_v50, %v8647_v37 }
 0x1f3   :  { %v6447_v9 = vpop.f32.mrf.mxu1  ;;  %v6449_v23 = vadd.f32 %v1080_v49, %v951_v8  ;;  %v855_v59 = vpop.f32.mrf.mxu2  ;;  %v8655_v8 = vld [vmem:[#allocation117_spill] sm:$0xff] }
 0x1f8   :  { %v952_v12 = vpop.f32.mrf.mxu3  ;;  %3994 = vmatmul.msk.bf16.gmra.mxu2 %vm8637_vm9, %v8636_v47  ;;  %vm8658_vm9 = vmmov %vm8529_vm2 }
 0x1f9   :  { %v6451_v48 = vadd.f32 %v952_v12, %v855_v59  ;;  %v8656_v59 = vpack.c.bf16 %v8654_v62, %v8655_v8  ;;  %v8669_v62 = vld [vmem:[#allocation19_spill] sm:$0xff] }
 0x1fb   :  { %v1085_v25 = vpop.f32.mrf.mxu1  ;;  %v858_v29 = vpop.f32.mrf.mxu2 }
 0x1fd   :  { %4026 = vmatmul.msk.bf16.gmra.mxu3 %vm8641_vm5, %v8640_v11  ;;  %v1450_v11 = vpop.f32.mrf.mxu0  ;;  %vm8661_vm5 = vmmov %vm8529_vm2 }
 0x1fe   :  { %4090 = vmatmul.msk.bf16.gmra.mxu1 %vm8645_vm13, %v8644_v41  ;;  %v8659_v41 = vld [vmem:[#allocation111_spill] sm:$0xff]  ;;  %vm8663_vm13 = vmmov %vm8529_vm2 }
 0x200   :  { %v955_v45 = vpop.f32.mrf.mxu3 }
 0x201   :  { %v956_v42 = vadd.f32 %v955_v45, %v858_v29  ;;  %v8660_v45 = vpack.c.bf16 %v6102_v40, %v8659_v41  ;;  %v8664_v40 = vld [vmem:[#allocation11_spill] sm:$0xff] }
 0x203   :  { %v6465_v43 = vpop.f32.mrf.mxu1  ;;  %v6467_v60 = vadd.f32 %v1085_v25, %v956_v42  ;;  %v860_v61 = vpop.f32.mrf.mxu2  ;;  %v8662_v42 = vpack.c.bf16 %v6207_v3, %v6202_v10 }
 0x205   :  { %v6505_v56 = vpop.f32.mrf.mxu0 }
 0x208   :  { %v957_v49 = vpop.f32.mrf.mxu3  ;;  %3995 = vmatmul.msk.bf16.gmra.mxu2 %vm8649_vm15, %v8648_v55  ;;  %vm8667_vm15 = vmmov %vm8529_vm2 }
 0x209   :  { %v6469_v15 = vadd.f32 %v957_v49, %v860_v61 }
 0x20b   :  { %v1090_v34 = vpop.f32.mrf.mxu1  ;;  %v863_v51 = vpop.f32.mrf.mxu2 }
 0x20d   :  { %4027 = vmatmul.msk.bf16.gmra.mxu3 %vm8653_vm14, %v8652_v20  ;;  %v8668_v20 = vld [vmem:[#allocation21_spill] sm:$0xff]  ;;  %vm8671_vm14 = vmmov %vm8529_vm2 }
 0x20e   :  { %4091 = vmatmul.msk.bf16.gmra.mxu1 %vm8529_vm2, %v8656_v59  ;;  %v8670_v8 = vpack.c.bf16 %v8668_v20, %v8669_v62  ;;  %v1455_v59 = vpop.f32.mrf.mxu0 }
 0x210   :  { %v960_v12 = vpop.f32.mrf.mxu3 }
 0x211   :  { %v961_v26 = vadd.f32 %v960_v12, %v863_v51  ;;  %v8665_v51 = vld [vmem:[#allocation12_spill] sm:$0xff] }
 0x212   :  { %v8666_v5 = vpack.c.bf16 %v8664_v40, %v8665_v51  ;;  %v8676_v51 = vld [vmem:[#allocation36_spill] sm:$0xff] }
 0x213   :  { %v6483_v22 = vpop.f32.mrf.mxu1  ;;  %v6485_v47 = vadd.f32 %v1090_v34, %v961_v26  ;;  %v865_v25 = vpop.f32.mrf.mxu2 }
 0x216   :  { %v6523_v41 = vpop.f32.mrf.mxu0 }
 0x218   :  { %v962_v29 = vpop.f32.mrf.mxu3  ;;  %3996 = vmatmul.msk.bf16.gmra.mxu2 %vm8658_vm9, %v8657_v1  ;;  %vm8678_vm9 = vmmov %vm8529_vm2 }
 0x219   :  { %v6487_v14 = vadd.f32 %v962_v29, %v865_v25 }
 0x21b   :  { %v1095_v13 = vpop.f32.mrf.mxu1  ;;  %v868_v19 = vpop.f32.mrf.mxu2 }
 0x21d   :  { %4028 = vmatmul.msk.bf16.gmra.mxu3 %vm8661_vm5, %v8660_v45  ;;  %vm8682_vm5 = vmmov %vm8529_vm2 }
 0x21e   :  { %4092 = vmatmul.msk.bf16.gmra.mxu1 %vm8663_vm13, %v8662_v42  ;;  %v8672_v42 = vld [vmem:[#allocation27_spill] sm:$0xff]  ;;  %vm8686_vm13 = vmmov %vm8529_vm2 }
 0x220   :  { %v965_v61 = vpop.f32.mrf.mxu3 }
 0x221   :  { %v966_v49 = vadd.f32 %v965_v61, %v868_v19  ;;  %v8673_v61 = vld [vmem:[#allocation26_spill] sm:$0xff] }
 0x223   :  { %v6501_v50 = vpop.f32.mrf.mxu1  ;;  %v6503_v4 = vadd.f32 %v1095_v13, %v966_v49  ;;  %v870_v37 = vpop.f32.mrf.mxu2  ;;  %v8674_v49 = vpack.c.bf16 %v8672_v42, %v8673_v61 }
 0x228   :  { %v967_v55 = vpop.f32.mrf.mxu3  ;;  %4117 = vmatmul.msk.bf16.vlgmr.msra.gmra.mxu2 %vm8667_vm15, %v8666_v5  ;;  %vm8690_vm15 = vmmov %vm8529_vm2 }
 0x229   :  { %v6507_v34 = vadd.f32 %v967_v55, %v870_v37 }
 0x22b   :  { %v1628_v10 = vpop.f32.mrf.mxu1  ;;  %v1190_v3 = vpop.f32.mrf.mxu2 }
 0x22c   :  { %v1230_v53 = vadd.f32 %v1190_v3, %v6371_v63  ;;  %v1460_v3 = vpop.f32.mrf.mxu0 }
 0x22d   :  { %4149 = vmatmul.msk.bf16.vlgmr.msra.gmra.mxu3 %vm8671_vm14, %v8670_v8  ;;  %vm8694_vm14 = vmmov %vm8529_vm2 }
 0x230   :  { %v1320_v12 = vpop.f32.mrf.mxu3 }
 0x231   :  { %v1360_v26 = vadd.f32 %v1320_v12, %v1230_v53 }
 0x233   :  { %v6518_v25 = vpop.f32.mrf.mxu1  ;;  %v1490_v29 = vadd.f32 %v1450_v11, %v1360_v26  ;;  %v1192_v1 = vpop.f32.mrf.mxu2  ;;  %v8675_v11 = vld [vmem:[#allocation37_spill] sm:$0xff] }
 0x234   :  { %v1231_v13 = vadd.f32 %v1192_v1, %v6377_v7  ;;  %v8677_v5 = vpack.c.bf16 %v8675_v11, %v8676_v51  ;;  %v8680_v1 = vld [vmem:[#allocation42_spill] sm:$0xff]  ;;  %v6547_v42 = vpop.f32.mrf.mxu0 }
 0x235   :  { %v6521_v19 = vadd.f32 %v1628_v10, %v1490_v29 }
 0x238   :  { %v1322_v45 = vpop.f32.mrf.mxu3  ;;  %4118 = vmatmul.msk.bf16.gmra.mxu2 %vm8529_vm2, %v8674_v49 }
 0x239   :  { %v6525_v63 = vadd.f32 %v1322_v45, %v1231_v13 }
 0x23b   :  { %v1633_v37 = vpop.f32.mrf.mxu1  ;;  %v1195_v55 = vpop.f32.mrf.mxu2 }
 0x23c   :  { %v1232_v40 = vadd.f32 %v1195_v55, %v6387_v31  ;;  %v8679_v31 = vld [vmem:[#allocation43_spill] sm:$0xff]  ;;  %v8684_v55 = vld [vmem:[#allocation52_spill] sm:$0xff] }
 0x23d   :  { %4150 = vmatmul.msk.bf16.gmra.mxu3 %vm8678_vm9, %v8677_v5  ;;  %v8681_v13 = vpack.c.bf16 %v8679_v31, %v8680_v1  ;;  %vm8701_vm9 = vmmov %vm8529_vm2 }
 0x240   :  { %v1325_v7 = vpop.f32.mrf.mxu3 }
 0x241   :  { %v1362_v10 = vadd.f32 %v1325_v7, %v1232_v40 }
 0x243   :  { %v6536_v53 = vpop.f32.mrf.mxu1  ;;  %v1492_v20 = vadd.f32 %v1455_v59, %v1362_v10  ;;  %v1197_v62 = vpop.f32.mrf.mxu2  ;;  %v8683_v59 = vld [vmem:[#allocation53_spill] sm:$0xff] }
 0x244   :  { %v1233_v8 = vadd.f32 %v1197_v62, %v6396_v18  ;;  %v8685_v40 = vpack.c.bf16 %v8683_v59, %v8684_v55 }
 0x245   :  { %v6539_v12 = vadd.f32 %v1633_v37, %v1492_v20  ;;  %v1465_v20 = vpop.f32.mrf.mxu0 }
 0x248   :  { %v1327_v26 = vpop.f32.mrf.mxu3  ;;  %4119 = vmatmul.msk.bf16.gmra.mxu2 %vm8682_vm5, %v8681_v13  ;;  %vm8705_vm5 = vmmov %vm8529_vm2 }
 0x249   :  { %v6541_v29 = vadd.f32 %v1327_v26, %v1233_v8  ;;  %v8688_v26 = vld [vmem:[#allocation58_spill] sm:$0xff] }
 0x24b   :  { %v1638_v45 = vpop.f32.mrf.mxu1  ;;  %v1200_v61 = vpop.f32.mrf.mxu2 }
 0x24c   :  { %v1234_v49 = vadd.f32 %v1200_v61, %v6409_v58  ;;  %v8687_v58 = vld [vmem:[#allocation59_spill] sm:$0xff] }
 0x24d   :  { %4151 = vmatmul.msk.bf16.gmra.mxu3 %vm8686_vm13, %v8685_v40  ;;  %v8689_v31 = vpack.c.bf16 %v8687_v58, %v8688_v26  ;;  %v8696_v58 = vld [vmem:[#allocation79_spill] sm:$0xff]  ;;  %vm8709_vm13 = vmmov %vm8529_vm2 }
 0x250   :  { %v1330_v18 = vpop.f32.mrf.mxu3 }
 0x251   :  { %v1364_v37 = vadd.f32 %v1330_v18, %v1234_v49  ;;  %v8691_v49 = vld [vmem:[#allocation71_spill] sm:$0xff] }
 0x253   :  { %v6554_v11 = vpop.f32.mrf.mxu1  ;;  %v1494_v51 = vadd.f32 %v1460_v3, %v1364_v37  ;;  %v1202_v5 = vpop.f32.mrf.mxu2  ;;  %v8692_v3 = vld [vmem:[#allocation70_spill] sm:$0xff] }
 0x254   :  { %v1235_v7 = vadd.f32 %v1202_v5, %v6415_v6  ;;  %v8693_v59 = vpack.c.bf16 %v8691_v49, %v8692_v3  ;;  %v6570_v6 = vpop.f32.mrf.mxu0  ;;  %v8698_v3 = vld [vmem:[#allocation91_spill] sm:$0xff] }
 0x255   :  { %v6557_v10 = vadd.f32 %v1638_v45, %v1494_v51 }
 0x258   :  { %v1332_v62 = vpop.f32.mrf.mxu3  ;;  %4120 = vmatmul.msk.bf16.gmra.mxu2 %vm8690_vm15, %v8689_v31  ;;  %vm8713_vm15 = vmmov %vm8529_vm2 }
 0x259   :  { %v6559_v8 = vadd.f32 %v1332_v62, %v1235_v7 }
 0x25b   :  { %v1643_v1 = vpop.f32.mrf.mxu1  ;;  %v1205_v13 = vpop.f32.mrf.mxu2 }
 0x25c   :  { %v1236_v61 = vadd.f32 %v1205_v13, %v6425_v28  ;;  %v8695_v28 = vld [vmem:[#allocation78_spill] sm:$0xff]  ;;  %v1470_v31 = vpop.f32.mrf.mxu0 }
 0x25d   :  { %4152 = vmatmul.msk.bf16.gmra.mxu3 %vm8694_vm14, %v8693_v59  ;;  %v8697_v26 = vpack.c.bf16 %v8695_v28, %v8696_v58  ;;  %v8702_v28 = vld [vmem:[#allocation99_spill] sm:$0xff]  ;;  %vm8715_vm14 = vmmov %vm8529_vm2 }
 0x260   :  { %v1335_v45 = vpop.f32.mrf.mxu3 }
 0x261   :  { %v1366_v55 = vadd.f32 %v1335_v45, %v1236_v61 }
 0x263   :  { %v6572_v40 = vpop.f32.mrf.mxu1  ;;  %v1496_v18 = vadd.f32 %v1465_v20, %v1366_v55  ;;  %v1207_v37 = vpop.f32.mrf.mxu2  ;;  %v8699_v20 = vld [vmem:[#allocation92_spill] sm:$0xff] }
 0x264   :  { %v1237_v51 = vadd.f32 %v1207_v37, %v6434_v46  ;;  %v8700_v59 = vpack.c.bf16 %v8698_v3, %v8699_v20  ;;  %v6588_v55 = vpop.f32.mrf.mxu0 }
 0x265   :  { %v6575_v5 = vadd.f32 %v1643_v1, %v1496_v18 }
 0x268   :  { %v1337_v7 = vpop.f32.mrf.mxu3  ;;  %4121 = vmatmul.msk.bf16.gmra.mxu2 %vm8529_vm2, %v8697_v26 }
 0x269   :  { %v6577_v62 = vadd.f32 %v1337_v7, %v1237_v51 }
 0x26b   :  { %v1648_v13 = vpop.f32.mrf.mxu1  ;;  %v1210_v49 = vpop.f32.mrf.mxu2 }
 0x26c   :  { %v1238_v61 = vadd.f32 %v1210_v49, %v6449_v23  ;;  %v8703_v23 = vld [vmem:[#allocation97_spill] sm:$0xff]  ;;  %v1475_v20 = vpop.f32.mrf.mxu0 }
 0x26d   :  { %4153 = vmatmul.msk.bf16.gmra.mxu3 %vm8701_vm9, %v8700_v59  ;;  %v8704_v58 = vpack.c.bf16 %v8702_v28, %v8703_v23  ;;  %vm8718_vm9 = vmmov %vm8529_vm2 }
 0x270   :  { %v1340_v46 = vpop.f32.mrf.mxu3 }
 0x271   :  { %v1368_v1 = vadd.f32 %v1340_v46, %v1238_v61  ;;  %v8706_v61 = vld [vmem:[#allocation110_spill] sm:$0xff] }
 0x273   :  { %v1498_v45 = vadd.f32 %v1470_v31, %v1368_v1  ;;  %v6590_v18 = vpop.f32.mrf.mxu2  ;;  %v6594_v51 = vpop.f32.mrf.mxu1  ;;  %v8707_v31 = vld [vmem:[#allocation109_spill] sm:$0xff] }
 0x274   :  { %v8708_v3 = vpack.c.bf16 %v8706_v61, %v8707_v31  ;;  %v6611_v28 = vpop.f32.mrf.mxu0 }
 0x275   :  { %v6592_v37 = vadd.f32 %v1648_v13, %v1498_v45 }
 0x278   :  { %v6596_v7 = vpop.f32.mrf.mxu3  ;;  %4122 = vmatmul.msk.bf16.gmra.mxu2 %vm8705_vm5, %v8704_v58  ;;  %v8710_v58 = vld [vmem:[#allocation115_spill] sm:$0xff]  ;;  %vm8721_vm5 = vcmask 1040384  }
 0x27b   :  { %v1215_v26 = vpop.f32.mrf.mxu2  ;;  %v1653_v13 = vpop.f32.mrf.mxu1 }
 0x27c   :  { %v1240_v49 = vadd.f32 %v1215_v26, %v6467_v60  ;;  %v8711_v60 = vld [vmem:[#allocation114_spill] sm:$0xff] }
 0x27d   :  { %4154 = vmatmul.msk.bf16.gmra.mxu3 %vm8709_vm13, %v8708_v3  ;;  %v8712_v26 = vpack.c.bf16 %v8710_v58, %v8711_v60  ;;  %v4841_v60 = vld [vmem:[%s7991_s5 + $0x78] sm:$0xff]  ;;  %vm8722_vm13 = vcmask 1046528  }
 0x27e   :  { %2287 = vmatpush.bf16.msra.mxu0 %v4841_v60 }
 0x280   :  { %v1345_v59 = vpop.f32.mrf.mxu3 }
 0x281   :  { %v1370_v46 = vadd.f32 %v1345_v59, %v1240_v49  ;;  %v8714_v49 = vpack.c.bf16 %v6218_v38, %v6193_v54  ;;  %v1480_v59 = vpop.f32.mrf.mxu0  ;;  %v8716_v54 = vpack.c.bf16 %v6113_v35, %v6185_v0  ;;  %v4840_v35 = vld [vmem:[%s7991_s5 + $0x70] sm:$0xff] }
 0x282   :  { %2288 = vmatpush.bf16.msra.mxu0 %v4840_v35 }
 0x283   :  { %v1500_v1 = vadd.f32 %v1475_v20, %v1370_v46  ;;  %v6607_v45 = vpop.f32.mrf.mxu2  ;;  %v6619_v61 = vpop.f32.mrf.mxu1 }
 0x285   :  { %v6609_v52 = vadd.f32 %v1653_v13, %v1500_v1 }
 0x288   :  { %v6613_v23 = vpop.f32.mrf.mxu3  ;;  %4123 = vmatmul.msk.bf16.gmra.mxu2 %vm8713_vm15, %v8712_v26  ;;  %vm8723_vm15 = vmmov %vm8721_vm5 }
 0x28b   :  { %v1220_v31 = vpop.f32.mrf.mxu2  ;;  %v1658_v1 = vpop.f32.mrf.mxu1 }
 0x28c   :  { %v1242_v3 = vadd.f32 %v1220_v31, %v6485_v47  ;;  %v8717_v31 = vpack.c.bf16 %v6148_v17, %v6224_v36  ;;  %v1491_v17 = vadd.f32 %v6505_v56, %v6525_v63 }
 0x28d   :  { %4155 = vmatmul.msk.bf16.gmra.mxu3 %vm8715_vm14, %v8714_v49  ;;  %vm8724_vm14 = vmmov %vm8722_vm13 }
 0x290   :  { %v1350_v20 = vpop.f32.mrf.mxu3 }
 0x291   :  { %v1372_v13 = vadd.f32 %v1350_v20, %v1242_v3 }
 0x293   :  { %v1502_v46 = vadd.f32 %v1480_v59, %v1372_v13  ;;  %v6626_v39 = vpop.f32.mrf.mxu2 }
 0x295   :  { %v6628_v58 = vadd.f32 %v1658_v1, %v1502_v46  ;;  %v1669_v1 = vadd.f32 %v6518_v25, %v1491_v17 }
 0x298   :  { %v6633_v26 = vpop.f32.mrf.mxu3  ;;  %4124 = vmatmul.msk.bf16.gmra.mxu2 %vm8529_vm2, %v8716_v54  ;;  %v4839_v54 = vld [vmem:[%s7991_s5 + $0x68] sm:$0xff]  ;;  %vm8728_vm2 = vmmov %vm8721_vm5 }
 0x299   :  { %2289 = vmatpush.bf16.msra.mxu0 %v4839_v54 }
 0x29b   :  { %v1225_v38 = vpop.f32.mrf.mxu2 }
 0x29c   :  { %v1244_v47 = vadd.f32 %v1225_v38, %v6503_v4  ;;  %v6663_v38 = vld [vmem:[%s7990_s4] ss:$0 sm:$0xff] }
 0x29d   :  { %4156 = vmatmul.msk.bf16.gmra.mxu3 %vm8718_vm9, %v8717_v31  ;;  %vm8729_vm9 = vmmov %vm8722_vm13 }
 0x2a0   :  { %v1355_v3 = vpop.f32.mrf.mxu3 }
 0x2a1   :  { %v6644_v49 = vadd.f32 %v1355_v3, %v1244_v47 }
 0x2a3   :  { %v6646_v20 = vpop.f32.mrf.mxu2 }
 0x2a8   :  { %v6651_v0 = vpop.f32.mrf.mxu3 }
 0x2ab   :  { %v1774_v13 = vpop.f32.mrf.mxu2 }
 0x2ac   :  { %v1814_v4 = vadd.f32 %v1774_v13, %v6521_v19 }
 0x2b0   :  { %v1920_v59 = vpop.f32.mrf.mxu3 }
 0x2b1   :  { %v1960_v36 = vadd.f32 %v1920_v59, %v1814_v4  ;;  %v1493_v4 = vadd.f32 %v6523_v41, %v6541_v29 }
 0x2b3   :  { %v1776_v46 = vpop.f32.mrf.mxu2  ;;  %v1980_v56 = vadd.f32 %v6663_v38, %v1960_v36 }
 0x2b4   :  { %v1815_v60 = vadd.f32 %v1776_v46, %v1669_v1 }
 0x2b5   :  { %v6670_v35 = vmax.f32 %v1980_v56, 0.0  ;;  %v4838_v56 = vld [vmem:[%s7991_s5 + $0x60] sm:$0xff] }
 0x2b6   :  { %2290 = vmatpush.bf16.msra.mxu0 %v4838_v56 }
 0x2b7   :  { %v8213_v1 = vrot.slane %v6670_v35, 7 }
 0x2b8   :  { %v1922_v47 = vpop.f32.mrf.mxu3 }
 0x2b9   :  { %v1961_v19 = vadd.f32 %v1922_v47, %v1815_v60  ;;  %v8212_v47 = vrot.slane %v6670_v35, 1 }
 0x2bb   :  { %v1981_v31 = vadd.f32 %v6663_v38, %v1961_v19  ;;  %v1779_v63 = vpop.f32.mrf.mxu2 }
 0x2bc   :  { %v1816_v25 = vadd.f32 %v1779_v63, %v6539_v12  ;;  %v1671_v12 = vadd.f32 %v6536_v53, %v1493_v4 }
 0x2bd   :  { %v6668_v3 = vmax.f32 %v1981_v31, 0.0 }
 0x2bf   :  { %8719 = vst [vmem:[#allocation69_spill] sm:$0xff] %v6668_v3  ;;  %v2031_v17 = vrot.slane %v6668_v3, 7  ;;  %v2094_v36 = vrot.slane %v6668_v3, 1 }
 0x2c0   :  { %v1925_v13 = vpop.f32.mrf.mxu3 }
 0x2c1   :  { %v1962_v59 = vadd.f32 %v1925_v13, %v1816_v25  ;;  %v6685_v41 = vsel %vm8721_vm5, %v8213_v1, %v2031_v17  ;;  %v6699_v25 = vsel %vm8722_vm13, %v8212_v47, %v2094_v36  ;;  %v1495_v47 = vadd.f32 %v6547_v42, %v6559_v8  ;;  %vm8736_vm5 = vmmov %vm8728_vm2 }
 0x2c2   :  { %vm8737_vm13 = vmmov %vm8729_vm9 }
 0x2c3   :  { %v1982_v46 = vadd.f32 %v6663_v38, %v1962_v59  ;;  %v1781_v60 = vpop.f32.mrf.mxu2 }
 0x2c4   :  { %v1817_v31 = vadd.f32 %v1781_v60, %v1671_v12 }
 0x2c5   :  { %v6678_v54 = vmax.f32 %v1982_v46, 0.0  ;;  %v2078_v46 = vsel %vm6233_vm3, %v6685_v41, 0.0 }
 0x2c7   :  { %8720 = vst [vmem:[#allocation68_spill] sm:$0xff] %v6678_v54  ;;  %v2033_v29 = vrot.slane %v6678_v54, 7  ;;  %v2096_v19 = vrot.slane %v6678_v54, 1  ;;  %v6694_v63 = vpack.c.bf16 %v6678_v54, %v6668_v3 }
 0x2c8   :  { %v1927_v53 = vpop.f32.mrf.mxu3 }
 0x2c9   :  { %v1963_v13 = vadd.f32 %v1927_v53, %v1817_v31  ;;  %v6702_v4 = vsel %vm8723_vm15, %v2031_v17, %v2033_v29  ;;  %v6705_v59 = vsel %vm8724_vm14, %v2094_v36, %v2096_v19  ;;  %vm8742_vm15 = vmmov %vm8728_vm2 }
 0x2ca   :  { %8725 = vst [vmem:[#allocation76_spill] sm:$0xff] %v6705_v59  ;;  %v2079_v12 = vsel %vm5255_vm10, %v6702_v4, 0.0  ;;  %vm8743_vm14 = vmmov %vm8729_vm9 }
 0x2cb   :  { %v1983_v31 = vadd.f32 %v6663_v38, %v1963_v13  ;;  %v6716_v56 = vpack.c.bf16 %v2079_v12, %v2078_v46  ;;  %v1784_v17 = vpop.f32.mrf.mxu2 }
 0x2cc   :  { %v1818_v36 = vadd.f32 %v1784_v17, %v6557_v10 }
 0x2cd   :  { %v6718_v53 = vmax.f32 %v1983_v31, 0.0  ;;  %v2143_v31 = vsel %vm5198_vm8, %v6705_v59, 0.0  ;;  %v4837_v59 = vld [vmem:[%s7991_s5 + $0x58] sm:$0xff] }
 0x2ce   :  { %2291 = vmatpush.bf16.msra.mxu0 %v4837_v59 }
 0x2cf   :  { %8727 = vst [vmem:[#allocation75_spill] sm:$0xff] %v6718_v53  ;;  %v2035_v1 = vrot.slane %v6718_v53, 7  ;;  %v2098_v3 = vrot.slane %v6718_v53, 1 }
 0x2d0   :  { %v1930_v44 = vpop.f32.mrf.mxu3 }
 0x2d1   :  { %v1964_v16 = vadd.f32 %v1930_v44, %v1818_v36  ;;  %v6728_v13 = vsel %vm8728_vm2, %v2033_v29, %v2035_v1  ;;  %v6731_v46 = vsel %vm8729_vm9, %v2096_v19, %v2098_v3  ;;  %v1673_v19 = vadd.f32 %v6554_v11, %v1495_v47  ;;  %v4879_v47 = vld [vmem:[%s7991_s5 + $0x1a8] sm:$0xff] }
 0x2d2   :  { %8730 = vst [vmem:[#allocation81_spill] sm:$0xff] %v6731_v46  ;;  %v2144_v57 = vsel %vm5259_vm11, %v6731_v46, 0.0 }
 0x2d3   :  { %v1984_v42 = vadd.f32 %v6663_v38, %v1964_v16  ;;  %v6742_v44 = vpack.c.bf16 %v2144_v57, %v2143_v31  ;;  %v1786_v8 = vpop.f32.mrf.mxu2 }
 0x2d4   :  { %v1819_v54 = vadd.f32 %v1786_v8, %v1673_v19 }
 0x2d5   :  { %8733 = vst [vmem:[#allocation89_spill] sm:$0xff] %v6742_v44  ;;  %v6744_v29 = vmax.f32 %v1984_v42, 0.0  ;;  %v2080_v42 = vsel %vm5264_vm12, %v6728_v13, 0.0 }
 0x2d7   :  { %8734 = vst [vmem:[#allocation88_spill] sm:$0xff] %v6744_v29  ;;  %v2037_v36 = vrot.slane %v6744_v29, 7  ;;  %v2100_v10 = vrot.slane %v6744_v29, 1  ;;  %v6754_v17 = vpack.c.bf16 %v6744_v29, %v6718_v53  ;;  %v1497_v53 = vadd.f32 %v6570_v6, %v6577_v62 }
 0x2d8   :  { %v1932_v16 = vpop.f32.mrf.mxu3 }
 0x2d9   :  { %8735 = vst [vmem:[#allocation98_spill] sm:$0xff] %v6754_v17  ;;  %v1965_v57 = vadd.f32 %v1932_v16, %v1819_v54  ;;  %v6757_v31 = vsel %vm8736_vm5, %v2035_v1, %v2037_v36  ;;  %v6760_v11 = vsel %vm8737_vm13, %v2098_v3, %v2100_v10 }
 0x2da   :  { %8738 = vst [vmem:[#allocation95_spill] sm:$0xff] %v6760_v11  ;;  %v2081_v19 = vsel %vm5326_vm0, %v6757_v31, 0.0 }
 0x2db   :  { %v1985_v54 = vadd.f32 %v6663_v38, %v1965_v57  ;;  %v6771_v59 = vpack.c.bf16 %v2081_v19, %v2080_v42  ;;  %v1789_v1 = vpop.f32.mrf.mxu2  ;;  %v8745_v19 = vld [vmem:[#allocation23_spill] sm:$0xff] }
 0x2dc   :  { %v1820_v3 = vadd.f32 %v1789_v1, %v6575_v5  ;;  %vm8746_vm2 = vnez %v8745_v19  ;;  %v8747_v1 = vld [vmem:[#allocation32_spill] sm:$0xff] }
 0x2dd   :  { %v6773_v16 = vmax.f32 %v1985_v54, 0.0  ;;  %v2145_v54 = vsel %vm8746_vm2, %v6760_v11, 0.0  ;;  %vm8748_vm9 = vnez %v8747_v1  ;;  %v4836_v11 = vld [vmem:[%s7991_s5 + $0x50] sm:$0xff] }
 0x2de   :  { %2292 = vmatpush.bf16.msra.mxu0 %v4836_v11 }
 0x2df   :  { %8741 = vst [vmem:[#allocation116_spill] sm:$0xff] %v6773_v16  ;;  %v2039_v12 = vrot.slane %v6773_v16, 7  ;;  %v2102_v17 = vrot.slane %v6773_v16, 1 }
 0x2e0   :  { %v1935_v44 = vpop.f32.mrf.mxu3  ;;  %v8836_v60 = vld [vmem:[#allocation98_spill] sm:$0xff] }
 0x2e1   :  { %v1966_v46 = vadd.f32 %v1935_v44, %v1820_v3  ;;  %v6783_v57 = vsel %vm8742_vm15, %v2037_v36, %v2039_v12  ;;  %v6786_v42 = vsel %vm8743_vm14, %v2100_v10, %v2102_v17  ;;  %v1675_v10 = vadd.f32 %v6572_v40, %v1497_v53 }
 0x2e2   :  { %8744 = vst [vmem:[#allocation5_spill] sm:$0xff] %v6786_v42  ;;  %v2146_v8 = vsel %vm8748_vm9, %v6786_v42, 0.0 }
 0x2e3   :  { %v1986_v6 = vadd.f32 %v6663_v38, %v1966_v46  ;;  %v6797_v62 = vpack.c.bf16 %v2146_v8, %v2145_v54  ;;  %v1791_v44 = vpop.f32.mrf.mxu2  ;;  %v1109_v8 = vadd.f32 %v6447_v9, %v6451_v48 }
 0x2e4   :  { %v1821_v29 = vadd.f32 %v1791_v44, %v1675_v10  ;;  %v8754_v10 = vld [vmem:[#allocation40_spill] sm:$0xff] }
 0x2e5   :  { %v6799_v36 = vmax.f32 %v1986_v6, 0.0  ;;  %v8752_v6 = vld [vmem:[#allocation34_spill] sm:$0xff]  ;;  %vm8755_vm14 = vnez %v8754_v10  ;;  %v1239_v9 = vadd.f32 %v6590_v18, %v1109_v8 }
 0x2e6   :  { %vm8753_vm15 = vnez %v8752_v6 }
 0x2e7   :  { %8749 = vst [vmem:[#allocation20_spill] sm:$0xff] %v6799_v36  ;;  %v2041_v3 = vrot.slane %v6799_v36, 7  ;;  %v2104_v5 = vrot.slane %v6799_v36, 1  ;;  %v6809_v1 = vpack.c.bf16 %v6799_v36, %v6773_v16  ;;  %v2082_v44 = vsel %vm8753_vm15, %v6783_v57, 0.0  ;;  %v8764_v36 = vld [vmem:[#allocation50_spill] sm:$0xff] }
 0x2e8   :  { %v1937_v46 = vpop.f32.mrf.mxu3 }
 0x2e9   :  { %8750 = vst [vmem:[#allocation14_spill] sm:$0xff] %v6809_v1  ;;  %v1967_v54 = vadd.f32 %v1937_v46, %v1821_v29  ;;  %v6814_v40 = vsel %vm8736_vm5, %v2039_v12, %v2041_v3  ;;  %v6817_v53 = vsel %vm8737_vm13, %v2102_v17, %v2104_v5  ;;  %v1369_v17 = vadd.f32 %v6596_v7, %v1239_v9  ;;  %v8760_v9 = vld [vmem:[#allocation48_spill] sm:$0xff] }
 0x2ea   :  { %8751 = vst [vmem:[#allocation8_spill] sm:$0xff] %v6817_v53  ;;  %v2083_v16 = vsel %vm8755_vm14, %v6814_v40, 0.0  ;;  %vm8761_vm2 = vnez %v8760_v9 }
 0x2eb   :  { %v1987_v48 = vadd.f32 %v6663_v38, %v1967_v54  ;;  %v6829_v12 = vpack.c.bf16 %v2083_v16, %v2082_v44  ;;  %v1794_v29 = vpop.f32.mrf.mxu2  ;;  %v1499_v18 = vadd.f32 %v6588_v55, %v1369_v17  ;;  %v8758_v54 = vld [vmem:[#allocation39_spill] sm:$0xff] }
 0x2ec   :  { %v1822_v46 = vadd.f32 %v1794_v29, %v6592_v37  ;;  %vm8759_vm9 = vnez %v8758_v54  ;;  %v4835_v37 = vld [vmem:[%s7991_s5 + $0x48] sm:$0xff] }
 0x2ed   :  { %v6832_v11 = vmax.f32 %v1987_v48, 0.0  ;;  %v2147_v44 = vsel %vm8759_vm9, %v6817_v53, 0.0  ;;  %2293 = vmatpush.bf16.msra.mxu0 %v4835_v37  ;;  %v4856_v53 = vld [vmem:[%s7991_s5 + $0xf0] sm:$0xff] }
 0x2ef   :  { %8756 = vst [vmem:[#allocation29_spill] sm:$0xff] %v6832_v11  ;;  %v2043_v1 = vrot.slane %v6832_v11, 7  ;;  %v2106_v10 = vrot.slane %v6832_v11, 1 }
 0x2f0   :  { %v1940_v42 = vpop.f32.mrf.mxu3  ;;  %v8843_v6 = vld [vmem:[#allocation14_spill] sm:$0xff] }
 0x2f1   :  { %v1968_v8 = vadd.f32 %v1940_v42, %v1822_v46  ;;  %v6841_v16 = vsel %vm8736_vm5, %v2041_v3, %v2043_v1  ;;  %v6844_v7 = vsel %vm8737_vm13, %v2104_v5, %v2106_v10  ;;  %v1677_v5 = vadd.f32 %v6594_v51, %v1499_v18 }
 0x2f2   :  { %8757 = vst [vmem:[#allocation28_spill] sm:$0xff] %v6844_v7  ;;  %v2148_v48 = vsel %vm8761_vm2, %v6844_v7, 0.0  ;;  %v1111_v18 = vadd.f32 %v6465_v43, %v6469_v15  ;;  %vm8765_vm2 = vnez %v8764_v36  ;;  %v8766_v15 = vld [vmem:[#allocation56_spill] sm:$0xff] }
 0x2f3   :  { %v1988_v55 = vadd.f32 %v6663_v38, %v1968_v8  ;;  %v6855_v42 = vpack.c.bf16 %v2148_v48, %v2147_v44  ;;  %v1796_v3 = vpop.f32.mrf.mxu2  ;;  %v4857_v8 = vld [vmem:[%s7991_s5 + $0xf8] sm:$0xff]  ;;  %v2084_v43 = vsel %vm8765_vm2, %v6841_v16, 0.0  ;;  %vm8767_vm9 = vnez %v8766_v15 }
 0x2f4   :  { %v1823_v19 = vadd.f32 %v1796_v3, %v1677_v5  ;;  %v4833_v44 = vld [vmem:[%s7991_s5 + $0x38] sm:$0xff]  ;;  %2660 = vmatpush.bf16.msrb.mxu3 %v4857_v8  ;;  %v1241_v37 = vadd.f32 %v6607_v45, %v1111_v18  ;;  %v4848_v45 = vld [vmem:[%s7991_s5 + $0xb0] sm:$0xff]  ;;  %vm8824_vm2 = vcmask 1046528  }
 0x2f5   :  { %v6857_v29 = vmax.f32 %v1988_v55, 0.0  ;;  %v4849_v55 = vld [vmem:[%s7991_s5 + $0xb8] sm:$0xff]  ;;  %2384 = vmatpush.bf16.msrb.mxu1 %v4833_v44 }
 0x2f6   :  { %2522 = vmatpush.bf16.msrb.mxu2 %v4849_v55  ;;  %v1371_v44 = vadd.f32 %v6613_v23, %v1241_v37  ;;  %v4847_v37 = vld [vmem:[%s7991_s5 + $0xa8] sm:$0xff] }
 0x2f7   :  { %8762 = vst [vmem:[#allocation35_spill] sm:$0xff] %v6857_v29  ;;  %v2045_v17 = vrot.slane %v6857_v29, 7  ;;  %v2108_v46 = vrot.slane %v6857_v29, 1  ;;  %v6873_v51 = vpack.c.bf16 %v6857_v29, %v6832_v11  ;;  %v8772_v29 = vld [vmem:[#allocation65_spill] sm:$0xff] }
 0x2f8   :  { %v1942_v48 = vpop.f32.mrf.mxu3  ;;  %2661 = vmatpush.bf16.msrb.mxu3 %v4856_v53  ;;  %v1501_v53 = vadd.f32 %v6611_v28, %v1371_v44  ;;  %vm8773_vm8 = vnez %v8772_v29 }
 0x2f9   :  { %v1969_v3 = vadd.f32 %v1942_v48, %v1823_v19  ;;  %v6881_v5 = vsel %vm8736_vm5, %v2043_v1, %v2045_v17  ;;  %v6884_v9 = vsel %vm8737_vm13, %v2106_v10, %v2108_v46  ;;  %v4832_v19 = vld [vmem:[%s7991_s5 + $0x30] sm:$0xff] }
 0x2fa   :  { %8763 = vst [vmem:[#allocation25_spill] sm:$0xff] %v6884_v9  ;;  %v2085_v11 = vsel %vm8767_vm9, %v6881_v5, 0.0  ;;  %2385 = vmatpush.bf16.msrb.mxu1 %v4832_v19  ;;  %2523 = vmatpush.bf16.msrb.mxu2 %v4848_v45  ;;  %v8770_v45 = vld [vmem:[#allocation55_spill] sm:$0xff]  ;;  %v4830_v19 = vld [vmem:[%s7991_s5 + $0x20] sm:$0xff] }
 0x2fb   :  { %v1989_v1 = vadd.f32 %v6663_v38, %v1969_v3  ;;  %v6896_v8 = vpack.c.bf16 %v2085_v11, %v2084_v43  ;;  %v1799_v10 = vpop.f32.mrf.mxu2  ;;  %v4831_v43 = vld [vmem:[%s7991_s5 + $0x28] sm:$0xff]  ;;  %vm8771_vm11 = vnez %v8770_v45 }
 0x2fc   :  { %v1824_v55 = vadd.f32 %v1799_v10, %v6609_v52  ;;  %v4855_v52 = vld [vmem:[%s7991_s5 + $0xe8] sm:$0xff]  ;;  %v2149_v18 = vsel %vm8771_vm11, %v6884_v9, 0.0 }
 0x2fd   :  { %v6899_v48 = vmax.f32 %v1989_v1, 0.0  ;;  %2662 = vmatpush.bf16.msrb.mxu3 %v4855_v52  ;;  %v8779_v9 = vld [vmem:[#allocation74_spill] sm:$0xff] }
 0x2fe   :  { %2386 = vmatpush.bf16.msrb.mxu1 %v4831_v43  ;;  %2524 = vmatpush.bf16.msrb.mxu2 %v4847_v37  ;;  %v4853_v37 = vld [vmem:[%s7991_s5 + $0xd8] sm:$0xff]  ;;  %vm8780_vm11 = vnez %v8779_v9 }
 0x2ff   :  { %8768 = vst [vmem:[#allocation30_spill] sm:$0xff] %v6899_v48  ;;  %v2047_v11 = vrot.slane %v6899_v48, 7  ;;  %v2110_v23 = vrot.slane %v6899_v48, 1 }
 0x300   :  { %v1945_v3 = vpop.f32.mrf.mxu3 }
 0x301   :  { %v1970_v1 = vadd.f32 %v1945_v3, %v1824_v55  ;;  %v6926_v10 = vsel %vm8736_vm5, %v2045_v17, %v2047_v11  ;;  %v6929_v7 = vsel %vm8737_vm13, %v2108_v46, %v2110_v23  ;;  %v1679_v55 = vadd.f32 %v6619_v61, %v1501_v53  ;;  %v4854_v3 = vld [vmem:[%s7991_s5 + $0xe0] sm:$0xff] }
 0x302   :  { %8769 = vst [vmem:[#allocation22_spill] sm:$0xff] %v6929_v7  ;;  %v2150_v54 = vsel %vm8773_vm8, %v6929_v7, 0.0  ;;  %v4834_v61 = vld [vmem:[%s7991_s5 + $0x40] sm:$0xff]  ;;  %2663 = vmatpush.bf16.msrb.mxu3 %v4854_v3  ;;  %2387 = vmatpush.bf16.msrb.mxu1 %v4830_v19  ;;  %v8777_v19 = vld [vmem:[#allocation66_spill] sm:$0xff] }
 0x303   :  { %v1990_v28 = vadd.f32 %v6663_v38, %v1970_v1  ;;  %v6940_v44 = vpack.c.bf16 %v2150_v54, %v2149_v18  ;;  %v1801_v17 = vpop.f32.mrf.mxu2  ;;  %v4846_v54 = vld [vmem:[%s7991_s5 + $0xa0] sm:$0xff]  ;;  %2294 = vmatpush.bf16.msra.mxu0 %v4834_v61  ;;  %vm8778_vm8 = vnez %v8777_v19 }
 0x304   :  { %v1825_v43 = vadd.f32 %v1801_v17, %v1679_v55  ;;  %2525 = vmatpush.bf16.msrb.mxu2 %v4846_v54  ;;  %v4845_v17 = vld [vmem:[%s7991_s5 + $0x98] sm:$0xff]  ;;  %v1113_v55 = vadd.f32 %v6483_v22, %v6487_v14  ;;  %v2086_v54 = vsel %vm8778_vm8, %v6926_v10, 0.0 }
 0x305   :  { %v6942_v46 = vmax.f32 %v1990_v28, 0.0  ;;  %v4829_v28 = vld [vmem:[%s7991_s5 + $0x18] sm:$0xff] }
 0x306   :  { %v1243_v22 = vadd.f32 %v6626_v39, %v1113_v55  ;;  %2664 = vmatpush.bf16.msrb.mxu3 %v4853_v37  ;;  %2388 = vmatpush.bf16.msrb.mxu1 %v4829_v28  ;;  %v4828_v39 = vld [vmem:[%s7991_s5 + $0x10] sm:$0xff]  ;;  %v1660_v28 = vpop.f32.mrf.mxu1 }
 0x307   :  { %8774 = vst [vmem:[#allocation45_spill] sm:$0xff] %v6942_v46  ;;  %v2049_v52 = vrot.slane %v6942_v46, 7  ;;  %v2112_v18 = vrot.slane %v6942_v46, 1  ;;  %v6964_v53 = vpack.c.bf16 %v6942_v46, %v6899_v48 }
 0x308   :  { %v1947_v1 = vpop.f32.mrf.mxu3  ;;  %2526 = vmatpush.bf16.msrb.mxu2 %v4845_v17  ;;  %v1373_v61 = vadd.f32 %v6633_v26, %v1243_v22 }
 0x309   :  { %8775 = vst [vmem:[#allocation44_spill] sm:$0xff] %v6964_v53  ;;  %v1971_v3 = vadd.f32 %v1947_v1, %v1825_v43  ;;  %v6975_v29 = vsel %vm8736_vm5, %v2047_v11, %v2049_v52  ;;  %v6978_v48 = vsel %vm8737_vm13, %v2110_v23, %v2112_v18  ;;  %v1482_v23 = vpop.f32.mrf.mxu0  ;;  %v4852_v53 = vld [vmem:[%s7991_s5 + $0xd0] sm:$0xff] }
 0x30a   :  { %8776 = vst [vmem:[#allocation51_spill] sm:$0xff] %v6978_v48  ;;  %v2087_v45 = vsel %vm8780_vm11, %v6975_v29, 0.0  ;;  %2665 = vmatpush.bf16.msrb.mxu3 %v4852_v53  ;;  %2389 = vmatpush.bf16.msrb.mxu1 %v4828_v39  ;;  %v1503_v55 = vadd.f32 %v1482_v23, %v1373_v61  ;;  %v4827_v53 = vld [vmem:[%s7991_s5 + $0x8] sm:$0xff] }
 0x30b   :  { %v1991_v14 = vadd.f32 %v6663_v38, %v1971_v3  ;;  %v6990_v11 = vpack.c.bf16 %v2087_v45, %v2086_v54  ;;  %v1804_v43 = vpop.f32.mrf.mxu2  ;;  %v4844_v45 = vld [vmem:[%s7991_s5 + $0x90] sm:$0xff]  ;;  %v4851_v54 = vld [vmem:[%s7991_s5 + $0xc8] sm:$0xff] }
 0x30c   :  { %v1826_v9 = vadd.f32 %v1804_v43, %v6628_v58  ;;  %2527 = vmatpush.bf16.msrb.mxu2 %v4844_v45  ;;  %v4843_v43 = vld [vmem:[%s7991_s5 + $0x88] sm:$0xff]  ;;  %v4850_v45 = vld [vmem:[%s7991_s5 + $0xc0] sm:$0xff]  ;;  %v1681_v46 = vadd.f32 %v1660_v28, %v1503_v55 }
 0x30d   :  { %v6993_v1 = vmax.f32 %v1991_v14, 0.0  ;;  %v8783_v23 = vld [vmem:[#allocation73_spill] sm:$0xff] }
 0x30e   :  { %vm8784_vm11 = vnez %v8783_v23  ;;  %2666 = vmatpush.bf16.msrb.mxu3 %v4851_v54  ;;  %2390 = vmatpush.bf16.msrb.mxu1 %v4827_v53 }
 0x30f   :  { %8781 = vst [vmem:[#allocation41_spill] sm:$0xff] %v6993_v1  ;;  %v2051_v37 = vrot.slane %v6993_v1, 7  ;;  %v2114_v26 = vrot.slane %v6993_v1, 1  ;;  %v2151_v61 = vsel %vm8784_vm11, %v6978_v48, 0.0 }
 0x310   :  { %v1950_v17 = vpop.f32.mrf.mxu3  ;;  %2528 = vmatpush.bf16.msrb.mxu2 %v4843_v43  ;;  %v1115_v43 = vadd.f32 %v6501_v50, %v6507_v34 }
 0x311   :  { %v1972_v3 = vadd.f32 %v1950_v17, %v1826_v9  ;;  %v7013_v22 = vsel %vm8736_vm5, %v2049_v52, %v2051_v37  ;;  %v7016_v14 = vsel %vm8737_vm13, %v2112_v18, %v2114_v26  ;;  %v8785_v52 = vld [vmem:[#allocation86_spill] sm:$0xff]  ;;  %v4865_v17 = vld [vmem:[%s7991_s5 + $0x138] sm:$0xff]  ;;  %v1485_v7 = vpop.f32.mrf.mxu0  ;;  %vm8789_vm13 = vcmask 1040384  }
 0x312   :  { %8782 = vst [vmem:[#allocation46_spill] sm:$0xff] %v7016_v14  ;;  %vm8786_vm5 = vnez %v8785_v52  ;;  %v4826_v52 = vld [vmem:[%s7991_s5] sm:$0xff]  ;;  %2798 = vmatpush.bf16.msrb.mxu0 %v4865_v17  ;;  %2667 = vmatpush.bf16.msrb.mxu3 %v4850_v45  ;;  %v1504_v28 = vadd.f32 %v1485_v7, %v6644_v49  ;;  %v1245_v49 = vadd.f32 %v6646_v20, %v1115_v43 }
 0x313   :  { %v2152_v18 = vsel %vm8786_vm5, %v7016_v14, 0.0  ;;  %v1992_v39 = vadd.f32 %v6663_v38, %v1972_v3  ;;  %v1806_v9 = vpop.f32.mrf.mxu2  ;;  %v4842_v3 = vld [vmem:[%s7991_s5 + $0x80] sm:$0xff]  ;;  %2391 = vmatpush.bf16.msrb.mxu1 %v4826_v52  ;;  %vm8790_vm5 = vcmask 1046528  }
 0x314   :  { %v7039_v58 = vpack.c.bf16 %v2152_v18, %v2151_v61  ;;  %v1827_v18 = vadd.f32 %v1806_v9, %v1681_v46  ;;  %2529 = vmatpush.bf16.msrb.mxu2 %v4842_v3  ;;  %v1663_v46 = vpop.f32.mrf.mxu1  ;;  %v8792_v9 = vld [vmem:[#allocation87_spill] sm:$0xff] }
 0x315   :  { %v7047_v54 = vmax.f32 %v1992_v39, 0.0  ;;  %vm8793_vm11 = vnez %v8792_v9  ;;  %v1682_v3 = vadd.f32 %v1663_v46, %v1504_v28 }
 0x316   :  { %v2088_v45 = vsel %vm8793_vm11, %v7013_v22, 0.0 }
 0x317   :  { %8787 = vst [vmem:[#allocation38_spill] sm:$0xff] %v7047_v54  ;;  %v2053_v48 = vrot.slane %v7047_v54, 7  ;;  %v2116_v61 = vrot.slane %v7047_v54, 1  ;;  %v7053_v53 = vpack.c.bf16 %v7047_v54, %v6993_v1  ;;  %v8794_v1 = vld [vmem:[#allocation96_spill] sm:$0xff] }
 0x318   :  { %v1952_v23 = vpop.f32.mrf.mxu3  ;;  %vm8795_vm8 = vnez %v8794_v1 }
 0x319   :  { %8788 = vst [vmem:[#allocation61_spill] sm:$0xff] %v7053_v53  ;;  %v1973_v55 = vadd.f32 %v1952_v23, %v1827_v18  ;;  %v7059_v39 = vsel %vm8789_vm13, %v2051_v37, %v2053_v48  ;;  %v7062_v17 = vsel %vm8790_vm5, %v2114_v26, %v2116_v61  ;;  %v1375_v23 = vadd.f32 %v6651_v0, %v1245_v49  ;;  %v1487_v14 = vpop.f32.mrf.mxu0  ;;  %vm8797_vm5 = vmmov %vm8789_vm13 }
 0x31a   :  { %8791 = vst [vmem:[#allocation60_spill] sm:$0xff] %v7062_v17  ;;  %v2089_v50 = vsel %vm8795_vm8, %v7059_v39, 0.0  ;;  %vm8798_vm13 = vcmask 1046528  }
 0x31b   :  { %v1993_v7 = vadd.f32 %v6663_v38, %v1973_v55  ;;  %v7074_v37 = vpack.c.bf16 %v2089_v50, %v2088_v45  ;;  %v1809_v26 = vpop.f32.mrf.mxu2  ;;  %v1505_v43 = vadd.f32 %v1487_v14, %v1375_v23  ;;  %v4864_v45 = vld [vmem:[%s7991_s5 + $0x130] sm:$0xff]  ;;  %v8802_v14 = vld [vmem:[#allocation105_spill] sm:$0xff] }
 0x31c   :  { %v1828_v53 = vadd.f32 %v1809_v26, %v1682_v3  ;;  %v8800_v50 = vld [vmem:[#allocation94_spill] sm:$0xff]  ;;  %vm8803_vm11 = vnez %v8802_v14  ;;  %2799 = vmatpush.bf16.msrb.mxu0 %v4864_v45 }
 0x31d   :  { %v7077_v52 = vmax.f32 %v1993_v7, 0.0  ;;  %vm8801_vm8 = vnez %v8800_v50 }
 0x31e   :  { %v2153_v49 = vsel %vm8801_vm8, %v7062_v17, 0.0 }
 0x31f   :  { %8796 = vst [vmem:[#allocation67_spill] sm:$0xff] %v7077_v52  ;;  %v2055_v18 = vrot.slane %v7077_v52, 7  ;;  %v2118_v1 = vrot.slane %v7077_v52, 1 }
 0x320   :  { %v1955_v20 = vpop.f32.mrf.mxu3 }
 0x321   :  { %v1974_v55 = vadd.f32 %v1955_v20, %v1828_v53  ;;  %v7087_v0 = vsel %vm8797_vm5, %v2053_v48, %v2055_v18  ;;  %v7090_v28 = vsel %vm8798_vm13, %v2116_v61, %v2118_v1  ;;  %v1665_v48 = vpop.f32.mrf.mxu1 }
 0x322   :  { %8799 = vst [vmem:[#allocation57_spill] sm:$0xff] %v7090_v28  ;;  %v2154_v53 = vsel %vm8803_vm11, %v7090_v28, 0.0  ;;  %v1683_v3 = vadd.f32 %v1665_v48, %v1505_v43 }
 0x323   :  { %v1994_v7 = vadd.f32 %v6663_v38, %v1974_v55  ;;  %v7101_v26 = vpack.c.bf16 %v2154_v53, %v2153_v49  ;;  %v1811_v23 = vpop.f32.mrf.mxu2  ;;  %v8806_v49 = vld [vmem:[#allocation106_spill] sm:$0xff]  ;;  %v8808_v53 = vld [vmem:[#allocation113_spill] sm:$0xff] }
 0x324   :  { %v1829_v46 = vadd.f32 %v1811_v23, %v1683_v3  ;;  %vm8807_vm11 = vnez %v8806_v49  ;;  %vm8809_vm8 = vnez %v8808_v53 }
 0x325   :  { %v7103_v61 = vmax.f32 %v1994_v7, 0.0  ;;  %v2090_v43 = vsel %vm8807_vm11, %v7087_v0, 0.0 }
 0x327   :  { %8804 = vst [vmem:[#allocation62_spill] sm:$0xff] %v7103_v61  ;;  %v2057_v20 = vrot.slane %v7103_v61, 7  ;;  %v2120_v34 = vrot.slane %v7103_v61, 1  ;;  %v7109_v54 = vpack.c.bf16 %v7103_v61, %v7077_v52  ;;  %v8821_v52 = vrot.slane %v6670_v35, 7 }
 0x328   :  { %v1957_v14 = vpop.f32.mrf.mxu3 }
 0x329   :  { %v1975_v17 = vadd.f32 %v1957_v14, %v1829_v46  ;;  %v7112_v55 = vsel %vm8797_vm5, %v2055_v18, %v2057_v20  ;;  %v7115_v45 = vsel %vm8798_vm13, %v2118_v1, %v2120_v34  ;;  %vm8811_vm5 = vcmp.ge.s32.totalorder %v5168_v27, 1  ;;  %v8832_v1 = vld [vmem:[#allocation13_spill] sm:$0xff] }
 0x32a   :  { %8805 = vst [vmem:[#allocation54_spill] sm:$0xff] %v7115_v45  ;;  %v2091_v7 = vsel %vm8809_vm8, %v7112_v55, 0.0  ;;  %vm8812_vm13 = vcmp.ge.s32.totalorder %v5176_v30, 1  ;;  %v8823_v30 = vrot.slane %v6670_v35, 1 }
 0x32b   :  { %v1995_v23 = vadd.f32 %v6663_v38, %v1975_v17  ;;  %v7126_v46 = vpack.c.bf16 %v2091_v7, %v2090_v43  ;;  %vm7134_vm9 = vmpackc.low %vm8812_vm13, %vm8811_vm5  ;;  %v8816_v17 = vld [vmem:[#allocation9_spill] sm:$0xff]  ;;  %v8818_v7 = vld [vmem:[#allocation112_spill] sm:$0xff]  ;;  %vm8820_vm13 = vcmask 1040384  }
 0x32c   :  { %vm8817_vm8 = vnez %v8816_v17  ;;  %vm8819_vm5 = vnez %v8818_v7  ;;  %vm8822_vm11 = vmmov %vm8820_vm13 }
 0x32d   :  { %v7128_v18 = vmax.f32 %v1995_v23, 0.0  ;;  %v2142_v43 = vsel %vm8817_vm8, %v6699_v25, 0.0  ;;  %v2155_v23 = vsel %vm8819_vm5, %v7115_v45, 0.0  ;;  %vm4405_vm5 = vmpackc.low %vm6233_vm3, %vm6117_vm1 }
 0x32f   :  { %8810 = vst [vmem:[#allocation83_spill] sm:$0xff] %v7128_v18  ;;  %v2013_v14 = vrot.slane %v7128_v18, 7  ;;  %v2122_v3 = vrot.slane %v7128_v18, 1  ;;  %v7142_v48 = vpack.c.bf16 %v6670_v35, %v7128_v18 }
 0x331   :  { %8815 = vst [vmem:[#allocation82_spill] sm:$0xff] %v7142_v48  ;;  %v7153_v28 = vsel %vm8820_vm13, %v2057_v20, %v2013_v14  ;;  %v2076_v50 = vsel %vm8822_vm11, %v2013_v14, %v8821_v52  ;;  %v7161_v27 = vsel %vm8824_vm2, %v2122_v3, %v8823_v30  ;;  %4207 = vmatmul.msk.bf16.vlgmr.msra.gmra.mxu0 %vm7134_vm9, %v7142_v48  ;;  %v4863_v20 = vld [vmem:[%s7991_s5 + $0x128] sm:$0xff]  ;;  %vm8825_vm13 = vmmov %vm8824_vm2  ;;  %vm8828_vm11 = vcmp.ge.s32.totalorder %v5160_v21, 1 }
 0x332   :  { %v7174_v52 = vsel %vm8825_vm13, %v2120_v34, %v2122_v3  ;;  %v2077_v30 = vsel %vm6117_vm1, %v2076_v50, 0.0  ;;  %v2092_v14 = vsel %vm6121_vm4, %v7153_v28, 0.0  ;;  %v2157_v48 = vsel %vm6125_vm7, %v7161_v27, 0.0  ;;  %2800 = vmatpush.bf16.msrb.mxu0 %v4863_v20  ;;  %vm4408_vm2 = vmpackc.low %vm5264_vm12, %vm5255_vm10  ;;  %v8841_v20 = vld [vmem:[#allocation33_spill] sm:$0xff] }
 0x333   :  { %v4406_v32 = vpack.c.bf16 %v6685_v41, %v2076_v50  ;;  %v7185_v61 = vpack.c.bf16 %v2077_v30, %v2092_v14  ;;  %v7187_v18 = vpack.c.bf16 %v2142_v43, %v2157_v48  ;;  %v4427_v34 = vpack.c.bf16 %v7153_v28, %v7112_v55  ;;  %v4862_v41 = vld [vmem:[%s7991_s5 + $0x120] sm:$0xff]  ;;  %v8834_v43 = vld [vmem:[#allocation18_spill] sm:$0xff]  ;;  %vm4411_vm10 = vmpackc.low %vm8753_vm15, %vm5326_vm0 }
 0x334   :  { %v2156_v3 = vsel %vm6129_vm6, %v7174_v52, 0.0  ;;  %v4547_v38 = vpack.c.bf16 %v7161_v27, %v7174_v52  ;;  %vm8829_vm1 = vcmp.ge.s32.totalorder %v5163_v24, 1  ;;  %v8830_v50 = vpack.c.bf16 %v6728_v13, %v6702_v4  ;;  %v8831_v48 = vld [vmem:[#allocation89_spill] sm:$0xff]  ;;  %v4861_v4 = vld [vmem:[%s7991_s5 + $0x118] sm:$0xff]  ;;  %v8858_v30 = vld [vmem:[#allocation74_spill] sm:$0xff] }
 0x335   :  { %4407 = vmatmul.msk.bf16.vlgmr.msrb.gmra.mxu3 %vm4405_vm5, %v4406_v32  ;;  %v7194_v45 = vpack.c.bf16 %v2156_v3, %v2155_v23  ;;  %4263 = vmatmul.msk.bf16.vlgmr.msrb.gmra.mxu1 %vm7134_vm9, %v7185_v61  ;;  %vm4208_vm3 = vmpackc.low %vm8829_vm1, %vm8828_vm11  ;;  %vm8835_vm5 = vcmp.ge.s32.totalorder %v8834_v43, 1  ;;  %v8838_v13 = vpack.c.bf16 %v6783_v57, %v6757_v31  ;;  %v8839_v23 = vld [vmem:[#allocation31_spill] sm:$0xff]  ;;  %vm8842_vm11 = vcmp.ge.s32.totalorder %v8841_v20, 1  ;;  %v8849_v32 = vld [vmem:[#allocation49_spill] sm:$0xff] }
 0x336   :  { %4335 = vmatmul.msk.bf16.vlgmr.msrb.gmra.mxu2 %vm7134_vm9, %v7187_v18  ;;  %2801 = vmatpush.bf16.msrb.mxu0 %v4862_v41  ;;  %vm8833_vm9 = vcmp.ge.s32.totalorder %v8832_v1, 1  ;;  %vm8840_vm12 = vcmp.ge.s32.totalorder %v8839_v23, 1  ;;  %vm8845_vm0 = vnez %v8764_v36  ;;  %v4860_v31 = vld [vmem:[%s7991_s5 + $0x110] sm:$0xff]  ;;  %v8846_v57 = vpack.c.bf16 %v6841_v16, %v6814_v40  ;;  %v4859_v36 = vld [vmem:[%s7991_s5 + $0x108] sm:$0xff]  ;;  %v4889_v16 = vld [vmem:[%s7991_s5 + $0x1f8] sm:$0xff] }
 0x337   :  { %vm4211_vm13 = vmpackc.low %vm8835_vm5, %vm8833_vm9  ;;  %v8847_v14 = vld [vmem:[#allocation47_spill] sm:$0xff]  ;;  %vm8852_vm5 = vnez %v8777_v19  ;;  %v8853_v40 = vpack.c.bf16 %v6926_v10, %v6881_v5  ;;  %3244 = vmatpush.bf16.msra.mxu3 %v4889_v16  ;;  %v4887_v41 = vld [vmem:[%s7991_s5 + $0x1e8] sm:$0xff]  ;;  %v8862_v16 = vpack.c.bf16 %v7013_v22, %v6975_v29 }
 0x338   :  { %vm4214_vm1 = vmpackc.low %vm8842_vm11, %vm8840_vm12  ;;  %v4881_v19 = vld [vmem:[%s7991_s5 + $0x1b8] sm:$0xff]  ;;  %v4888_v5 = vld [vmem:[%s7991_s5 + $0x1f0] sm:$0xff] }
 0x339   :  { %vm4414_vm15 = vmpackc.low %vm8845_vm0, %vm8755_vm14  ;;  %vm8851_vm14 = vnez %v8766_v15  ;;  %v4873_v15 = vld [vmem:[%s7991_s5 + $0x178] sm:$0xff]  ;;  %v4872_v10 = vld [vmem:[%s7991_s5 + $0x170] sm:$0xff]  ;;  %3090 = vmatpush.bf16.msra.mxu2 %v4881_v19  ;;  %vm8860_vm0 = vnez %v8792_v9 }
 0x33a   :  { %2802 = vmatpush.bf16.msrb.mxu0 %v4861_v4  ;;  %2936 = vmatpush.bf16.msra.mxu1 %v4873_v15  ;;  %v4880_v3 = vld [vmem:[%s7991_s5 + $0x1b0] sm:$0xff]  ;;  %v4878_v9 = vld [vmem:[%s7991_s5 + $0x1a0] sm:$0xff]  ;;  %v4885_v15 = vld [vmem:[%s7991_s5 + $0x1d8] sm:$0xff] }
 0x33b   :  { %3245 = vmatpush.bf16.msra.mxu3 %v4888_v5  ;;  %v8854_v4 = vld [vmem:[#allocation63_spill] sm:$0xff]  ;;  %v4895_v28 = vld [vmem:[%s7991_s5 + $0x228] sm:$0xff] }
 0x33c   :  { %v4869_v19 = vld [vmem:[%s7991_s5 + $0x158] sm:$0xff]  ;;  %v4884_v29 = vld [vmem:[%s7991_s5 + $0x1d0] sm:$0xff] }
 0x33d   :  { %3091 = vmatpush.bf16.msra.mxu2 %v4880_v3  ;;  %v4877_v5 = vld [vmem:[%s7991_s5 + $0x198] sm:$0xff]  ;;  %v4868_v22 = vld [vmem:[%s7991_s5 + $0x150] sm:$0xff]  ;;  %v4883_v3 = vld [vmem:[%s7991_s5 + $0x1c8] sm:$0xff] }
 0x33e   :  { %2803 = vmatpush.bf16.msrb.mxu0 %v4860_v31  ;;  %2937 = vmatpush.bf16.msra.mxu1 %v4872_v10  ;;  %v8861_v31 = vld [vmem:[#allocation44_spill] sm:$0xff]  ;;  %v4876_v10 = vld [vmem:[%s7991_s5 + $0x190] sm:$0xff] }
 0x33f   :  { %3246 = vmatpush.bf16.msra.mxu3 %v4887_v41  ;;  %v8863_v41 = vld [vmem:[#allocation77_spill] sm:$0xff] }
 0x341   :  { %4210 = vmatmul.msk.bf16.gmra.mxu0 %vm4208_vm3, %v6694_v63  ;;  %3092 = vmatpush.bf16.msra.mxu2 %v4879_v47  ;;  %v8888_v47 = vld [vmem:[#allocation76_spill] sm:$0xff] }
 0x342   :  { %2804 = vmatpush.bf16.msrb.mxu0 %v4859_v36  ;;  %v4886_v36 = vld [vmem:[%s7991_s5 + $0x1e0] sm:$0xff] }
 0x343   :  { %3247 = vmatpush.bf16.msra.mxu3 %v4886_v36  ;;  %v8869_v36 = vld [vmem:[#allocation61_spill] sm:$0xff] }
 0x345   :  { %4410 = vmatmul.msk.bf16.gmra.mxu3 %vm4408_vm2, %v8830_v50  ;;  %4266 = vmatmul.msk.bf16.gmra.mxu1 %vm4208_vm3, %v6716_v56  ;;  %vm8850_vm2 = vcmp.ge.s32.totalorder %v8849_v32, 1  ;;  %v4871_v50 = vld [vmem:[%s7991_s5 + $0x168] sm:$0xff] }
 0x346   :  { %4338 = vmatmul.msk.bf16.gmra.mxu2 %vm4208_vm3, %v8831_v48  ;;  %vm8848_vm3 = vcmp.ge.s32.totalorder %v8847_v14, 1  ;;  %2938 = vmatpush.bf16.msra.mxu1 %v4871_v50  ;;  %v8865_v50 = vld [vmem:[#allocation85_spill] sm:$0xff] }
 0x347   :  { %vm4217_vm9 = vmpackc.low %vm8850_vm2, %vm8848_vm3  ;;  %3093 = vmatpush.bf16.msra.mxu2 %v4878_v9  ;;  %3248 = vmatpush.bf16.msra.mxu3 %v4885_v15  ;;  %vm8864_vm3 = vcmp.ge.s32.totalorder %v8863_v41, 1  ;;  %vm8866_vm2 = vcmp.ge.s32.totalorder %v8865_v50, 1  ;;  %v4882_v9 = vld [vmem:[%s7991_s5 + $0x1c0] sm:$0xff] }
 0x348   :  { %v4866_v15 = vld [vmem:[%s7991_s5 + $0x140] sm:$0xff] }
 0x34b   :  { %3094 = vmatpush.bf16.msra.mxu2 %v4877_v5  ;;  %3249 = vmatpush.bf16.msra.mxu3 %v4884_v29  ;;  %v8874_v5 = vld [vmem:[#allocation101_spill] sm:$0xff]  ;;  %v8876_v29 = vld [vmem:[#allocation107_spill] sm:$0xff] }
 0x34f   :  { %3095 = vmatpush.bf16.msra.mxu2 %v4876_v10  ;;  %3250 = vmatpush.bf16.msra.mxu3 %v4883_v3  ;;  %v8882_v10 = vld [vmem:[#allocation7_spill] sm:$0xff] }
 0x351   :  { %4213 = vmatmul.msk.bf16.gmra.mxu0 %vm4211_vm13, %v8836_v60 }
 0x353   :  { %3251 = vmatpush.bf16.msra.mxu3 %v4882_v9 }
 0x355   :  { %4413 = vmatmul.msk.bf16.gmra.mxu3 %vm4411_vm10, %v8838_v13  ;;  %4269 = vmatmul.msk.bf16.gmra.mxu1 %vm4211_vm13, %v6771_v59  ;;  %vm8855_vm10 = vcmp.ge.s32.totalorder %v8854_v4, 1  ;;  %v8856_v13 = vld [vmem:[#allocation64_spill] sm:$0xff] }
 0x356   :  { %4341 = vmatmul.msk.bf16.gmra.mxu2 %vm4211_vm13, %v6797_v62  ;;  %vm4417_vm13 = vmpackc.low %vm8852_vm5, %vm8851_vm14  ;;  %vm8857_vm12 = vcmp.ge.s32.totalorder %v8856_v13, 1  ;;  %vm8872_vm5 = vnez %v8806_v49  ;;  %v4874_v49 = vld [vmem:[%s7991_s5 + $0x180] sm:$0xff] }
 0x357   :  { %vm4220_vm11 = vmpackc.low %vm8857_vm12, %vm8855_vm10  ;;  %vm8875_vm10 = vcmp.ge.s32.totalorder %v8874_v5, 1  ;;  %vm8877_vm12 = vcmp.ge.s32.totalorder %v8876_v29, 1 }
 0x361   :  { %4216 = vmatmul.msk.bf16.gmra.mxu0 %vm4214_vm1, %v8843_v6 }
 0x365   :  { %4416 = vmatmul.msk.bf16.gmra.mxu3 %vm4414_vm15, %v8846_v57  ;;  %4272 = vmatmul.msk.bf16.gmra.mxu1 %vm4214_vm1, %v6829_v12  ;;  %v4858_v57 = vld [vmem:[%s7991_s5 + $0x100] sm:$0xff] }
 0x366   :  { %4344 = vmatmul.msk.bf16.gmra.mxu2 %vm4214_vm1, %v6855_v42  ;;  %vm8859_vm1 = vnez %v8858_v30  ;;  %2805 = vmatpush.bf16.msrb.mxu0 %v4858_v57  ;;  %v4867_v30 = vld [vmem:[%s7991_s5 + $0x148] sm:$0xff] }
 0x367   :  { %vm4420_vm15 = vmpackc.low %vm8860_vm0, %vm8859_vm1  ;;  %v4875_v57 = vld [vmem:[%s7991_s5 + $0x188] sm:$0xff]  ;;  %vm8878_vm1 = vnez %v8808_v53 }
 0x368   :  { %3096 = vmatpush.bf16.msra.mxu2 %v4875_v57  ;;  %vm4426_vm0 = vmpackc.low %vm6121_vm4, %vm8878_vm1  ;;  %vm8881_vm4 = vcmp.le.s32.totalorder %v8880_v2, 6  ;;  %v4894_v2 = vld [vmem:[%s7991_s5 + $0x220] sm:$0xff]  ;;  %vm8908_vm1 = vcmp.le.s32.totalorder %v8834_v43, 6 }
 0x369   :  { %v8916_v43 = vld [vmem:[#allocation5_spill] sm:$0xff] }
 0x36c   :  { %3097 = vmatpush.bf16.msra.mxu2 %v4874_v49 }
 0x371   :  { %4219 = vmatmul.msk.bf16.gmra.mxu0 %vm4217_vm9, %v6873_v51 }
 0x375   :  { %4419 = vmatmul.msk.bf16.gmra.mxu3 %vm4417_vm13, %v8853_v40  ;;  %4275 = vmatmul.msk.bf16.gmra.mxu1 %vm4217_vm9, %v6896_v8  ;;  %v4870_v40 = vld [vmem:[%s7991_s5 + $0x160] sm:$0xff] }
 0x376   :  { %4347 = vmatmul.msk.bf16.gmra.mxu2 %vm4217_vm9, %v6940_v44  ;;  %2939 = vmatpush.bf16.msra.mxu1 %v4870_v40  ;;  %vm7350_vm9 = vmpackc.low %vm8866_vm2, %vm8864_vm3  ;;  %v8870_v40 = vld [vmem:[#allocation96_spill] sm:$0xff] }
 0x377   :  { %vm8871_vm14 = vnez %v8870_v40 }
 0x378   :  { %vm4423_vm13 = vmpackc.low %vm8872_vm5, %vm8871_vm14  ;;  %vm8894_vm14 = vcmp.le.s32.totalorder %v5163_v24, 6  ;;  %v8902_v24 = vld [vmem:[#allocation81_spill] sm:$0xff] }
 0x37a   :  { %2940 = vmatpush.bf16.msra.mxu1 %v4869_v19  ;;  %v8873_v19 = vpack.c.bf16 %v7087_v0, %v7059_v39  ;;  %v4896_v39 = vld [vmem:[%s7991_s5 + $0x230] sm:$0xff] }
 0x37e   :  { %2941 = vmatpush.bf16.msra.mxu1 %v4868_v22  ;;  %v8879_v22 = vld [vmem:[#allocation69_spill] sm:$0xff] }
 0x37f   :  { %v2725_v53 = vpack.c.bf16 %v8879_v22, %v6670_v35  ;;  %v8890_v22 = vld [vmem:[#allocation75_spill] sm:$0xff] }
 0x381   :  { %4222 = vmatmul.msk.bf16.gmra.mxu0 %vm4220_vm11, %v8861_v31 }
 0x382   :  { %2942 = vmatpush.bf16.msra.mxu1 %v4867_v30  ;;  %v8889_v30 = vpack.c.bf16 %v8888_v47, %v6699_v25 }
 0x385   :  { %4422 = vmatmul.msk.bf16.gmra.mxu3 %vm4420_vm15, %v8862_v16  ;;  %4278 = vmatmul.msk.bf16.gmra.mxu1 %vm4220_vm11, %v6990_v11  ;;  %v4897_v16 = vld [vmem:[%s7991_s5 + $0x238] sm:$0xff]  ;;  %vm8883_vm15 = vcmp.le.s32.totalorder %v8882_v10, 6 }
 0x386   :  { %4350 = vmatmul.msk.bf16.gmra.mxu2 %vm4220_vm11, %v7039_v58  ;;  %3398 = vmatpush.bf16.msra.mxu0 %v4897_v16  ;;  %vm4226_vm11 = vmpackc.low %vm8877_vm12, %vm8875_vm10 }
 0x387   :  { %2943 = vmatpush.bf16.msra.mxu1 %v4866_v15  ;;  %vm7411_vm3 = vmpackc.low %vm8883_vm15, %vm8881_vm4 }
 0x38a   :  { %3399 = vmatpush.bf16.msra.mxu0 %v4896_v39 }
 0x38e   :  { %3400 = vmatpush.bf16.msra.mxu0 %v4895_v28  ;;  %v8897_v28 = vld [vmem:[#allocation16_spill] sm:$0xff] }
 0x391   :  { %4225 = vmatmul.msk.bf16.gmra.mxu0 %vm7350_vm9, %v8869_v36 }
 0x392   :  { %3401 = vmatpush.bf16.msra.mxu0 %v4894_v2 }
 0x395   :  { %4425 = vmatmul.msk.bf16.gmra.mxu3 %vm4423_vm13, %v8873_v19  ;;  %4281 = vmatmul.msk.bf16.gmra.mxu1 %vm7350_vm9, %v7074_v37  ;;  %vm8898_vm13 = vnez %v8897_v28  ;;  %v8913_v28 = vld [vmem:[#allocation39_spill] sm:$0xff] }
 0x396   :  { %4353 = vmatmul.msk.bf16.gmra.mxu2 %vm7350_vm9, %v7101_v26  ;;  %vm8914_vm15 = vnez %v8913_v28 }
 0x3a1   :  { %4228 = vmatmul.msk.bf16.gmra.mxu0 %vm4226_vm11, %v7109_v54 }
 0x3a5   :  { %4428 = vmatmul.msk.bf16.gmra.mxu3 %vm4426_vm0, %v4427_v34  ;;  %4284 = vmatmul.msk.bf16.gmra.mxu1 %vm4226_vm11, %v7126_v46  ;;  %v8886_v34 = vld [vmem:[#allocation10_spill] sm:$0xff] }
 0x3a6   :  { %4356 = vmatmul.msk.bf16.gmra.mxu2 %vm4226_vm11, %v7194_v45  ;;  %vm8887_vm2 = vnez %v8886_v34  ;;  %vm8907_vm11 = vcmp.le.s32.totalorder %v8832_v1, 6  ;;  %v8915_v1 = vld [vmem:[#allocation8_spill] sm:$0xff] }
 0x3a7   :  { %vm4525_vm9 = vmpackc.low %vm8887_vm2, %vm8817_vm8  ;;  %vm8893_vm8 = vcmp.le.s32.totalorder %v5160_v21, 6  ;;  %v8901_v21 = vld [vmem:[#allocation95_spill] sm:$0xff] }
 0x3a8   :  { %vm7440_vm5 = vmpackc.low %vm8894_vm14, %vm8893_vm8  ;;  %v8903_v47 = vpack.c.bf16 %v8901_v21, %v8902_v24  ;;  %v8917_v21 = vpack.c.bf16 %v8915_v1, %v8916_v43  ;;  %vm8922_vm8 = vcmp.le.s32.totalorder %v8841_v20, 6  ;;  %v8930_v20 = vld [vmem:[#allocation28_spill] sm:$0xff] }
 0x3a9   :  { %vm7471_vm0 = vmpackc.low %vm8908_vm1, %vm8907_vm11  ;;  %vm8935_vm11 = vcmp.le.s32.totalorder %v8847_v14, 6  ;;  %vm8936_vm1 = vcmp.le.s32.totalorder %v8849_v32, 6  ;;  %v8943_v14 = vld [vmem:[#allocation51_spill] sm:$0xff]  ;;  %v8944_v32 = vld [vmem:[#allocation22_spill] sm:$0xff] }
 0x3ae   :  { %v2296_v0 = vpop.f32.mrf.mxu0 }
 0x3b1   :  { %2806 = vmatmul.bf16.vlgmr.msrb.gmra.mxu0 %v2725_v53  ;;  %v8891_v53 = vld [vmem:[#allocation68_spill] sm:$0xff] }
 0x3b2   :  { %v2393_v55 = vpop.f32.mrf.mxu1  ;;  %v8892_v25 = vpack.c.bf16 %v8890_v22, %v8891_v53  ;;  %v8905_v22 = vld [vmem:[#allocation88_spill] sm:$0xff] }
 0x3b3   :  { %v2394_v35 = vadd.f32 %v2393_v55, %v2296_v0  ;;  %v8899_v55 = vld [vmem:[#allocation23_spill] sm:$0xff] }
 0x3b4   :  { %vm8900_vm10 = vnez %v8899_v55 }
 0x3b5   :  { %4671 = vmatmul.msk.bf16.vlgmr.msra.gmra.mxu3 %vm7411_vm3, %v6694_v63  ;;  %4527 = vmatmul.msk.bf16.vlgmr.msra.gmra.mxu1 %vm4525_vm9, %v8889_v30  ;;  %vm4528_vm12 = vmpackc.low %vm8900_vm10, %vm8898_vm13  ;;  %vm8921_vm9 = vcmp.le.s32.totalorder %v8839_v23, 6  ;;  %v8929_v23 = vld [vmem:[#allocation25_spill] sm:$0xff] }
 0x3b6   :  { %4599 = vmatmul.msk.bf16.vlgmr.msra.gmra.mxu2 %vm7411_vm3, %v6716_v56  ;;  %v2298_v57 = vpop.f32.mrf.mxu0  ;;  %vm7502_vm14 = vmpackc.low %vm8922_vm8, %vm8921_vm9  ;;  %vm8949_vm8 = vcmp.le.s32.totalorder %v8854_v4, 6  ;;  %v8957_v4 = vld [vmem:[#allocation60_spill] sm:$0xff] }
 0x3b8   :  { %v2669_v40 = vpop.f32.mrf.mxu3 }
 0x3b9   :  { %v2531_v17 = vpop.f32.mrf.mxu2 }
 0x3ba   :  { %v2571_v9 = vadd.f32 %v2531_v17, %v2394_v35  ;;  %v2395_v16 = vpop.f32.mrf.mxu1 }
 0x3bb   :  { %v2396_v15 = vadd.f32 %v2395_v16, %v2298_v57 }
 0x3bc   :  { %v7431_v49 = vadd.f32 %v2669_v40, %v2571_v9 }
 0x3be   :  { %v2301_v19 = vpop.f32.mrf.mxu0 }
 0x3c0   :  { %v2671_v39 = vpop.f32.mrf.mxu3 }
 0x3c1   :  { %v2533_v0 = vpop.f32.mrf.mxu2  ;;  %2811 = vmatmul.bf16.gmra.mxu0 %v8892_v25  ;;  %v4893_v25 = vld [vmem:[%s7991_s5 + $0x218] sm:$0xff] }
 0x3c2   :  { %v2572_v63 = vadd.f32 %v2533_v0, %v2396_v15  ;;  %v2398_v10 = vpop.f32.mrf.mxu1  ;;  %3402 = vmatpush.bf16.msra.mxu0 %v4893_v25  ;;  %v8925_v25 = vld [vmem:[#allocation48_spill] sm:$0xff] }
 0x3c3   :  { %v2399_v34 = vadd.f32 %v2398_v10, %v2301_v19  ;;  %v8911_v10 = vld [vmem:[#allocation32_spill] sm:$0xff]  ;;  %vm8926_vm13 = vnez %v8925_v25 }
 0x3c4   :  { %v7451_v35 = vadd.f32 %v2671_v39, %v2572_v63  ;;  %v8904_v63 = vld [vmem:[#allocation116_spill] sm:$0xff]  ;;  %vm8912_vm4 = vnez %v8911_v10 }
 0x3c5   :  { %4674 = vmatmul.msk.bf16.gmra.mxu3 %vm7440_vm5, %v8836_v60  ;;  %4530 = vmatmul.msk.bf16.gmra.mxu1 %vm4528_vm12, %v8903_v47  ;;  %v8906_v53 = vpack.c.bf16 %v8904_v63, %v8905_v22  ;;  %vm4531_vm2 = vmpackc.low %vm8914_vm15, %vm8912_vm4  ;;  %v4892_v22 = vld [vmem:[%s7991_s5 + $0x210] sm:$0xff] }
 0x3c6   :  { %4602 = vmatmul.msk.bf16.gmra.mxu2 %vm7440_vm5, %v6771_v59  ;;  %v2303_v30 = vpop.f32.mrf.mxu0  ;;  %3403 = vmatpush.bf16.msra.mxu0 %v4892_v22  ;;  %vm7533_vm4 = vmpackc.low %vm8936_vm1, %vm8935_vm11  ;;  %v8941_v22 = vld [vmem:[#allocation73_spill] sm:$0xff] }
 0x3c8   :  { %v2674_v57 = vpop.f32.mrf.mxu3 }
 0x3c9   :  { %v2536_v40 = vpop.f32.mrf.mxu2 }
 0x3ca   :  { %v2573_v17 = vadd.f32 %v2536_v40, %v2399_v34  ;;  %v2400_v9 = vpop.f32.mrf.mxu1 }
 0x3cb   :  { %v2401_v16 = vadd.f32 %v2400_v9, %v2303_v30 }
 0x3cc   :  { %v7462_v15 = vadd.f32 %v2674_v57, %v2573_v17 }
 0x3ce   :  { %v2306_v19 = vpop.f32.mrf.mxu0 }
 0x3d0   :  { %v2676_v39 = vpop.f32.mrf.mxu3 }
 0x3d1   :  { %v2538_v0 = vpop.f32.mrf.mxu2  ;;  %2816 = vmatmul.bf16.gmra.mxu0 %v8906_v53 }
 0x3d2   :  { %v2574_v60 = vadd.f32 %v2538_v0, %v2401_v16  ;;  %v2403_v2 = vpop.f32.mrf.mxu1  ;;  %v8918_v0 = vld [vmem:[#allocation29_spill] sm:$0xff] }
 0x3d3   :  { %v2404_v55 = vadd.f32 %v2403_v2, %v2306_v19  ;;  %v8927_v2 = vld [vmem:[#allocation55_spill] sm:$0xff] }
 0x3d4   :  { %v7482_v34 = vadd.f32 %v2676_v39, %v2574_v60  ;;  %v8919_v60 = vld [vmem:[#allocation20_spill] sm:$0xff]  ;;  %vm8928_vm10 = vnez %v8927_v2  ;;  %v8945_v2 = vpack.c.bf16 %v8943_v14, %v8944_v32 }
 0x3d5   :  { %4677 = vmatmul.msk.bf16.gmra.mxu3 %vm7471_vm0, %v8843_v6  ;;  %4533 = vmatmul.msk.bf16.gmra.mxu1 %vm4531_vm2, %v8917_v21  ;;  %v8920_v63 = vpack.c.bf16 %v8918_v0, %v8919_v60  ;;  %vm4534_vm12 = vmpackc.low %vm8928_vm10, %vm8926_vm13  ;;  %v4891_v0 = vld [vmem:[%s7991_s5 + $0x208] sm:$0xff]  ;;  %vm8942_vm2 = vnez %v8941_v22  ;;  %vm8950_vm13 = vcmp.le.s32.totalorder %v8856_v13, 6 }
 0x3d6   :  { %4605 = vmatmul.msk.bf16.gmra.mxu2 %vm7471_vm0, %v6829_v12  ;;  %v2308_v24 = vpop.f32.mrf.mxu0  ;;  %3404 = vmatpush.bf16.msra.mxu0 %v4891_v0  ;;  %vm7564_vm10 = vmpackc.low %vm8950_vm13, %vm8949_vm8  ;;  %v8958_v13 = vld [vmem:[#allocation46_spill] sm:$0xff]  ;;  %vm8969_vm13 = vnez %v8818_v7 }
 0x3d8   :  { %v2679_v47 = vpop.f32.mrf.mxu3 }
 0x3d9   :  { %v2541_v30 = vpop.f32.mrf.mxu2 }
 0x3da   :  { %v2575_v57 = vadd.f32 %v2541_v30, %v2404_v55  ;;  %v2405_v40 = vpop.f32.mrf.mxu1  ;;  %v8931_v55 = vpack.c.bf16 %v8929_v23, %v8930_v20 }
 0x3db   :  { %v2406_v17 = vadd.f32 %v2405_v40, %v2308_v24 }
 0x3dc   :  { %v7493_v9 = vadd.f32 %v2679_v47, %v2575_v57 }
 0x3de   :  { %v2311_v16 = vpop.f32.mrf.mxu0 }
 0x3e0   :  { %v2681_v19 = vpop.f32.mrf.mxu3 }
 0x3e1   :  { %v2543_v39 = vpop.f32.mrf.mxu2  ;;  %2821 = vmatmul.bf16.gmra.mxu0 %v8920_v63  ;;  %v8939_v63 = vld [vmem:[#allocation65_spill] sm:$0xff] }
 0x3e2   :  { %v2576_v6 = vadd.f32 %v2543_v39, %v2406_v17  ;;  %v2408_v53 = vpop.f32.mrf.mxu1  ;;  %v8933_v39 = vld [vmem:[#allocation35_spill] sm:$0xff]  ;;  %vm8940_vm15 = vnez %v8939_v63  ;;  %v8959_v63 = vpack.c.bf16 %v8957_v4, %v8958_v13 }
 0x3e3   :  { %v2409_v10 = vadd.f32 %v2408_v53, %v2311_v16  ;;  %vm4537_vm9 = vmpackc.low %vm8942_vm2, %vm8940_vm15  ;;  %vm8963_vm15 = vcmp.le.s32.totalorder %v8863_v41, 6  ;;  %vm8964_vm2 = vcmp.le.s32.totalorder %v8865_v50, 6  ;;  %v8970_v41 = vld [vmem:[#allocation54_spill] sm:$0xff] }
 0x3e4   :  { %v7513_v28 = vadd.f32 %v2681_v19, %v2576_v6  ;;  %v8932_v19 = vld [vmem:[#allocation30_spill] sm:$0xff] }
 0x3e5   :  { %4680 = vmatmul.msk.bf16.gmra.mxu3 %vm7502_vm14, %v6873_v51  ;;  %4536 = vmatmul.msk.bf16.gmra.mxu1 %vm4534_vm12, %v8931_v55  ;;  %v8934_v6 = vpack.c.bf16 %v8932_v19, %v8933_v39  ;;  %v8953_v39 = vld [vmem:[#allocation86_spill] sm:$0xff] }
 0x3e6   :  { %4608 = vmatmul.msk.bf16.gmra.mxu2 %vm7502_vm14, %v6896_v8  ;;  %v2313_v1 = vpop.f32.mrf.mxu0  ;;  %vm8954_vm12 = vnez %v8953_v39 }
 0x3e8   :  { %v2684_v43 = vpop.f32.mrf.mxu3 }
 0x3e9   :  { %v2546_v21 = vpop.f32.mrf.mxu2 }
 0x3ea   :  { %v2577_v24 = vadd.f32 %v2546_v21, %v2409_v10  ;;  %v2410_v47 = vpop.f32.mrf.mxu1 }
 0x3eb   :  { %v2411_v30 = vadd.f32 %v2410_v47, %v2313_v1 }
 0x3ec   :  { %v7524_v57 = vadd.f32 %v2684_v43, %v2577_v24 }
 0x3ee   :  { %v2316_v40 = vpop.f32.mrf.mxu0 }
 0x3f0   :  { %v2686_v17 = vpop.f32.mrf.mxu3 }
 0x3f1   :  { %v2548_v16 = vpop.f32.mrf.mxu2  ;;  %2826 = vmatmul.bf16.gmra.mxu0 %v8934_v6  ;;  %v8955_v6 = vld [vmem:[#allocation94_spill] sm:$0xff] }
 0x3f2   :  { %v2578_v51 = vadd.f32 %v2548_v16, %v2411_v30  ;;  %v2413_v60 = vpop.f32.mrf.mxu1  ;;  %vm8956_vm11 = vnez %v8955_v6 }
 0x3f3   :  { %v2414_v53 = vadd.f32 %v2413_v60, %v2316_v40  ;;  %v8946_v40 = vld [vmem:[#allocation41_spill] sm:$0xff]  ;;  %vm4540_vm1 = vmpackc.low %vm8956_vm11, %vm8954_vm12  ;;  %vm8976_vm11 = vcmp.le.s32.totalorder %v8874_v5, 6 }
 0x3f4   :  { %v7544_v25 = vadd.f32 %v2686_v17, %v2578_v51  ;;  %v8947_v17 = vld [vmem:[#allocation45_spill] sm:$0xff] }
 0x3f5   :  { %4683 = vmatmul.msk.bf16.gmra.mxu3 %vm7533_vm4, %v8861_v31  ;;  %4539 = vmatmul.msk.bf16.gmra.mxu1 %vm4537_vm9, %v8945_v2  ;;  %v8948_v16 = vpack.c.bf16 %v8946_v40, %v8947_v17  ;;  %v4890_v51 = vld [vmem:[%s7991_s5 + $0x200] sm:$0xff]  ;;  %vm7595_vm9 = vmpackc.low %vm8964_vm2, %vm8963_vm15 }
 0x3f6   :  { %4611 = vmatmul.msk.bf16.gmra.mxu2 %vm7533_vm4, %v6990_v11  ;;  %v2318_v10 = vpop.f32.mrf.mxu0  ;;  %3405 = vmatpush.bf16.msra.mxu0 %v4890_v51  ;;  %vm4546_vm2 = vmpackc.low %vm6125_vm7, %vm6129_vm6  ;;  %vm3707_vm7 = vcmask 1041409   ;;  %vm3709_vm6 = vcmask 1042434  }
 0x3f8   :  { %v2689_v23 = vpop.f32.mrf.mxu3 }
 0x3f9   :  { %v2551_v20 = vpop.f32.mrf.mxu2 }
 0x3fa   :  { %v2579_v55 = vadd.f32 %v2551_v20, %v2414_v53  ;;  %v2415_v1 = vpop.f32.mrf.mxu1 }
 0x3fb   :  { %v2416_v43 = vadd.f32 %v2415_v1, %v2318_v10 }
 0x3fc   :  { %v7555_v21 = vadd.f32 %v2689_v23, %v2579_v55 }
 0x3fe   :  { %v2321_v24 = vpop.f32.mrf.mxu0 }
 0x400   :  { %v2691_v47 = vpop.f32.mrf.mxu3 }
 0x401   :  { %v2553_v30 = vpop.f32.mrf.mxu2  ;;  %2831 = vmatmul.bf16.gmra.mxu0 %v8948_v16  ;;  %v8971_v16 = vld [vmem:[#allocation57_spill] sm:$0xff] }
 0x402   :  { %v2580_v31 = vadd.f32 %v2553_v30, %v2416_v43  ;;  %v2418_v19 = vpop.f32.mrf.mxu1  ;;  %v8960_v43 = vld [vmem:[#allocation67_spill] sm:$0xff]  ;;  %v8972_v50 = vpack.c.bf16 %v8970_v41, %v8971_v16 }
 0x403   :  { %v2419_v0 = vadd.f32 %v2418_v19, %v2321_v24  ;;  %v8961_v24 = vld [vmem:[#allocation38_spill] sm:$0xff] }
 0x404   :  { %v7575_v60 = vadd.f32 %v2691_v47, %v2580_v31  ;;  %v8962_v47 = vpack.c.bf16 %v8960_v43, %v8961_v24  ;;  %v8967_v31 = vld [vmem:[#allocation105_spill] sm:$0xff] }
 0x405   :  { %4686 = vmatmul.msk.bf16.gmra.mxu3 %vm7564_vm10, %v8869_v36  ;;  %4542 = vmatmul.msk.bf16.gmra.mxu1 %vm4540_vm1, %v8959_v63  ;;  %vm8968_vm8 = vnez %v8967_v31  ;;  %vm8977_vm1 = vcmp.le.s32.totalorder %v8876_v29, 6 }
 0x406   :  { %4614 = vmatmul.msk.bf16.gmra.mxu2 %vm7564_vm10, %v7074_v37  ;;  %v2323_v22 = vpop.f32.mrf.mxu0  ;;  %vm4543_vm12 = vmpackc.low %vm8969_vm13, %vm8968_vm8 }
 0x407   :  { %vm7621_vm15 = vmpackc.low %vm8977_vm1, %vm8976_vm11 }
 0x408   :  { %v2694_v53 = vpop.f32.mrf.mxu3 }
 0x409   :  { %v2556_v14 = vpop.f32.mrf.mxu2 }
 0x40a   :  { %v2581_v32 = vadd.f32 %v2556_v14, %v2419_v0  ;;  %v2420_v2 = vpop.f32.mrf.mxu1  ;;  %v8974_v14 = vld [vmem:[#allocation62_spill] sm:$0xff] }
 0x40b   :  { %v2421_v10 = vadd.f32 %v2420_v2, %v2323_v22 }
 0x40c   :  { %v7586_v23 = vadd.f32 %v2694_v53, %v2581_v32 }
 0x40e   :  { %v2326_v20 = vpop.f32.mrf.mxu0 }
 0x410   :  { %v2696_v55 = vpop.f32.mrf.mxu3 }
 0x411   :  { %v2558_v1 = vpop.f32.mrf.mxu2  ;;  %2836 = vmatmul.bf16.gmra.mxu0 %v8962_v47 }
 0x412   :  { %v2582_v36 = vadd.f32 %v2558_v1, %v2421_v10  ;;  %v2423_v30 = vpop.f32.mrf.mxu1  ;;  %v8981_v1 = vld [vmem:[#allocation82_spill] sm:$0xff] }
 0x413   :  { %v2424_v40 = vadd.f32 %v2423_v30, %v2326_v20 }
 0x414   :  { %v7603_v17 = vadd.f32 %v2696_v55, %v2582_v36 }
 0x415   :  { %4689 = vmatmul.msk.bf16.gmra.mxu3 %vm7595_vm9, %v7109_v54  ;;  %4545 = vmatmul.msk.bf16.gmra.mxu1 %vm4543_vm12, %v8972_v50  ;;  %v8973_v54 = vld [vmem:[#allocation83_spill] sm:$0xff] }
 0x416   :  { %4617 = vmatmul.msk.bf16.gmra.mxu2 %vm7595_vm9, %v7126_v46  ;;  %v2328_v51 = vpop.f32.mrf.mxu0  ;;  %v8975_v32 = vpack.c.bf16 %v8973_v54, %v8974_v14 }
 0x418   :  { %v2699_v19 = vpop.f32.mrf.mxu3 }
 0x419   :  { %v2561_v39 = vpop.f32.mrf.mxu2 }
 0x41a   :  { %v2583_v7 = vadd.f32 %v2561_v39, %v2424_v40  ;;  %v2425_v6 = vpop.f32.mrf.mxu1 }
 0x41b   :  { %v2426_v0 = vadd.f32 %v2425_v6, %v2328_v51 }
 0x41c   :  { %v2721_v4 = vadd.f32 %v2699_v19, %v2583_v7 }
 0x41e   :  { %v2331_v13 = vpop.f32.mrf.mxu0 }
 0x420   :  { %v2701_v63 = vpop.f32.mrf.mxu3 }
 0x421   :  { %v2563_v22 = vpop.f32.mrf.mxu2  ;;  %2841 = vmatmul.bf16.gmra.mxu0 %v8975_v32 }
 0x422   :  { %v2584_v53 = vadd.f32 %v2563_v22, %v2426_v0  ;;  %v2428_v2 = vpop.f32.mrf.mxu1 }
 0x423   :  { %v2429_v20 = vadd.f32 %v2428_v2, %v2331_v13 }
 0x424   :  { %v2722_v55 = vadd.f32 %v2701_v63, %v2584_v53 }
 0x425   :  { %4692 = vmatmul.msk.bf16.gmra.mxu3 %vm7621_vm15, %v8981_v1  ;;  %4548 = vmatmul.msk.bf16.gmra.mxu1 %vm4546_vm2, %v4547_v38 }
 0x426   :  { %4620 = vmatmul.msk.bf16.gmra.mxu2 %vm7621_vm15, %v7185_v61  ;;  %v2333_v5 = vpop.f32.mrf.mxu0 }
 0x428   :  { %v2704_v29 = vpop.f32.mrf.mxu3 }
 0x429   :  { %v2566_v33 = vpop.f32.mrf.mxu2 }
 0x42a   :  { %v2585_v36 = vadd.f32 %v2566_v33, %v2429_v20  ;;  %v2430_v43 = vpop.f32.mrf.mxu1 }
 0x42b   :  { %v2431_v24 = vadd.f32 %v2430_v43, %v2333_v5 }
 0x42c   :  { %v2723_v47 = vadd.f32 %v2704_v29, %v2585_v36 }
 0x42e   :  { %v2807_v30 = vpop.f32.mrf.mxu0 }
 0x42f   :  { %v2847_v31 = vadd.f32 %v2807_v30, %v7431_v49 }
 0x430   :  { %v2706_v27 = vpop.f32.mrf.mxu3 }
 0x431   :  { %v2568_v40 = vpop.f32.mrf.mxu2  ;;  %4743 = vmatmul.msk.bf16.vlgmr.msra.gmra.mxu0 %vm7411_vm3, %v8831_v48  ;;  %vm3711_vm3 = vcmask 1043459  }
 0x432   :  { %v2586_v41 = vadd.f32 %v2568_v40, %v2431_v24  ;;  %v7715_v40 = vld [vmem:[%s7993_s7] sm:$0xff] }
 0x434   :  { %v2724_v38 = vadd.f32 %v2706_v27, %v2586_v41  ;;  %v7720_v41 = vld [vmem:[%s7993_s7 + $0x40] sm:$0xff] }
 0x435   :  { %v7725_v27 = vld [vmem:[%s7993_s7 + $0x80] sm:$0xff] }
 0x436   :  { %v2809_v52 = vpop.f32.mrf.mxu0 }
 0x437   :  { %v2848_v61 = vadd.f32 %v2809_v52, %v7451_v35 }
 0x438   :  { %v3253_v8 = vpop.f32.mrf.mxu3 }
 0x439   :  { %v3099_v39 = vpop.f32.mrf.mxu2 }
 0x43e   :  { %v2812_v16 = vpop.f32.mrf.mxu0 }
 0x43f   :  { %v2849_v50 = vadd.f32 %v2812_v16, %v7462_v15 }
 0x441   :  { %4746 = vmatmul.msk.bf16.gmra.mxu0 %vm7440_vm5, %v6797_v62  ;;  %vm3718_vm5 = vcmask 1043456  }
 0x446   :  { %v2814_v51 = vpop.f32.mrf.mxu0 }
 0x447   :  { %v7648_v49 = vadd.f32 %v2814_v51, %v7482_v34  ;;  %v7743_v51 = vld [vmem:[%s7993_s7 + $0x48] sm:$0xff] }
 0x44e   :  { %v2817_v19 = vpop.f32.mrf.mxu0 }
 0x44f   :  { %v7651_v3 = vadd.f32 %v2817_v19, %v7493_v9  ;;  %v7748_v19 = vld [vmem:[%s7993_s7 + $0x88] sm:$0xff] }
 0x451   :  { %4749 = vmatmul.msk.bf16.gmra.mxu0 %vm7471_vm0, %v6855_v42  ;;  %vm3751_vm0 = vcmask 25600  }
 0x456   :  { %v2819_v48 = vpop.f32.mrf.mxu0 }
 0x457   :  { %v7657_v35 = vadd.f32 %v2819_v48, %v7513_v28  ;;  %v7753_v48 = vld [vmem:[%s7993_s7 + $0xc8] sm:$0xff] }
 0x45e   :  { %v2822_v15 = vpop.f32.mrf.mxu0 }
 0x45f   :  { %v7660_v56 = vadd.f32 %v2822_v15, %v7524_v57 }
 0x461   :  { %4752 = vmatmul.msk.bf16.gmra.mxu0 %vm7502_vm14, %v6940_v44  ;;  %v2945_v44 = vpop.f32.mrf.mxu1 }
 0x466   :  { %v2824_v62 = vpop.f32.mrf.mxu0 }
 0x467   :  { %v7666_v34 = vadd.f32 %v2824_v62, %v7544_v25 }
 0x469   :  { %v2947_v7 = vpop.f32.mrf.mxu1 }
 0x46e   :  { %v2827_v9 = vpop.f32.mrf.mxu0 }
 0x46f   :  { %v7669_v59 = vadd.f32 %v2827_v9, %v7555_v21 }
 0x471   :  { %4755 = vmatmul.msk.bf16.gmra.mxu0 %vm7533_vm4, %v7039_v58  ;;  %v2950_v11 = vpop.f32.mrf.mxu1 }
 0x472   :  { %v2987_v30 = vadd.f32 %v2950_v11, %v2849_v50 }
 0x476   :  { %v2829_v42 = vpop.f32.mrf.mxu0 }
 0x477   :  { %v7675_v28 = vadd.f32 %v2829_v42, %v7575_v60  ;;  %v3101_v60 = vpop.f32.mrf.mxu2 }
 0x479   :  { %v2952_v22 = vpop.f32.mrf.mxu1 }
 0x47e   :  { %v2832_v57 = vpop.f32.mrf.mxu0 }
 0x47f   :  { %v7678_v12 = vadd.f32 %v2832_v57, %v7586_v23  ;;  %v3104_v13 = vpop.f32.mrf.mxu2 }
 0x480   :  { %v3141_v16 = vadd.f32 %v3104_v13, %v2987_v30 }
 0x481   :  { %4758 = vmatmul.msk.bf16.gmra.mxu0 %vm7564_vm10, %v7101_v26  ;;  %v3255_v26 = vpop.f32.mrf.mxu3  ;;  %v2955_v2 = vpop.f32.mrf.mxu1 }
 0x482   :  { %v2989_v30 = vadd.f32 %v2955_v2, %v7651_v3  ;;  %v7805_v3 = vld [vmem:[%s7993_s7 + $0x98] sm:$0xff] }
 0x483   :  { %v7810_v2 = vld [vmem:[%s7993_s7 + $0xd8] sm:$0xff] }
 0x486   :  { %v2834_v25 = vpop.f32.mrf.mxu0 }
 0x487   :  { %v7684_v21 = vadd.f32 %v2834_v25, %v7603_v17  ;;  %v3106_v53 = vpop.f32.mrf.mxu2 }
 0x489   :  { %v7710_v24 = vpop.f32.mrf.mxu1 }
 0x48e   :  { %v2837_v58 = vpop.f32.mrf.mxu0 }
 0x48f   :  { %v7686_v6 = vadd.f32 %v2837_v58, %v2721_v4  ;;  %v3258_v4 = vpop.f32.mrf.mxu3  ;;  %v7700_v1 = vpop.f32.mrf.mxu2  ;;  %v2988_v58 = vadd.f32 %v2952_v22, %v7648_v49  ;;  %v7773_v49 = vld [vmem:[%s7993_s7 + $0x50] sm:$0xff] }
 0x490   :  { %v7783_v22 = vld [vmem:[%s7993_s7 + $0xd0] sm:$0xff] }
 0x491   :  { %4761 = vmatmul.msk.bf16.gmra.mxu0 %vm7595_vm9, %v7194_v45  ;;  %v2985_v45 = vadd.f32 %v2945_v44, %v2847_v31 }
 0x493   :  { %v3139_v14 = vadd.f32 %v3099_v39, %v2985_v45  ;;  %v3142_v45 = vadd.f32 %v3106_v53, %v2988_v58 }
 0x495   :  { %v3293_v10 = vadd.f32 %v3253_v8, %v3139_v14  ;;  %v2960_v14 = vpop.f32.mrf.mxu1 }
 0x496   :  { %v2839_v23 = vpop.f32.mrf.mxu0 }
 0x497   :  { %v7691_v0 = vadd.f32 %v2839_v23, %v2722_v55  ;;  %v3260_v32 = vpop.f32.mrf.mxu3  ;;  %v2986_v55 = vadd.f32 %v2947_v7, %v2848_v61  ;;  %v7736_v61 = vld [vmem:[%s7993_s7 + $0x8] sm:$0xff]  ;;  %v7738_v50 = vpop.f32.mrf.mxu2  ;;  %v3295_v7 = vadd.f32 %v3258_v4, %v3141_v16  ;;  %v7778_v4 = vld [vmem:[%s7993_s7 + $0x90] sm:$0xff] }
 0x499   :  { %v3140_v46 = vadd.f32 %v3101_v60, %v2986_v55 }
 0x49b   :  { %v3294_v33 = vadd.f32 %v3255_v26, %v3140_v46 }
 0x49e   :  { %v2842_v63 = vpop.f32.mrf.mxu0 }
 0x49f   :  { %v7693_v17 = vadd.f32 %v2842_v63, %v2723_v47  ;;  %v7708_v36 = vpop.f32.mrf.mxu3  ;;  %v3114_v53 = vpop.f32.mrf.mxu2 }
 0x4a1   :  { %4764 = vmatmul.msk.bf16.gmra.mxu0 %vm7621_vm15, %v7187_v18  ;;  %v7705_v18 = vld [vmem:[%s7992_s6] ss:$0 sm:$0xff] }
 0x4a6   :  { %v2844_v54 = vpop.f32.mrf.mxu0 }
 0x4a7   :  { %v7698_v37 = vadd.f32 %v2844_v54, %v2724_v38  ;;  %v7730_v38 = vld [vmem:[%s7993_s7 + $0xc0] sm:$0xff]  ;;  %v3265_v63 = vpop.f32.mrf.mxu3 }
 0x4ae   :  { %v3407_v20 = vpop.f32.mrf.mxu0 }
 0x4af   :  { %v3447_v5 = vadd.f32 %v3407_v20, %v3293_v10  ;;  %v7768_v20 = vld [vmem:[%s7993_s7 + $0x10] sm:$0xff] }
 0x4b1   :  { %v3467_v29 = vadd.f32 %v7705_v18, %v3447_v5  ;;  %v3296_v5 = vadd.f32 %v3260_v32, %v3142_v45  ;;  %v7794_v32 = vld [vmem:[%s7993_s7 + $0x18] sm:$0xff] }
 0x4b3   :  { %v3483_v31 = vmax.f32 %v3467_v29, 0.0 }
 0x4b5   :  { %v3531_v62 = vmul.f32 %v7715_v40, %v3483_v31  ;;  %v3539_v9 = vmul.f32 %v7720_v41, %v3483_v31  ;;  %v3547_v42 = vmul.f32 %v7725_v27, %v3483_v31  ;;  %v3555_v57 = vmul.f32 %v7730_v38, %v3483_v31 }
 0x4b6   :  { %v3409_v43 = vpop.f32.mrf.mxu0 }
 0x4b7   :  { %v3448_v47 = vadd.f32 %v3409_v43, %v3294_v33 }
 0x4b9   :  { %v3468_v52 = vadd.f32 %v7705_v18, %v3448_v47 }
 0x4bb   :  { %v3484_v15 = vmax.f32 %v3468_v52, 0.0 }
 0x4bd   :  { %v3532_v44 = vmul.f32 %v7736_v61, %v3484_v15  ;;  %v3540_v25 = vmul.f32 %v7743_v51, %v3484_v15  ;;  %v3548_v39 = vmul.f32 %v7748_v19, %v3484_v15  ;;  %v3556_v8 = vmul.f32 %v7753_v48, %v3484_v15 }
 0x4be   :  { %v3412_v60 = vpop.f32.mrf.mxu0 }
 0x4bf   :  { %v3595_v23 = vadd.f32 %v3532_v44, %v3531_v62  ;;  %v3608_v26 = vadd.f32 %v3540_v25, %v3539_v9  ;;  %v3621_v11 = vadd.f32 %v3548_v39, %v3547_v42  ;;  %v3634_v13 = vadd.f32 %v3556_v8, %v3555_v57  ;;  %v3268_v57 = vpop.f32.mrf.mxu3  ;;  %v7800_v44 = vld [vmem:[%s7993_s7 + $0x58] sm:$0xff]  ;;  %v2962_v25 = vpop.f32.mrf.mxu1 }
 0x4c0   :  { %v3449_v54 = vadd.f32 %v3412_v60, %v3295_v7  ;;  %v3143_v42 = vadd.f32 %v7700_v1, %v2989_v30  ;;  %v2990_v60 = vadd.f32 %v7710_v24, %v7657_v35  ;;  %v7829_v35 = vld [vmem:[%s7993_s7 + $0x60] sm:$0xff] }
 0x4c1   :  { %v7839_v24 = vld [vmem:[%s7993_s7 + $0xe0] sm:$0xff] }
 0x4c2   :  { %v3469_v10 = vadd.f32 %v7705_v18, %v3449_v54 }
 0x4c4   :  { %v3485_v55 = vmax.f32 %v3469_v10, 0.0 }
 0x4c6   :  { %v3533_v46 = vmul.f32 %v7768_v20, %v3485_v55  ;;  %v3541_v29 = vmul.f32 %v7773_v49, %v3485_v55  ;;  %v3549_v33 = vmul.f32 %v7778_v4, %v3485_v55  ;;  %v3557_v43 = vmul.f32 %v7783_v22, %v3485_v55  ;;  %v3414_v47 = vpop.f32.mrf.mxu0 }
 0x4c7   :  { %v3450_v31 = vadd.f32 %v3414_v47, %v3296_v5  ;;  %v3144_v5 = vadd.f32 %v7738_v50, %v2990_v60  ;;  %v3270_v50 = vpop.f32.mrf.mxu3 }
 0x4c8   :  { %v3596_v52 = vadd.f32 %v3595_v23, %v3533_v46  ;;  %v3609_v16 = vadd.f32 %v3608_v26, %v3541_v29  ;;  %v3622_v15 = vadd.f32 %v3621_v11, %v3549_v33  ;;  %v3635_v62 = vadd.f32 %v3634_v13, %v3557_v43  ;;  %v3116_v23 = vpop.f32.mrf.mxu2  ;;  %v7824_v29 = vld [vmem:[%s7993_s7 + $0x20] sm:$0xff]  ;;  %v2965_v43 = vpop.f32.mrf.mxu1 }
 0x4c9   :  { %v3470_v9 = vadd.f32 %v7705_v18, %v3450_v31  ;;  %v3297_v26 = vadd.f32 %v7708_v36, %v3143_v42  ;;  %v7834_v36 = vld [vmem:[%s7993_s7 + $0xa0] sm:$0xff]  ;;  %v3298_v47 = vadd.f32 %v3265_v63, %v3144_v5  ;;  %v7850_v63 = vld [vmem:[%s7993_s7 + $0x28] sm:$0xff] }
 0x4cb   :  { %v3486_v39 = vmax.f32 %v3470_v9, 0.0 }
 0x4cd   :  { %v3534_v1 = vmul.f32 %v7794_v32, %v3486_v39  ;;  %v3542_v8 = vmul.f32 %v7800_v44, %v3486_v39  ;;  %v3550_v58 = vmul.f32 %v7805_v3, %v3486_v39  ;;  %v3558_v7 = vmul.f32 %v7810_v2, %v3486_v39 }
 0x4ce   :  { %v3417_v11 = vpop.f32.mrf.mxu0 }
 0x4cf   :  { %v3597_v13 = vadd.f32 %v3596_v52, %v3534_v1  ;;  %v3610_v54 = vadd.f32 %v3609_v16, %v3542_v8  ;;  %v3623_v45 = vadd.f32 %v3622_v15, %v3550_v58  ;;  %v3636_v10 = vadd.f32 %v3635_v62, %v3558_v7 }
 0x4d0   :  { %v3451_v55 = vadd.f32 %v3417_v11, %v3297_v26  ;;  %v2991_v62 = vadd.f32 %v2960_v14, %v7660_v56  ;;  %v3119_v42 = vpop.f32.mrf.mxu2  ;;  %v7855_v26 = vld [vmem:[%s7993_s7 + $0x68] sm:$0xff] }
 0x4d1   :  { %v7860_v56 = vld [vmem:[%s7993_s7 + $0xa8] sm:$0xff] }
 0x4d2   :  { %v3471_v46 = vadd.f32 %v7705_v18, %v3451_v55  ;;  %v3145_v60 = vadd.f32 %v3114_v53, %v2991_v62  ;;  %v7865_v14 = vld [vmem:[%s7993_s7 + $0xe8] sm:$0xff]  ;;  %v3273_v55 = vpop.f32.mrf.mxu3 }
 0x4d4   :  { %v3487_v33 = vmax.f32 %v3471_v46, 0.0  ;;  %v3299_v5 = vadd.f32 %v3268_v57, %v3145_v60  ;;  %v7886_v57 = vld [vmem:[%s7993_s7 + $0xb0] sm:$0xff] }
 0x4d5   :  { %8984 = vst [vmem:[#allocation84_spill] sm:$0xff] %v7886_v57 }
 0x4d6   :  { %v3535_v30 = vmul.f32 %v7824_v29, %v3487_v33  ;;  %v3543_v31 = vmul.f32 %v7829_v35, %v3487_v33  ;;  %v3551_v52 = vmul.f32 %v7834_v36, %v3487_v33  ;;  %v3559_v16 = vmul.f32 %v7839_v24, %v3487_v33  ;;  %v3419_v15 = vpop.f32.mrf.mxu0  ;;  %v2967_v33 = vpop.f32.mrf.mxu1 }
 0x4d7   :  { %v3452_v9 = vadd.f32 %v3419_v15, %v3298_v47 }
 0x4d8   :  { %v3598_v39 = vadd.f32 %v3597_v13, %v3535_v30  ;;  %v3611_v1 = vadd.f32 %v3610_v54, %v3543_v31  ;;  %v3624_v8 = vadd.f32 %v3623_v45, %v3551_v52  ;;  %v3637_v58 = vadd.f32 %v3636_v10, %v3559_v16  ;;  %v3121_v62 = vpop.f32.mrf.mxu2 }
 0x4d9   :  { %v3472_v7 = vadd.f32 %v7705_v18, %v3452_v9  ;;  %v2992_v10 = vadd.f32 %v2962_v25, %v7666_v34  ;;  %v7881_v34 = vld [vmem:[%s7993_s7 + $0x70] sm:$0xff] }
 0x4da   :  { %8983 = vst [vmem:[#allocation80_spill] sm:$0xff] %v7881_v34  ;;  %v7891_v25 = vld [vmem:[%s7993_s7 + $0xf0] sm:$0xff] }
 0x4db   :  { %v3488_v11 = vmax.f32 %v3472_v7, 0.0  ;;  %v3146_v15 = vadd.f32 %v3116_v23, %v2992_v10  ;;  %v7876_v7 = vld [vmem:[%s7993_s7 + $0x30] sm:$0xff]  ;;  %8985 = vst [vmem:[#allocation72_spill] sm:$0xff] %v7891_v25  ;;  %v3275_v10 = vpop.f32.mrf.mxu3 }
 0x4dc   :  { %8982 = vst [vmem:[#allocation90_spill] sm:$0xff] %v7876_v7 }
 0x4dd   :  { %v3536_v13 = vmul.f32 %v7850_v63, %v3488_v11  ;;  %v3544_v53 = vmul.f32 %v7855_v26, %v3488_v11  ;;  %v3552_v54 = vmul.f32 %v7860_v56, %v3488_v11  ;;  %v3560_v45 = vmul.f32 %v7865_v14, %v3488_v11 }
 0x4de   :  { %v3422_v46 = vpop.f32.mrf.mxu0 }
 0x4df   :  { %v3599_v47 = vadd.f32 %v3598_v39, %v3536_v13  ;;  %v3612_v30 = vadd.f32 %v3611_v1, %v3544_v53  ;;  %v3625_v31 = vadd.f32 %v3624_v8, %v3552_v54  ;;  %v3638_v52 = vadd.f32 %v3637_v58, %v3560_v45  ;;  %v4907_v53 = vld [vmem:[%s7994_s8] ss:$0 sm:$0xff] }
 0x4e0   :  { %v3453_v16 = vadd.f32 %v3422_v46, %v3299_v5  ;;  %v2993_v39 = vadd.f32 %v2965_v43, %v7669_v59  ;;  %v3300_v1 = vadd.f32 %v3270_v50, %v3146_v15  ;;  %3732 = vperm.xlu1 %4900, %v4907_v53   ;;  %v2970_v43 = vpop.f32.mrf.mxu1  ;;  %v7905_v15 = vld [vmem:[%s7993_s7 + $0x38] sm:$0xff] }
 0x4e1   :  { %8986 = vst [vmem:[#allocation103_spill] sm:$0xff] %v7905_v15 }
 0x4e2   :  { %v3473_v9 = vadd.f32 %v7705_v18, %v3453_v16  ;;  %v3147_v54 = vadd.f32 %v3119_v42, %v2993_v39  ;;  %v7915_v42 = vld [vmem:[%s7993_s7 + $0xb8] sm:$0xff] }
 0x4e3   :  { %8988 = vst [vmem:[#allocation108_spill] sm:$0xff] %v7915_v42 }
 0x4e4   :  { %v3489_v23 = vmax.f32 %v3473_v9, 0.0  ;;  %v7910_v9 = vld [vmem:[%s7993_s7 + $0x78] sm:$0xff] }
 0x4e5   :  { %8987 = vst [vmem:[#allocation102_spill] sm:$0xff] %v7910_v9 }
 0x4e6   :  { %v3537_v8 = vmul.f32 %v7876_v7, %v3489_v23  ;;  %v3545_v58 = vmul.f32 %v7881_v34, %v3489_v23  ;;  %v3553_v60 = vmul.f32 %v7886_v57, %v3489_v23  ;;  %v3561_v11 = vmul.f32 %v7891_v25, %v3489_v23  ;;  %v3424_v13 = vpop.f32.mrf.mxu0 }
 0x4e7   :  { %v3454_v45 = vadd.f32 %v3424_v13, %v3300_v1 }
 0x4e8   :  { %v3600_v5 = vadd.f32 %v3599_v47, %v3537_v8  ;;  %v3613_v46 = vadd.f32 %v3612_v30, %v3545_v58  ;;  %v3626_v59 = vadd.f32 %v3625_v31, %v3553_v60  ;;  %v3639_v50 = vadd.f32 %v3638_v52, %v3561_v11  ;;  %v7920_v47 = vld [vmem:[%s7993_s7 + $0xf8] sm:$0xff]  ;;  %v3124_v31 = vpop.f32.mrf.mxu2  ;;  %v2972_v7 = vpop.f32.mrf.mxu1  ;;  %s4935_s7 = smov [#allocation2]  }
 0x4e9   :  { %v3474_v16 = vadd.f32 %v7705_v18, %v3454_v45  ;;  %8989 = vst [vmem:[#allocation100_spill] sm:$0xff] %v7920_v47  ;;  %v3301_v52 = vadd.f32 %v3273_v55, %v3147_v54  ;;  %v2994_v58 = vadd.f32 %v2967_v33, %v7675_v28  ;;  %v2995_v54 = vadd.f32 %v2970_v43, %v7678_v12  ;;  %s3758_s26 = sshll.u32 %s4935_s7, 4  ;;  %s3759_s26 = int_to_ptr.vmem [resolvable:$true] %s3758_s26 }
 0x4eb   :  { %v3490_v30 = vmax.f32 %v3474_v16, 0.0  ;;  %v3148_v57 = vadd.f32 %v3121_v62, %v2994_v58 }
 0x4ed   :  { %v3538_v23 = vmul.f32 %v7905_v15, %v3490_v30  ;;  %v3546_v39 = vmul.f32 %v7910_v9, %v3490_v30  ;;  %v3554_v1 = vmul.f32 %v7915_v42, %v3490_v30  ;;  %v3562_v8 = vmul.f32 %v7920_v47, %v3490_v30  ;;  %v3278_v15 = vpop.f32.mrf.mxu3 }
 0x4ee   :  { %v3427_v60 = vpop.f32.mrf.mxu0 }
 0x4ef   :  { %v3601_v11 = vadd.f32 %v3600_v5, %v3538_v23  ;;  %v3614_v13 = vadd.f32 %v3613_v46, %v3546_v39  ;;  %v3627_v53 = vadd.f32 %v3626_v59, %v3554_v1  ;;  %v3455_v45 = vadd.f32 %v3427_v60, %v3301_v52 }
 0x4f0   :  { %v3640_v25 = vadd.f32 %v3639_v50, %v3562_v8  ;;  %v3149_v5 = vadd.f32 %v3124_v31, %v2995_v54  ;;  %v3302_v46 = vadd.f32 %v3275_v10, %v3148_v57  ;;  %v3126_v59 = vpop.f32.mrf.mxu2  ;;  %v2996_v1 = vadd.f32 %v2972_v7, %v7684_v21 }
 0x4f1   :  { %v3602_v16 = vrot.slane %v3601_v11, 4  ;;  %v3615_v34 = vrot.slane %v3614_v13, 4  ;;  %v3628_v55 = vrot.slane %v3627_v53, 4  ;;  %v3475_v42 = vadd.f32 %v7705_v18, %v3455_v45 }
 0x4f2   :  { %v3641_v9 = vrot.slane %v3640_v25, 4 }
 0x4f3   :  { %v3603_v30 = vadd.f32 %v3602_v16, %v3601_v11  ;;  %v3616_v47 = vadd.f32 %v3615_v34, %v3614_v13  ;;  %v3629_v28 = vadd.f32 %v3628_v55, %v3627_v53  ;;  %v3491_v12 = vmax.f32 %v3475_v42, 0.0 }
 0x4f4   :  { %v3642_v33 = vadd.f32 %v3641_v9, %v3640_v25  ;;  %v3303_v11 = vadd.f32 %v3278_v15, %v3149_v5  ;;  %v2975_v15 = vpop.f32.mrf.mxu1 }
 0x4f5   :  { %v3604_v50 = vrot.slane %v3603_v30, 2  ;;  %v3617_v62 = vrot.slane %v3616_v47, 2  ;;  %v3630_v23 = vrot.slane %v3629_v28, 2  ;;  %v3563_v31 = vmul.f32 %v7715_v40, %v3491_v12  ;;  %v3280_v42 = vpop.f32.mrf.mxu3 }
 0x4f6   :  { %v3429_v52 = vpop.f32.mrf.mxu0  ;;  %v3643_v39 = vrot.slane %v3642_v33, 2  ;;  %v3571_v13 = vmul.f32 %v7720_v41, %v3491_v12  ;;  %v3579_v21 = vmul.f32 %v7725_v27, %v3491_v12 }
 0x4f7   :  { %v3456_v43 = vadd.f32 %v3429_v52, %v3302_v46  ;;  %v3605_v8 = vadd.f32 %v3604_v50, %v3603_v30  ;;  %v3618_v58 = vadd.f32 %v3617_v62, %v3616_v47  ;;  %v3631_v60 = vadd.f32 %v3630_v23, %v3629_v28 }
 0x4f8   :  { %v3644_v45 = vadd.f32 %v3643_v39, %v3642_v33  ;;  %v3587_v47 = vmul.f32 %v7730_v38, %v3491_v12  ;;  %v3129_v50 = vpop.f32.mrf.mxu2  ;;  %v3150_v23 = vadd.f32 %v3126_v59, %v2996_v1  ;;  %v2997_v59 = vadd.f32 %v2975_v15, %v7686_v6 }
 0x4f9   :  { %v3476_v34 = vadd.f32 %v7705_v18, %v3456_v43  ;;  %v3606_v57 = vrot.slane %v3605_v8, 1  ;;  %v3619_v25 = vrot.slane %v3618_v58, 1  ;;  %v3632_v10 = vrot.slane %v3631_v60, 1 }
 0x4fa   :  { %v3645_v9 = vrot.slane %v3644_v45, 1  ;;  %v3304_v12 = vadd.f32 %v3280_v42, %v3150_v23 }
 0x4fb   :  { %v3492_v7 = vmax.f32 %v3476_v34, 0.0  ;;  %v3607_v53 = vadd.f32 %v3606_v57, %v3605_v8  ;;  %v3620_v16 = vadd.f32 %v3619_v25, %v3618_v58  ;;  %v3633_v55 = vadd.f32 %v3632_v10, %v3631_v60 }
 0x4fc   :  { %v3646_v41 = vadd.f32 %v3645_v9, %v3644_v45  ;;  %v2977_v1 = vpop.f32.mrf.mxu1 }
 0x4fd   :  { %v3564_v54 = vmul.f32 %v7736_v61, %v3492_v7  ;;  %v3572_v30 = vmul.f32 %v7743_v51, %v3492_v7  ;;  %v3580_v28 = vmul.f32 %v7748_v19, %v3492_v7  ;;  %v3588_v40 = vmul.f32 %v7753_v48, %v3492_v7  ;;  %v3283_v43 = vpop.f32.mrf.mxu3 }
 0x4fe   :  { %v3432_v33 = vpop.f32.mrf.mxu0  ;;  %v3708_v27 = vsel %vm3707_vm7, %v3620_v16, %v3607_v53  ;;  %v2998_v6 = vadd.f32 %v2977_v1, %v7691_v0 }
 0x4ff   :  { %v3647_v5 = vadd.f32 %v3564_v54, %v3563_v31  ;;  %v3660_v38 = vadd.f32 %v3572_v30, %v3571_v13  ;;  %v3673_v46 = vadd.f32 %v3580_v28, %v3579_v21  ;;  %v3686_v52 = vadd.f32 %v3588_v40, %v3587_v47 }
 0x500   :  { %v3457_v62 = vadd.f32 %v3432_v33, %v3303_v11  ;;  %v3710_v61 = vsel %vm3709_vm6, %v3633_v55, %v3708_v27  ;;  %v3151_v13 = vadd.f32 %v3129_v50, %v2997_v59  ;;  %v3131_v21 = vpop.f32.mrf.mxu2 }
 0x501   :  { %v3712_v51 = vsel %vm3711_vm3, %v3646_v41, %v3710_v61  ;;  %v3152_v28 = vadd.f32 %v3131_v21, %v2998_v6 }
 0x502   :  { %v3477_v19 = vadd.f32 %v7705_v18, %v3457_v62  ;;  %v3719_v48 = vsel %vm3718_vm5, %v3712_v51, 0.0  ;;  %v3305_v42 = vadd.f32 %v3283_v43, %v3151_v13 }
 0x503   :  { %3720 = vadd.xlane.f32.xlu0 %v3719_v48 }
 0x504   :  { %v3493_v39 = vmax.f32 %v3477_v19, 0.0  ;;  %v2980_v40 = vpop.f32.mrf.mxu1 }
 0x505   :  { %v3285_v54 = vpop.f32.mrf.mxu3 }
 0x506   :  { %v3565_v8 = vmul.f32 %v7768_v20, %v3493_v39  ;;  %v3573_v58 = vmul.f32 %v7773_v49, %v3493_v39  ;;  %v3581_v60 = vmul.f32 %v7778_v4, %v3493_v39  ;;  %v3589_v45 = vmul.f32 %v7783_v22, %v3493_v39  ;;  %v3434_v34 = vpop.f32.mrf.mxu0 }
 0x507   :  { %v3458_v11 = vadd.f32 %v3434_v34, %v3304_v12  ;;  %v3306_v41 = vadd.f32 %v3285_v54, %v3152_v28 }
 0x508   :  { %v3648_v57 = vadd.f32 %v3647_v5, %v3565_v8  ;;  %v3661_v25 = vadd.f32 %v3660_v38, %v3573_v58  ;;  %v3674_v10 = vadd.f32 %v3673_v46, %v3581_v60  ;;  %v3687_v9 = vadd.f32 %v3686_v52, %v3589_v45  ;;  %v3134_v33 = vpop.f32.mrf.mxu2 }
 0x509   :  { %v3478_v31 = vadd.f32 %v7705_v18, %v3458_v11  ;;  %v2999_v38 = vadd.f32 %v2980_v40, %v7693_v17 }
 0x50b   :  { %v3494_v20 = vmax.f32 %v3478_v31, 0.0  ;;  %v3153_v19 = vadd.f32 %v3134_v33, %v2999_v38  ;;  %v8993_v31 = vld [vmem:[#allocation72_spill] sm:$0xff] }
 0x50c   :  { %v2982_v48 = vpop.f32.mrf.mxu1 }
 0x50d   :  { %v3566_v49 = vmul.f32 %v7794_v32, %v3494_v20  ;;  %v3574_v4 = vmul.f32 %v7800_v44, %v3494_v20  ;;  %v3582_v22 = vmul.f32 %v7805_v3, %v3494_v20  ;;  %v3590_v7 = vmul.f32 %v7810_v2, %v3494_v20  ;;  %v3288_v51 = vpop.f32.mrf.mxu3 }
 0x50e   :  { %v3437_v47 = vpop.f32.mrf.mxu0  ;;  %v3000_v17 = vadd.f32 %v2982_v48, %v7698_v37  ;;  %v3307_v43 = vadd.f32 %v3288_v51, %v3153_v19 }
 0x50f   :  { %v3649_v53 = vadd.f32 %v3648_v57, %v3566_v49  ;;  %v3662_v16 = vadd.f32 %v3661_v25, %v3574_v4  ;;  %v3675_v55 = vadd.f32 %v3674_v10, %v3582_v22  ;;  %v3688_v15 = vadd.f32 %v3687_v9, %v3590_v7  ;;  %v8990_v25 = vld [vmem:[#allocation90_spill] sm:$0xff]  ;;  %v8991_v10 = vld [vmem:[#allocation80_spill] sm:$0xff] }
 0x510   :  { %v3459_v30 = vadd.f32 %v3437_v47, %v3305_v42  ;;  %v3136_v12 = vpop.f32.mrf.mxu2  ;;  %v8992_v9 = vld [vmem:[#allocation84_spill] sm:$0xff]  ;;  %v8994_v47 = vld [vmem:[#allocation103_spill] sm:$0xff] }
 0x511   :  { %v3154_v1 = vadd.f32 %v3136_v12, %v3000_v17 }
 0x512   :  { %v3479_v32 = vadd.f32 %v7705_v18, %v3459_v30  ;;  %v8997_v30 = vld [vmem:[#allocation100_spill] sm:$0xff] }
 0x514   :  { %v3495_v44 = vmax.f32 %v3479_v32, 0.0 }
 0x516   :  { %v3567_v3 = vmul.f32 %v7824_v29, %v3495_v44  ;;  %v3575_v2 = vmul.f32 %v7829_v35, %v3495_v44  ;;  %v3583_v0 = vmul.f32 %v7834_v36, %v3495_v44  ;;  %v3591_v27 = vmul.f32 %v7839_v24, %v3495_v44  ;;  %v3439_v5 = vpop.f32.mrf.mxu0 }
 0x517   :  { %v3460_v46 = vadd.f32 %v3439_v5, %v3306_v41 }
 0x518   :  { %v3650_v52 = vadd.f32 %v3649_v53, %v3567_v3  ;;  %v3663_v50 = vadd.f32 %v3662_v16, %v3575_v2  ;;  %v3676_v62 = vadd.f32 %v3675_v55, %v3583_v0  ;;  %v3689_v61 = vadd.f32 %v3688_v15, %v3591_v27  ;;  %v8995_v16 = vld [vmem:[#allocation102_spill] sm:$0xff]  ;;  %v8996_v15 = vld [vmem:[#allocation108_spill] sm:$0xff] }
 0x519   :  { %v3480_v23 = vadd.f32 %v7705_v18, %v3460_v46 }
 0x51b   :  { %v3496_v29 = vmax.f32 %v3480_v23, 0.0 }
 0x51d   :  { %v3568_v35 = vmul.f32 %v7850_v63, %v3496_v29  ;;  %v3576_v36 = vmul.f32 %v7855_v26, %v3496_v29  ;;  %v3584_v24 = vmul.f32 %v7860_v56, %v3496_v29  ;;  %v3592_v39 = vmul.f32 %v7865_v14, %v3496_v29  ;;  %v3290_v63 = vpop.f32.mrf.mxu3 }
 0x51e   :  { %v3442_v8 = vpop.f32.mrf.mxu0  ;;  %v3308_v26 = vadd.f32 %v3290_v63, %v3154_v1 }
 0x51f   :  { %v3651_v58 = vadd.f32 %v3650_v52, %v3568_v35  ;;  %v3664_v60 = vadd.f32 %v3663_v50, %v3576_v36  ;;  %v3677_v45 = vadd.f32 %v3676_v62, %v3584_v24  ;;  %v3690_v34 = vadd.f32 %v3689_v61, %v3592_v39 }
 0x520   :  { %v3461_v59 = vadd.f32 %v3442_v8, %v3307_v43 }
 0x522   :  { %v3481_v11 = vadd.f32 %v7705_v18, %v3461_v59 }
 0x524   :  { %v3497_v57 = vmax.f32 %v3481_v11, 0.0 }
 0x526   :  { %v3569_v56 = vmul.f32 %v8990_v25, %v3497_v57  ;;  %v3577_v14 = vmul.f32 %v8991_v10, %v3497_v57  ;;  %v3585_v37 = vmul.f32 %v8992_v9, %v3497_v57  ;;  %v3593_v13 = vmul.f32 %v8993_v31, %v3497_v57  ;;  %v3444_v21 = vpop.f32.mrf.mxu0 }
 0x527   :  { %v3462_v20 = vadd.f32 %v3444_v21, %v3308_v26  ;;  %v8998_v57 = vlaneseq }
 0x528   :  { %v3652_v49 = vadd.f32 %v3651_v58, %v3569_v56  ;;  %v3665_v4 = vadd.f32 %v3664_v60, %v3577_v14  ;;  %v3678_v22 = vadd.f32 %v3677_v45, %v3585_v37  ;;  %v3691_v7 = vadd.f32 %v3690_v34, %v3593_v13 }
 0x529   :  { %v3482_v6 = vadd.f32 %v7705_v18, %v3462_v20  ;;  %v4934_v45 = vmov 0   ;;  %v3746_v26 = vand.u32 127, %v8998_v57 }
 0x52a   :  { %4901 = vset.pattern.permute.xlu1 %v4934_v45  ;;  %4902 = vset.pattern.permute.xlu2 %v4934_v45 }
 0x52b   :  { %v3498_v42 = vmax.f32 %v3482_v6, 0.0  ;;  %4903 = vset.pattern.permute.xlu0 %v4934_v45 }
 0x52d   :  { %v3570_v53 = vmul.f32 %v8994_v47, %v3498_v42  ;;  %v3578_v55 = vmul.f32 %v8995_v16, %v3498_v42  ;;  %v3586_v54 = vmul.f32 %v8996_v15, %v3498_v42  ;;  %v3594_v28 = vmul.f32 %v8997_v30, %v3498_v42 }
 0x52f   :  { %v3653_v40 = vadd.f32 %v3652_v49, %v3570_v53  ;;  %v3666_v32 = vadd.f32 %v3665_v4, %v3578_v55  ;;  %v3679_v33 = vadd.f32 %v3678_v22, %v3586_v54  ;;  %v3692_v44 = vadd.f32 %v3691_v7, %v3594_v28 }
 0x531   :  { %v3654_v41 = vrot.slane %v3653_v40, 4  ;;  %v3667_v3 = vrot.slane %v3666_v32, 4  ;;  %v3680_v2 = vrot.slane %v3679_v33, 4  ;;  %v3693_v0 = vrot.slane %v3692_v44, 4 }
 0x533   :  { %v3655_v27 = vadd.f32 %v3654_v41, %v3653_v40  ;;  %v3668_v5 = vadd.f32 %v3667_v3, %v3666_v32  ;;  %v3681_v18 = vadd.f32 %v3680_v2, %v3679_v33  ;;  %v3694_v38 = vadd.f32 %v3693_v0, %v3692_v44 }
 0x535   :  { %v3656_v46 = vrot.slane %v3655_v27, 2  ;;  %v3669_v52 = vrot.slane %v3668_v5, 2  ;;  %v3682_v50 = vrot.slane %v3681_v18, 2  ;;  %v3695_v62 = vrot.slane %v3694_v38, 2 }
 0x537   :  { %v3657_v61 = vadd.f32 %v3656_v46, %v3655_v27  ;;  %v3670_v23 = vadd.f32 %v3669_v52, %v3668_v5  ;;  %v3683_v51 = vadd.f32 %v3682_v50, %v3681_v18  ;;  %v3696_v19 = vadd.f32 %v3695_v62, %v3694_v38 }
 0x539   :  { %v3658_v48 = vrot.slane %v3657_v61, 1  ;;  %v3671_v29 = vrot.slane %v3670_v23, 1  ;;  %v3684_v35 = vrot.slane %v3683_v51, 1  ;;  %v3697_v36 = vrot.slane %v3696_v19, 1 }
 0x53b   :  { %v3659_v24 = vadd.f32 %v3658_v48, %v3657_v61  ;;  %v3672_v39 = vadd.f32 %v3671_v29, %v3670_v23  ;;  %v3685_v17 = vadd.f32 %v3684_v35, %v3683_v51  ;;  %v3698_v12 = vadd.f32 %v3697_v36, %v3696_v19 }
 0x53d   :  { %v3713_v43 = vsel %vm3707_vm7, %v3672_v39, %v3659_v24 }
 0x53e   :  { %v3714_v8 = vsel %vm3709_vm6, %v3685_v17, %v3713_v43 }
 0x53f   :  { %v3715_v58 = vsel %vm3711_vm3, %v3698_v12, %v3714_v8 }
 0x540   :  { %v3722_v60 = vsel %vm3718_vm5, %v3715_v58, 0.0 }
 0x541   :  { %3723 = vadd.xlane.f32.xlu0 %v3722_v60 }
 0x552   :  { %v3733_v34 = vpop.permute.xlu1 %3732 }
 0x576   :  { %v3721_v59 = vpop.xlane.xlu0 %3720 }
 0x577   :  { %v3735_v1 = vadd.f32 %v3733_v34, %v3721_v59 }
 0x579   :  { %3740 = vperm.xlu1 %4901, %v3735_v1  }
 0x5b4   :  { %v3724_v11 = vpop.xlane.xlu0 %3723 }
 0x5b5   :  { %v3736_v63 = vadd.f32 %v3733_v34, %v3724_v11 }
 0x5b7   :  { %3743 = vperm.xlu2 %4902, %v3736_v63  }
 0x5eb   :  { %v3741_v25 = vpop.permute.xlu1 %3740 }
 0x5ec   :  { %v3747_v10 = vperm.slane %v3741_v25, %v3746_v26 }
 0x611   :  { %v3744_v56 = vpop.permute.xlu2 %3743 }
 0x612   :  { %v3748_v14 = vperm.slane %v3744_v56, %v3746_v26 }
 0x614   :  { %v3749_v9 = vsel %vm3707_vm7, %v3748_v14, %v3747_v10 }
 0x615   :  { %3752 = vst.msk [vmem:[#allocation2] sm:$0x3] %vm3751_vm0, %v3749_v9 }
 0x616   :  { %3763 = dma.vmem_to_hbm [thread:$0]  %s3759_s26, 32, %s3761_s28, [#allocation3]  }
 0x617   :  { %4932 = dma.done.wait [#allocation3], 32  }
 0x618   :  { %4933 = vsyncadd [#allocation3], 4294967264 }
 0x619   :  { %3768 = vsyncpa [#allocation3], 1 }

</bundles_post_ra>
